<compile_context>
chip_gen: v7x
topology: tpu7x:2x2x1
jax: 0.10.0
libtpu: 0.0.40
codegen_flags: <defaults>
</compile_context>

<pallas_src>
import functools

import jax
import jax.numpy as jnp
from jax.experimental import pallas as pl
from jax.experimental.pallas import tpu as pltpu


def decoder_kernel(tok_ref, emb_ref, h0_ref, encp_ref, enct_ref, mask_ref,
                   wc_ref, bc_ref, wg_ref, bg_ref, wo_ref, bo_ref,
                   logp_ref, hid_ref, attn_ref,
                   emb_scr, *, T, B, H):
    O = emb_ref.shape[0]
    TB = T * B

    # --- precompute ALL T*B step embeddings with one MXU matmul (off the serial chain) ---
    tok = tok_ref[...]                                                   # (T*B, 1) int32
    onehot = (jax.lax.broadcasted_iota(jnp.int32, (TB, O), 1) == tok).astype(jnp.float32)
    emb_scr[...] = jnp.dot(onehot, emb_ref[...],
                           preferred_element_type=jnp.float32)           # (T*B, H)

    # --- resident operands, loaded once ---
    encp = encp_ref[...]          # (LP, H)  zero-padded encoder outputs
    enct = enct_ref[...]          # (H, LP)  pre-transposed encoder outputs
    mask = mask_ref[...]          # (1, LP)  0 on valid positions, -1e30 on padding
    wc, bc = wc_ref[...], bc_ref[...]
    wg, bg = wg_ref[...], bg_ref[...]
    wo, bo = wo_ref[...], bo_ref[...]

    def step(t, h):
        # --- dot-product attention over (lane-padded) encoder positions ---
        scores = jnp.dot(h, enct, preferred_element_type=jnp.float32) + mask   # (B, LP)
        m = jnp.max(scores, axis=-1, keepdims=True)
        e = jnp.exp(scores - m)
        attn = e / jnp.sum(e, axis=-1, keepdims=True)   # exact divide; padded lanes == 0
        attn_ref[t] = attn

        # --- context vector ---
        ctx = jnp.dot(attn, encp, preferred_element_type=jnp.float32)          # (B, H)

        # --- attn_combine on [emb | ctx] -> one (B,2H)@(2H,H) matmul, then ReLU ---
        # dropout(p=0.1) is identity in eval mode.
        emb_t = emb_scr[pl.ds(pl.multiple_of(t * B, B), B), :]                 # (B, H)
        x = jnp.maximum(
            jnp.dot(jnp.concatenate([emb_t, ctx], axis=1), wc,
                    preferred_element_type=jnp.float32) + bc, 0.0)             # (B, H)

        # --- fused GRU step: ONE (B,2H)@(2H,4H) matmul ---
        # columns: [0:H] = gi_r+gh_r, [H:2H] = gi_z+gh_z, [2H:3H] = gi_n, [3H:4H] = gh_n
        g = jnp.dot(jnp.concatenate([x, h], axis=1), wg,
                    preferred_element_type=jnp.float32) + bg                   # (B, 4H)
        r = jax.nn.sigmoid(g[:, 0 * H:1 * H])
        z = jax.nn.sigmoid(g[:, 1 * H:2 * H])
        n = jnp.tanh(g[:, 2 * H:3 * H] + r * g[:, 3 * H:4 * H])
        h_new = (1.0 - z) * n + z * h                                          # (B, H)
        hid_ref[t] = h_new

        # --- output projection (lane-padded to OP) + log_softmax ---
        logits = jnp.dot(h_new, wo, preferred_element_type=jnp.float32) + bo   # (B, OP)
        lm = jnp.max(logits, axis=-1, keepdims=True)
        sh = logits - lm
        logp_ref[t] = sh - jnp.log(jnp.sum(jnp.exp(sh), axis=-1, keepdims=True))
        return h_new

    jax.lax.fori_loop(0, T, step, h0_ref[...], unroll=True)


def pack_params(emb_table, w_combine, b_combine, w_ih, w_hh, b_ih, b_hh, w_out, b_out):
    """Pre-transpose / fuse weights and lane-pad the output projection."""
    H = emb_table.shape[1]
    O = w_out.shape[0]
    OP = max(128, ((O + 127) // 128) * 128)

    wih_t = w_ih.T            # (H, 3H), column blocks [r | z | n]
    whh_t = w_hh.T            # (H, 3H)
    zeros = jnp.zeros((H, H), jnp.float32)
    # Fused GRU RHS (2H, 4H): rows 0:H multiply x, rows H:2H multiply h.
    wg = jnp.concatenate([
        jnp.concatenate([wih_t[:, :H], wih_t[:, H:2 * H], wih_t[:, 2 * H:], zeros], axis=1),
        jnp.concatenate([whh_t[:, :H], whh_t[:, H:2 * H], zeros, whh_t[:, 2 * H:]], axis=1),
    ], axis=0)
    bg = jnp.concatenate([b_ih[:, :H] + b_hh[:, :H],
                          b_ih[:, H:2 * H] + b_hh[:, H:2 * H],
                          b_ih[:, 2 * H:], b_hh[:, 2 * H:]], axis=1)    # (1, 4H)

    w_out_pad = jnp.concatenate([w_out.T, jnp.zeros((H, OP - O), jnp.float32)], axis=1)
    # pad bias = -1e30 so padded lanes contribute exp(.)=0 to the log_softmax sum
    b_out_pad = jnp.concatenate([b_out, jnp.full((1, OP - O), -1e30, jnp.float32)], axis=1)

    return dict(
        emb_table=emb_table,
        w_combine_t=w_combine.T, b_combine=b_combine,   # (2H, H), (1, H)
        wg=wg, bg=bg,                                   # (2H, 4H), (1, 4H)
        w_out_pad=w_out_pad, b_out_pad=b_out_pad)       # (H, OP), (1, OP)


def attn_decoder_decode(tokens, hidden0, encoder_outputs, params):
    """Run T sequential decoder steps for B batched sequences in one kernel launch.

    tokens: (T, B) int32, hidden0: (B, H), encoder_outputs: (L, H).
    Returns (log_probs (T,B,O), hidden_per_step (T,B,H), attn_weights (T,B,L)).
    """
    T, B = tokens.shape
    O, H = params["emb_table"].shape
    L = encoder_outputs.shape[0]
    OP = params["w_out_pad"].shape[1]
    LP = max(128, ((L + 127) // 128) * 128)

    # Lane-pad / pre-transpose encoder outputs; additive mask kills padded positions.
    enc_pad = jnp.zeros((LP, H), jnp.float32).at[:L].set(encoder_outputs)
    enc_t = enc_pad.T                                                   # (H, LP)
    mask = jnp.where(jnp.arange(LP)[None, :] < L, 0.0, -1e30).astype(jnp.float32)  # (1, LP)
    tok_flat = tokens.reshape(T * B, 1).astype(jnp.int32)

    kernel = functools.partial(decoder_kernel, T=T, B=B, H=H)
    const2 = lambda i: (0, 0)      # resident: single grid step, single DMA each
    const3 = lambda i: (0, 0, 0)

    grid_spec = pltpu.PrefetchScalarGridSpec(
        num_scalar_prefetch=0,
        grid=(1,),                                      # single program: loop is in-kernel
        in_specs=[
            pl.BlockSpec((T * B, 1), const2),           # token ids (all steps)
            pl.BlockSpec((O, H), const2),               # embedding table
            pl.BlockSpec((B, H), const2),               # initial hidden
            pl.BlockSpec((LP, H), const2),              # encoder outputs (padded)
            pl.BlockSpec((H, LP), const2),              # encoder outputs transposed
            pl.BlockSpec((1, LP), const2),              # attention pad mask
            pl.BlockSpec((2 * H, H), const2),           # W_combine^T
            pl.BlockSpec((1, H), const2),               # b_combine
            pl.BlockSpec((2 * H, 4 * H), const2),       # fused GRU weight
            pl.BlockSpec((1, 4 * H), const2),           # fused GRU bias
            pl.BlockSpec((H, OP), const2),              # W_out^T (lane padded)
            pl.BlockSpec((1, OP), const2),              # b_out   (lane padded)
        ],
        out_specs=(
            pl.BlockSpec((T, B, OP), const3),           # log-probs (padded), resident
            pl.BlockSpec((T, B, H), const3),            # hidden per step, resident
            pl.BlockSpec((T, B, LP), const3),           # attention weights (padded), resident
        ),
        scratch_shapes=[pltpu.VMEM((T * B, H), jnp.float32)],   # precomputed embeddings
    )

    logp_pad, hid_seq, attn_pad = pl.pallas_call(
        kernel,
        grid_spec=grid_spec,
        out_shape=(
            jax.ShapeDtypeStruct((T, B, OP), jnp.float32),
            jax.ShapeDtypeStruct((T, B, H), jnp.float32),
            jax.ShapeDtypeStruct((T, B, LP), jnp.float32),
        ),
        compiler_params=pltpu.CompilerParams(
            dimension_semantics=("arbitrary",)),
    )(tok_flat, params["emb_table"], hidden0, enc_pad, enc_t, mask,
      params["w_combine_t"], params["b_combine"],
      params["wg"], params["bg"],
      params["w_out_pad"], params["b_out_pad"])

    return logp_pad[:, :, :O], hid_seq, attn_pad[:, :, :L]


def reference_decode(tokens, hidden0, encoder_outputs, raw):
    """Pure-JAX reference: the PyTorch forward applied T times (eval mode)."""
    H = hidden0.shape[1]
    h = hidden0
    logps, hids, attns = [], [], []
    for t in range(tokens.shape[0]):
        emb = raw["emb_table"][tokens[t]]                       # (B, H)
        scores = h @ encoder_outputs.T                          # (B, L)
        attn = jax.nn.softmax(scores, axis=1)
        ctx = attn @ encoder_outputs
        comb = jnp.concatenate([emb, ctx], axis=1) @ raw["w_combine"].T + raw["b_combine"]
        x = jax.nn.relu(comb)
        gi = x @ raw["w_ih"].T + raw["b_ih"]
        gh = h @ raw["w_hh"].T + raw["b_hh"]
        r = jax.nn.sigmoid(gi[:, :H] + gh[:, :H])
        z = jax.nn.sigmoid(gi[:, H:2 * H] + gh[:, H:2 * H])
        n = jnp.tanh(gi[:, 2 * H:] + r * gh[:, 2 * H:])
        h = (1.0 - z) * n + z * h
        logits = h @ raw["w_out"].T + raw["b_out"]
        logps.append(jax.nn.log_softmax(logits, axis=1))
        hids.append(h)
        attns.append(attn)
    return jnp.stack(logps), jnp.stack(hids), jnp.stack(attns)


if __name__ == "__main__":
    hidden_size = 32   # H
    output_size = 20   # vocab / O
    max_length = 10    # L (encoder positions)
    batch = 8          # B: independent sequences (beam) sharing one encoding
    steps = 8          # T: decoder steps fused into one kernel launch

    key = jax.random.PRNGKey(0)
    ks = jax.random.split(key, 12)

    # deterministic synthetic parameters (shapes match the nn.Module __init__)
    emb_table = 0.1 * jax.random.normal(ks[0], (output_size, hidden_size), jnp.float32)
    w_combine = 0.1 * jax.random.normal(ks[1], (hidden_size, 2 * hidden_size), jnp.float32)
    b_combine = 0.1 * jax.random.normal(ks[2], (1, hidden_size), jnp.float32)
    w_ih = 0.1 * jax.random.normal(ks[3], (3 * hidden_size, hidden_size), jnp.float32)
    w_hh = 0.1 * jax.random.normal(ks[4], (3 * hidden_size, hidden_size), jnp.float32)
    b_ih = 0.1 * jax.random.normal(ks[5], (1, 3 * hidden_size), jnp.float32)
    b_hh = 0.1 * jax.random.normal(ks[6], (1, 3 * hidden_size), jnp.float32)
    w_out = 0.1 * jax.random.normal(ks[7], (output_size, hidden_size), jnp.float32)
    b_out = 0.1 * jax.random.normal(ks[8], (1, output_size), jnp.float32)

    params = pack_params(emb_table, w_combine, b_combine,
                         w_ih, w_hh, b_ih, b_hh, w_out, b_out)
    raw = dict(emb_table=emb_table, w_combine=w_combine, b_combine=b_combine,
               w_ih=w_ih, w_hh=w_hh, b_ih=b_ih, b_hh=b_hh,
               w_out=w_out, b_out=b_out)

    # example inputs: T steps of B token ids, B hidden states, one encoding
    tokens = jax.random.randint(ks[9], (steps, batch), 0, output_size, jnp.int32)
    hidden0 = 0.1 * jax.random.normal(ks[10], (batch, hidden_size), jnp.float32)
    encoder_outputs = jax.random.normal(ks[11], (max_length, hidden_size), jnp.float32)

    logp, hid, attn = attn_decoder_decode(tokens, hidden0, encoder_outputs, params)
    jax.block_until_ready((logp, hid, attn))

    # correctness check against pure-JAX reference (per-step module semantics)
    r_logp, r_hid, r_attn = reference_decode(tokens, hidden0, encoder_outputs, raw)

    assert logp.shape == (steps, batch, output_size)
    assert hid.shape == (steps, batch, hidden_size)
    assert attn.shape == (steps, batch, max_length)
    assert jnp.allclose(logp, r_logp, atol=2e-3, rtol=2e-3), \
        float(jnp.max(jnp.abs(logp - r_logp)))
    assert jnp.allclose(hid, r_hid, atol=2e-3, rtol=2e-3), \
        float(jnp.max(jnp.abs(hid - r_hid)))
    assert jnp.allclose(attn, r_attn, atol=2e-3, rtol=2e-3), \
        float(jnp.max(jnp.abs(attn - r_attn)))

    print("KERNEL_OK")
</pallas_src>

<mosaic_0001>
module attributes {stable_mosaic.version = 11 : i64} {
  func.func @decoder_kernel(%arg0: i32, %arg1: memref<64x1xi32, #tpu.memory_space<vmem>>, %arg2: memref<20x32xf32, #tpu.memory_space<vmem>>, %arg3: memref<8x32xf32, #tpu.memory_space<vmem>>, %arg4: memref<128x32xf32, #tpu.memory_space<vmem>>, %arg5: memref<32x128xf32, #tpu.memory_space<vmem>>, %arg6: memref<1x128xf32, #tpu.memory_space<vmem>>, %arg7: memref<64x32xf32, #tpu.memory_space<vmem>>, %arg8: memref<1x32xf32, #tpu.memory_space<vmem>>, %arg9: memref<64x128xf32, #tpu.memory_space<vmem>>, %arg10: memref<1x128xf32, #tpu.memory_space<vmem>>, %arg11: memref<32x128xf32, #tpu.memory_space<vmem>>, %arg12: memref<1x128xf32, #tpu.memory_space<vmem>>, %arg13: memref<8x8x128xf32, #tpu.memory_space<vmem>>, %arg14: memref<8x8x32xf32, #tpu.memory_space<vmem>>, %arg15: memref<8x8x128xf32, #tpu.memory_space<vmem>>, %arg16: memref<64x32xf32, #tpu.memory_space<vmem>>) attributes {dimension_semantics = [#tpu.dimension_semantics<arbitrary>], iteration_bounds = array<i64: 1>, scalar_prefetch = 0 : i64, scratch_operands = 1 : i64, tpu.core_type = #tpu.core_type<tc>, window_params = [{pipeline_mode = #tpu.pipeline_mode<synchronous>, transform_indices = @transform_0, window_bounds = array<i64: 64, 1>}, {pipeline_mode = #tpu.pipeline_mode<synchronous>, transform_indices = @transform_1, window_bounds = array<i64: 20, 32>}, {pipeline_mode = #tpu.pipeline_mode<synchronous>, transform_indices = @transform_2, window_bounds = array<i64: 8, 32>}, {pipeline_mode = #tpu.pipeline_mode<synchronous>, transform_indices = @transform_3, window_bounds = array<i64: 128, 32>}, {pipeline_mode = #tpu.pipeline_mode<synchronous>, transform_indices = @transform_4, window_bounds = array<i64: 32, 128>}, {pipeline_mode = #tpu.pipeline_mode<synchronous>, transform_indices = @transform_5, window_bounds = array<i64: 1, 128>}, {pipeline_mode = #tpu.pipeline_mode<synchronous>, transform_indices = @transform_6, window_bounds = array<i64: 64, 32>}, {pipeline_mode = #tpu.pipeline_mode<synchronous>, transform_indices = @transform_7, window_bounds = array<i64: 1, 32>}, {pipeline_mode = #tpu.pipeline_mode<synchronous>, transform_indices = @transform_8, window_bounds = array<i64: 64, 128>}, {pipeline_mode = #tpu.pipeline_mode<synchronous>, transform_indices = @transform_9, window_bounds = array<i64: 1, 128>}, {pipeline_mode = #tpu.pipeline_mode<synchronous>, transform_indices = @transform_10, window_bounds = array<i64: 32, 128>}, {pipeline_mode = #tpu.pipeline_mode<synchronous>, transform_indices = @transform_11, window_bounds = array<i64: 1, 128>}, {pipeline_mode = #tpu.pipeline_mode<synchronous>, transform_indices = @transform_12, window_bounds = array<i64: 8, 8, 128>}, {pipeline_mode = #tpu.pipeline_mode<synchronous>, transform_indices = @transform_13, window_bounds = array<i64: 8, 8, 32>}, {pipeline_mode = #tpu.pipeline_mode<synchronous>, transform_indices = @transform_14, window_bounds = array<i64: 8, 8, 128>}]} {
    %c0 = arith.constant 0 : index
    %c0_0 = arith.constant 0 : index
    %0 = vector.load %arg1[%c0, %c0_0] : memref<64x1xi32, #tpu.memory_space<vmem>>, vector<64x1xi32>
    %1 = tpu.iota {dimensions = array<i32: 1>} : vector<64x20xi32>
    %2 = vector.broadcast %0 : vector<64x1xi32> to vector<64x20xi32>
    %3 = arith.cmpi eq, %1, %2 : vector<64x20xi32>
    %4 = arith.extui %3 : vector<64x20xi1> to vector<64x20xi32>
    %5 = arith.sitofp %4 : vector<64x20xi32> to vector<64x20xf32>
    %c0_1 = arith.constant 0 : index
    %c0_2 = arith.constant 0 : index
    %6 = vector.load %arg2[%c0_1, %c0_2] : memref<20x32xf32, #tpu.memory_space<vmem>>, vector<20x32xf32>
    %cst = arith.constant dense<0.000000e+00> : vector<64x32xf32>
    %7 = tpu.matmul %5, %6, %cst {dimension_numbers = #tpu.dot_dimension_numbers<[1], [0], [0], [1], [0, 0, 1, 1], [], []>} : vector<64x20xf32>, vector<20x32xf32>, vector<64x32xf32> -> vector<64x32xf32>
    %c0_3 = arith.constant 0 : index
    %c0_4 = arith.constant 0 : index
    %8 = vector.load %arg16[%c0_3, %c0_4] : memref<64x32xf32, #tpu.memory_space<vmem>>, vector<64x32xf32>
    tpu.vector_store %arg16[%c0_3, %c0_4], %7 {strides = array<i32>} : memref<64x32xf32, #tpu.memory_space<vmem>>, vector<64x32xf32>,
    %c0_5 = arith.constant 0 : index
    %c0_6 = arith.constant 0 : index
    %9 = vector.load %arg4[%c0_5, %c0_6] : memref<128x32xf32, #tpu.memory_space<vmem>>, vector<128x32xf32>
    %c0_7 = arith.constant 0 : index
    %c0_8 = arith.constant 0 : index
    %10 = vector.load %arg5[%c0_7, %c0_8] : memref<32x128xf32, #tpu.memory_space<vmem>>, vector<32x128xf32>
    %c0_9 = arith.constant 0 : index
    %c0_10 = arith.constant 0 : index
    %11 = vector.load %arg6[%c0_9, %c0_10] : memref<1x128xf32, #tpu.memory_space<vmem>>, vector<1x128xf32>
    %c0_11 = arith.constant 0 : index
    %c0_12 = arith.constant 0 : index
    %12 = vector.load %arg7[%c0_11, %c0_12] : memref<64x32xf32, #tpu.memory_space<vmem>>, vector<64x32xf32>
    %c0_13 = arith.constant 0 : index
    %c0_14 = arith.constant 0 : index
    %13 = vector.load %arg8[%c0_13, %c0_14] : memref<1x32xf32, #tpu.memory_space<vmem>>, vector<1x32xf32>
    %c0_15 = arith.constant 0 : index
    %c0_16 = arith.constant 0 : index
    %14 = vector.load %arg9[%c0_15, %c0_16] : memref<64x128xf32, #tpu.memory_space<vmem>>, vector<64x128xf32>
    %c0_17 = arith.constant 0 : index
    %c0_18 = arith.constant 0 : index
    %15 = vector.load %arg10[%c0_17, %c0_18] : memref<1x128xf32, #tpu.memory_space<vmem>>, vector<1x128xf32>
    %c0_19 = arith.constant 0 : index
    %c0_20 = arith.constant 0 : index
    %16 = vector.load %arg11[%c0_19, %c0_20] : memref<32x128xf32, #tpu.memory_space<vmem>>, vector<32x128xf32>
    %c0_21 = arith.constant 0 : index
    %c0_22 = arith.constant 0 : index
    %17 = vector.load %arg12[%c0_21, %c0_22] : memref<1x128xf32, #tpu.memory_space<vmem>>, vector<1x128xf32>
    %c0_23 = arith.constant 0 : index
    %c0_24 = arith.constant 0 : index
    %18 = vector.load %arg3[%c0_23, %c0_24] : memref<8x32xf32, #tpu.memory_space<vmem>>, vector<8x32xf32>
    %c0_i32 = arith.constant 0 : i32
    %cst_25 = arith.constant dense<0.000000e+00> : vector<8x128xf32>
    %19 = tpu.matmul %18, %10, %cst_25 {dimension_numbers = #tpu.dot_dimension_numbers<[1], [0], [0], [1], [0, 0, 1, 1], [], []>} : vector<8x32xf32>, vector<32x128xf32>, vector<8x128xf32> -> vector<8x128xf32>
    %20 = vector.broadcast %11 : vector<1x128xf32> to vector<8x128xf32>
    %21 = arith.addf %19, %20 : vector<8x128xf32>
    %cst_26 = arith.constant dense<0xFF800000> : vector<8xf32>
    %22 = vector.multi_reduction <maximumf>, %21, %cst_26 [1] : vector<8x128xf32> to vector<8xf32>
    %23 = vector.shape_cast %22 : vector<8xf32> to vector<8x1xf32>
    %24 = vector.broadcast %23 : vector<8x1xf32> to vector<8x128xf32>
    %25 = arith.subf %21, %24 : vector<8x128xf32>
    %26 = math.exp %25 : vector<8x128xf32>
    %cst_27 = arith.constant dense<0.000000e+00> : vector<8xf32>
    %27 = vector.multi_reduction <add>, %26, %cst_27 [1] : vector<8x128xf32> to vector<8xf32>
    %28 = vector.shape_cast %27 : vector<8xf32> to vector<8x1xf32>
    %29 = vector.broadcast %28 : vector<8x1xf32> to vector<8x128xf32>
    %30 = arith.divf %26, %29 : vector<8x128xf32>
    %31 = arith.index_cast %c0_i32 : i32 to index
    %c0_28 = arith.constant 0 : index
    %c0_29 = arith.constant 0 : index
    %32 = vector.load %arg15[%31, %c0_28, %c0_29] : memref<8x8x128xf32, #tpu.memory_space<vmem>>, vector<1x8x128xf32>
    %33 = vector.shape_cast %32 : vector<1x8x128xf32> to vector<8x128xf32>
    %34 = vector.shape_cast %30 : vector<8x128xf32> to vector<1x8x128xf32>
    tpu.vector_store %arg15[%31, %c0_28, %c0_29], %34 {strides = array<i32>} : memref<8x8x128xf32, #tpu.memory_space<vmem>>, vector<1x8x128xf32>,
    %cst_30 = arith.constant dense<0.000000e+00> : vector<8x32xf32>
    %35 = tpu.matmul %30, %9, %cst_30 {dimension_numbers = #tpu.dot_dimension_numbers<[1], [0], [0], [1], [0, 0, 1, 1], [], []>} : vector<8x128xf32>, vector<128x32xf32>, vector<8x32xf32> -> vector<8x32xf32>
    %c8_i32 = arith.constant 8 : i32
    %36 = arith.muli %c0_i32, %c8_i32 : i32
    %37 = tpu.assume_multiple %36, 8 : i32
    %38 = arith.index_cast %37 : i32 to index
    %c0_31 = arith.constant 0 : index
    %39 = vector.load %arg16[%38, %c0_31] : memref<64x32xf32, #tpu.memory_space<vmem>>, vector<8x32xf32>
    %40 = tpu.concatenate %39, %35 in 1 : vector<8x32xf32>, vector<8x32xf32> -> vector<8x64xf32>
    %cst_32 = arith.constant dense<0.000000e+00> : vector<8x32xf32>
    %41 = tpu.matmul %40, %12, %cst_32 {dimension_numbers = #tpu.dot_dimension_numbers<[1], [0], [0], [1], [0, 0, 1, 1], [], []>} : vector<8x64xf32>, vector<64x32xf32>, vector<8x32xf32> -> vector<8x32xf32>
    %42 = vector.broadcast %13 : vector<1x32xf32> to vector<8x32xf32>
    %43 = arith.addf %41, %42 : vector<8x32xf32>
    %cst_33 = arith.constant 0.000000e+00 : f32
    %44 = vector.broadcast %cst_33 : f32 to vector<8x32xf32>
    %45 = arith.maximumf %43, %44 : vector<8x32xf32>
    %46 = tpu.concatenate %45, %18 in 1 : vector<8x32xf32>, vector<8x32xf32> -> vector<8x64xf32>
    %cst_34 = arith.constant dense<0.000000e+00> : vector<8x128xf32>
    %47 = tpu.matmul %46, %14, %cst_34 {dimension_numbers = #tpu.dot_dimension_numbers<[1], [0], [0], [1], [0, 0, 1, 1], [], []>} : vector<8x64xf32>, vector<64x128xf32>, vector<8x128xf32> -> vector<8x128xf32>
    %48 = vector.broadcast %15 : vector<1x128xf32> to vector<8x128xf32>
    %49 = arith.addf %47, %48 : vector<8x128xf32>
    %50 = vector.extract_strided_slice %49 {offsets = [0, 0], sizes = [8, 32], strides = [1, 1]} : vector<8x128xf32> to vector<8x32xf32>
    %51 = arith.negf %50 : vector<8x32xf32>
    %52 = math.exp %51 : vector<8x32xf32>
    %cst_35 = arith.constant 1.000000e+00 : f32
    %53 = vector.broadcast %cst_35 : f32 to vector<8x32xf32>
    %54 = arith.addf %53, %52 : vector<8x32xf32>
    %55 = arith.divf %53, %54 : vector<8x32xf32>
    %56 = vector.extract_strided_slice %49 {offsets = [0, 32], sizes = [8, 32], strides = [1, 1]} : vector<8x128xf32> to vector<8x32xf32>
    %57 = arith.negf %56 : vector<8x32xf32>
    %58 = math.exp %57 : vector<8x32xf32>
    %cst_36 = arith.constant 1.000000e+00 : f32
    %59 = vector.broadcast %cst_36 : f32 to vector<8x32xf32>
    %60 = arith.addf %59, %58 : vector<8x32xf32>
    %61 = arith.divf %59, %60 : vector<8x32xf32>
    %62 = vector.extract_strided_slice %49 {offsets = [0, 64], sizes = [8, 32], strides = [1, 1]} : vector<8x128xf32> to vector<8x32xf32>
    %63 = vector.extract_strided_slice %49 {offsets = [0, 96], sizes = [8, 32], strides = [1, 1]} : vector<8x128xf32> to vector<8x32xf32>
    %64 = arith.mulf %55, %63 : vector<8x32xf32>
    %65 = arith.addf %62, %64 : vector<8x32xf32>
    %66 = math.tanh %65 : vector<8x32xf32>
    %cst_37 = arith.constant 1.000000e+00 : f32
    %67 = vector.broadcast %cst_37 : f32 to vector<8x32xf32>
    %68 = arith.subf %67, %61 : vector<8x32xf32>
    %69 = arith.mulf %68, %66 : vector<8x32xf32>
    %70 = arith.mulf %61, %18 : vector<8x32xf32>
    %71 = arith.addf %69, %70 : vector<8x32xf32>
    %72 = arith.index_cast %c0_i32 : i32 to index
    %c0_38 = arith.constant 0 : index
    %c0_39 = arith.constant 0 : index
    %73 = vector.load %arg14[%72, %c0_38, %c0_39] : memref<8x8x32xf32, #tpu.memory_space<vmem>>, vector<1x8x32xf32>
    %74 = vector.shape_cast %73 : vector<1x8x32xf32> to vector<8x32xf32>
    %75 = vector.shape_cast %71 : vector<8x32xf32> to vector<1x8x32xf32>
    tpu.vector_store %arg14[%72, %c0_38, %c0_39], %75 {strides = array<i32>} : memref<8x8x32xf32, #tpu.memory_space<vmem>>, vector<1x8x32xf32>,
    %cst_40 = arith.constant dense<0.000000e+00> : vector<8x128xf32>
    %76 = tpu.matmul %71, %16, %cst_40 {dimension_numbers = #tpu.dot_dimension_numbers<[1], [0], [0], [1], [0, 0, 1, 1], [], []>} : vector<8x32xf32>, vector<32x128xf32>, vector<8x128xf32> -> vector<8x128xf32>
    %77 = vector.broadcast %17 : vector<1x128xf32> to vector<8x128xf32>
    %78 = arith.addf %76, %77 : vector<8x128xf32>
    %cst_41 = arith.constant dense<0xFF800000> : vector<8xf32>
    %79 = vector.multi_reduction <maximumf>, %78, %cst_41 [1] : vector<8x128xf32> to vector<8xf32>
    %80 = vector.shape_cast %79 : vector<8xf32> to vector<8x1xf32>
    %81 = vector.broadcast %80 : vector<8x1xf32> to vector<8x128xf32>
    %82 = arith.subf %78, %81 : vector<8x128xf32>
    %83 = math.exp %82 : vector<8x128xf32>
    %cst_42 = arith.constant dense<0.000000e+00> : vector<8xf32>
    %84 = vector.multi_reduction <add>, %83, %cst_42 [1] : vector<8x128xf32> to vector<8xf32>
    %85 = vector.shape_cast %84 : vector<8xf32> to vector<8x1xf32>
    %86 = math.log %85 : vector<8x1xf32>
    %87 = vector.broadcast %86 : vector<8x1xf32> to vector<8x128xf32>
    %88 = arith.subf %82, %87 : vector<8x128xf32>
    %89 = arith.index_cast %c0_i32 : i32 to index
    %c0_43 = arith.constant 0 : index
    %c0_44 = arith.constant 0 : index
    %90 = vector.load %arg13[%89, %c0_43, %c0_44] : memref<8x8x128xf32, #tpu.memory_space<vmem>>, vector<1x8x128xf32>
    %91 = vector.shape_cast %90 : vector<1x8x128xf32> to vector<8x128xf32>
    %92 = vector.shape_cast %88 : vector<8x128xf32> to vector<1x8x128xf32>
    tpu.vector_store %arg13[%89, %c0_43, %c0_44], %92 {strides = array<i32>} : memref<8x8x128xf32, #tpu.memory_space<vmem>>, vector<1x8x128xf32>,
    %c1_i32 = arith.constant 1 : i32
    %cst_45 = arith.constant dense<0.000000e+00> : vector<8x128xf32>
    %93 = tpu.matmul %71, %10, %cst_45 {dimension_numbers = #tpu.dot_dimension_numbers<[1], [0], [0], [1], [0, 0, 1, 1], [], []>} : vector<8x32xf32>, vector<32x128xf32>, vector<8x128xf32> -> vector<8x128xf32>
    %94 = vector.broadcast %11 : vector<1x128xf32> to vector<8x128xf32>
    %95 = arith.addf %93, %94 : vector<8x128xf32>
    %cst_46 = arith.constant dense<0xFF800000> : vector<8xf32>
    %96 = vector.multi_reduction <maximumf>, %95, %cst_46 [1] : vector<8x128xf32> to vector<8xf32>
    %97 = vector.shape_cast %96 : vector<8xf32> to vector<8x1xf32>
    %98 = vector.broadcast %97 : vector<8x1xf32> to vector<8x128xf32>
    %99 = arith.subf %95, %98 : vector<8x128xf32>
    %100 = math.exp %99 : vector<8x128xf32>
    %cst_47 = arith.constant dense<0.000000e+00> : vector<8xf32>
    %101 = vector.multi_reduction <add>, %100, %cst_47 [1] : vector<8x128xf32> to vector<8xf32>
    %102 = vector.shape_cast %101 : vector<8xf32> to vector<8x1xf32>
    %103 = vector.broadcast %102 : vector<8x1xf32> to vector<8x128xf32>
    %104 = arith.divf %100, %103 : vector<8x128xf32>
    %105 = arith.index_cast %c1_i32 : i32 to index
    %c0_48 = arith.constant 0 : index
    %c0_49 = arith.constant 0 : index
    %106 = vector.load %arg15[%105, %c0_48, %c0_49] : memref<8x8x128xf32, #tpu.memory_space<vmem>>, vector<1x8x128xf32>
    %107 = vector.shape_cast %106 : vector<1x8x128xf32> to vector<8x128xf32>
    %108 = vector.shape_cast %104 : vector<8x128xf32> to vector<1x8x128xf32>
    tpu.vector_store %arg15[%105, %c0_48, %c0_49], %108 {strides = array<i32>} : memref<8x8x128xf32, #tpu.memory_space<vmem>>, vector<1x8x128xf32>,
    %cst_50 = arith.constant dense<0.000000e+00> : vector<8x32xf32>
    %109 = tpu.matmul %104, %9, %cst_50 {dimension_numbers = #tpu.dot_dimension_numbers<[1], [0], [0], [1], [0, 0, 1, 1], [], []>} : vector<8x128xf32>, vector<128x32xf32>, vector<8x32xf32> -> vector<8x32xf32>
    %c8_i32_51 = arith.constant 8 : i32
    %110 = arith.muli %c1_i32, %c8_i32_51 : i32
    %111 = tpu.assume_multiple %110, 8 : i32
    %112 = arith.index_cast %111 : i32 to index
    %c0_52 = arith.constant 0 : index
    %113 = vector.load %arg16[%112, %c0_52] : memref<64x32xf32, #tpu.memory_space<vmem>>, vector<8x32xf32>
    %114 = tpu.concatenate %113, %109 in 1 : vector<8x32xf32>, vector<8x32xf32> -> vector<8x64xf32>
    %cst_53 = arith.constant dense<0.000000e+00> : vector<8x32xf32>
    %115 = tpu.matmul %114, %12, %cst_53 {dimension_numbers = #tpu.dot_dimension_numbers<[1], [0], [0], [1], [0, 0, 1, 1], [], []>} : vector<8x64xf32>, vector<64x32xf32>, vector<8x32xf32> -> vector<8x32xf32>
    %116 = vector.broadcast %13 : vector<1x32xf32> to vector<8x32xf32>
    %117 = arith.addf %115, %116 : vector<8x32xf32>
    %cst_54 = arith.constant 0.000000e+00 : f32
    %118 = vector.broadcast %cst_54 : f32 to vector<8x32xf32>
    %119 = arith.maximumf %117, %118 : vector<8x32xf32>
    %120 = tpu.concatenate %119, %71 in 1 : vector<8x32xf32>, vector<8x32xf32> -> vector<8x64xf32>
    %cst_55 = arith.constant dense<0.000000e+00> : vector<8x128xf32>
    %121 = tpu.matmul %120, %14, %cst_55 {dimension_numbers = #tpu.dot_dimension_numbers<[1], [0], [0], [1], [0, 0, 1, 1], [], []>} : vector<8x64xf32>, vector<64x128xf32>, vector<8x128xf32> -> vector<8x128xf32>
    %122 = vector.broadcast %15 : vector<1x128xf32> to vector<8x128xf32>
    %123 = arith.addf %121, %122 : vector<8x128xf32>
    %124 = vector.extract_strided_slice %123 {offsets = [0, 0], sizes = [8, 32], strides = [1, 1]} : vector<8x128xf32> to vector<8x32xf32>
    %125 = arith.negf %124 : vector<8x32xf32>
    %126 = math.exp %125 : vector<8x32xf32>
    %cst_56 = arith.constant 1.000000e+00 : f32
    %127 = vector.broadcast %cst_56 : f32 to vector<8x32xf32>
    %128 = arith.addf %127, %126 : vector<8x32xf32>
    %129 = arith.divf %127, %128 : vector<8x32xf32>
    %130 = vector.extract_strided_slice %123 {offsets = [0, 32], sizes = [8, 32], strides = [1, 1]} : vector<8x128xf32> to vector<8x32xf32>
    %131 = arith.negf %130 : vector<8x32xf32>
    %132 = math.exp %131 : vector<8x32xf32>
    %cst_57 = arith.constant 1.000000e+00 : f32
    %133 = vector.broadcast %cst_57 : f32 to vector<8x32xf32>
    %134 = arith.addf %133, %132 : vector<8x32xf32>
    %135 = arith.divf %133, %134 : vector<8x32xf32>
    %136 = vector.extract_strided_slice %123 {offsets = [0, 64], sizes = [8, 32], strides = [1, 1]} : vector<8x128xf32> to vector<8x32xf32>
    %137 = vector.extract_strided_slice %123 {offsets = [0, 96], sizes = [8, 32], strides = [1, 1]} : vector<8x128xf32> to vector<8x32xf32>
    %138 = arith.mulf %129, %137 : vector<8x32xf32>
    %139 = arith.addf %136, %138 : vector<8x32xf32>
    %140 = math.tanh %139 : vector<8x32xf32>
    %cst_58 = arith.constant 1.000000e+00 : f32
    %141 = vector.broadcast %cst_58 : f32 to vector<8x32xf32>
    %142 = arith.subf %141, %135 : vector<8x32xf32>
    %143 = arith.mulf %142, %140 : vector<8x32xf32>
    %144 = arith.mulf %135, %71 : vector<8x32xf32>
    %145 = arith.addf %143, %144 : vector<8x32xf32>
    %146 = arith.index_cast %c1_i32 : i32 to index
    %c0_59 = arith.constant 0 : index
    %c0_60 = arith.constant 0 : index
    %147 = vector.load %arg14[%146, %c0_59, %c0_60] : memref<8x8x32xf32, #tpu.memory_space<vmem>>, vector<1x8x32xf32>
    %148 = vector.shape_cast %147 : vector<1x8x32xf32> to vector<8x32xf32>
    %149 = vector.shape_cast %145 : vector<8x32xf32> to vector<1x8x32xf32>
    tpu.vector_store %arg14[%146, %c0_59, %c0_60], %149 {strides = array<i32>} : memref<8x8x32xf32, #tpu.memory_space<vmem>>, vector<1x8x32xf32>,
    %cst_61 = arith.constant dense<0.000000e+00> : vector<8x128xf32>
    %150 = tpu.matmul %145, %16, %cst_61 {dimension_numbers = #tpu.dot_dimension_numbers<[1], [0], [0], [1], [0, 0, 1, 1], [], []>} : vector<8x32xf32>, vector<32x128xf32>, vector<8x128xf32> -> vector<8x128xf32>
    %151 = vector.broadcast %17 : vector<1x128xf32> to vector<8x128xf32>
    %152 = arith.addf %150, %151 : vector<8x128xf32>
    %cst_62 = arith.constant dense<0xFF800000> : vector<8xf32>
    %153 = vector.multi_reduction <maximumf>, %152, %cst_62 [1] : vector<8x128xf32> to vector<8xf32>
    %154 = vector.shape_cast %153 : vector<8xf32> to vector<8x1xf32>
    %155 = vector.broadcast %154 : vector<8x1xf32> to vector<8x128xf32>
    %156 = arith.subf %152, %155 : vector<8x128xf32>
    %157 = math.exp %156 : vector<8x128xf32>
    %cst_63 = arith.constant dense<0.000000e+00> : vector<8xf32>
    %158 = vector.multi_reduction <add>, %157, %cst_63 [1] : vector<8x128xf32> to vector<8xf32>
    %159 = vector.shape_cast %158 : vector<8xf32> to vector<8x1xf32>
    %160 = math.log %159 : vector<8x1xf32>
    %161 = vector.broadcast %160 : vector<8x1xf32> to vector<8x128xf32>
    %162 = arith.subf %156, %161 : vector<8x128xf32>
    %163 = arith.index_cast %c1_i32 : i32 to index
    %c0_64 = arith.constant 0 : index
    %c0_65 = arith.constant 0 : index
    %164 = vector.load %arg13[%163, %c0_64, %c0_65] : memref<8x8x128xf32, #tpu.memory_space<vmem>>, vector<1x8x128xf32>
    %165 = vector.shape_cast %164 : vector<1x8x128xf32> to vector<8x128xf32>
    %166 = vector.shape_cast %162 : vector<8x128xf32> to vector<1x8x128xf32>
    tpu.vector_store %arg13[%163, %c0_64, %c0_65], %166 {strides = array<i32>} : memref<8x8x128xf32, #tpu.memory_space<vmem>>, vector<1x8x128xf32>,
    %c2_i32 = arith.constant 2 : i32
    %cst_66 = arith.constant dense<0.000000e+00> : vector<8x128xf32>
    %167 = tpu.matmul %145, %10, %cst_66 {dimension_numbers = #tpu.dot_dimension_numbers<[1], [0], [0], [1], [0, 0, 1, 1], [], []>} : vector<8x32xf32>, vector<32x128xf32>, vector<8x128xf32> -> vector<8x128xf32>
    %168 = vector.broadcast %11 : vector<1x128xf32> to vector<8x128xf32>
    %169 = arith.addf %167, %168 : vector<8x128xf32>
    %cst_67 = arith.constant dense<0xFF800000> : vector<8xf32>
    %170 = vector.multi_reduction <maximumf>, %169, %cst_67 [1] : vector<8x128xf32> to vector<8xf32>
    %171 = vector.shape_cast %170 : vector<8xf32> to vector<8x1xf32>
    %172 = vector.broadcast %171 : vector<8x1xf32> to vector<8x128xf32>
    %173 = arith.subf %169, %172 : vector<8x128xf32>
    %174 = math.exp %173 : vector<8x128xf32>
    %cst_68 = arith.constant dense<0.000000e+00> : vector<8xf32>
    %175 = vector.multi_reduction <add>, %174, %cst_68 [1] : vector<8x128xf32> to vector<8xf32>
    %176 = vector.shape_cast %175 : vector<8xf32> to vector<8x1xf32>
    %177 = vector.broadcast %176 : vector<8x1xf32> to vector<8x128xf32>
    %178 = arith.divf %174, %177 : vector<8x128xf32>
    %179 = arith.index_cast %c2_i32 : i32 to index
    %c0_69 = arith.constant 0 : index
    %c0_70 = arith.constant 0 : index
    %180 = vector.load %arg15[%179, %c0_69, %c0_70] : memref<8x8x128xf32, #tpu.memory_space<vmem>>, vector<1x8x128xf32>
    %181 = vector.shape_cast %180 : vector<1x8x128xf32> to vector<8x128xf32>
    %182 = vector.shape_cast %178 : vector<8x128xf32> to vector<1x8x128xf32>
    tpu.vector_store %arg15[%179, %c0_69, %c0_70], %182 {strides = array<i32>} : memref<8x8x128xf32, #tpu.memory_space<vmem>>, vector<1x8x128xf32>,
    %cst_71 = arith.constant dense<0.000000e+00> : vector<8x32xf32>
    %183 = tpu.matmul %178, %9, %cst_71 {dimension_numbers = #tpu.dot_dimension_numbers<[1], [0], [0], [1], [0, 0, 1, 1], [], []>} : vector<8x128xf32>, vector<128x32xf32>, vector<8x32xf32> -> vector<8x32xf32>
    %c8_i32_72 = arith.constant 8 : i32
    %184 = arith.muli %c2_i32, %c8_i32_72 : i32
    %185 = tpu.assume_multiple %184, 8 : i32
    %186 = arith.index_cast %185 : i32 to index
    %c0_73 = arith.constant 0 : index
    %187 = vector.load %arg16[%186, %c0_73] : memref<64x32xf32, #tpu.memory_space<vmem>>, vector<8x32xf32>
    %188 = tpu.concatenate %187, %183 in 1 : vector<8x32xf32>, vector<8x32xf32> -> vector<8x64xf32>
    %cst_74 = arith.constant dense<0.000000e+00> : vector<8x32xf32>
    %189 = tpu.matmul %188, %12, %cst_74 {dimension_numbers = #tpu.dot_dimension_numbers<[1], [0], [0], [1], [0, 0, 1, 1], [], []>} : vector<8x64xf32>, vector<64x32xf32>, vector<8x32xf32> -> vector<8x32xf32>
    %190 = vector.broadcast %13 : vector<1x32xf32> to vector<8x32xf32>
    %191 = arith.addf %189, %190 : vector<8x32xf32>
    %cst_75 = arith.constant 0.000000e+00 : f32
    %192 = vector.broadcast %cst_75 : f32 to vector<8x32xf32>
    %193 = arith.maximumf %191, %192 : vector<8x32xf32>
    %194 = tpu.concatenate %193, %145 in 1 : vector<8x32xf32>, vector<8x32xf32> -> vector<8x64xf32>
    %cst_76 = arith.constant dense<0.000000e+00> : vector<8x128xf32>
    %195 = tpu.matmul %194, %14, %cst_76 {dimension_numbers = #tpu.dot_dimension_numbers<[1], [0], [0], [1], [0, 0, 1, 1], [], []>} : vector<8x64xf32>, vector<64x128xf32>, vector<8x128xf32> -> vector<8x128xf32>
    %196 = vector.broadcast %15 : vector<1x128xf32> to vector<8x128xf32>
    %197 = arith.addf %195, %196 : vector<8x128xf32>
    %198 = vector.extract_strided_slice %197 {offsets = [0, 0], sizes = [8, 32], strides = [1, 1]} : vector<8x128xf32> to vector<8x32xf32>
    %199 = arith.negf %198 : vector<8x32xf32>
    %200 = math.exp %199 : vector<8x32xf32>
    %cst_77 = arith.constant 1.000000e+00 : f32
    %201 = vector.broadcast %cst_77 : f32 to vector<8x32xf32>
    %202 = arith.addf %201, %200 : vector<8x32xf32>
    %203 = arith.divf %201, %202 : vector<8x32xf32>
    %204 = vector.extract_strided_slice %197 {offsets = [0, 32], sizes = [8, 32], strides = [1, 1]} : vector<8x128xf32> to vector<8x32xf32>
    %205 = arith.negf %204 : vector<8x32xf32>
    %206 = math.exp %205 : vector<8x32xf32>
    %cst_78 = arith.constant 1.000000e+00 : f32
    %207 = vector.broadcast %cst_78 : f32 to vector<8x32xf32>
    %208 = arith.addf %207, %206 : vector<8x32xf32>
    %209 = arith.divf %207, %208 : vector<8x32xf32>
    %210 = vector.extract_strided_slice %197 {offsets = [0, 64], sizes = [8, 32], strides = [1, 1]} : vector<8x128xf32> to vector<8x32xf32>
    %211 = vector.extract_strided_slice %197 {offsets = [0, 96], sizes = [8, 32], strides = [1, 1]} : vector<8x128xf32> to vector<8x32xf32>
    %212 = arith.mulf %203, %211 : vector<8x32xf32>
    %213 = arith.addf %210, %212 : vector<8x32xf32>
    %214 = math.tanh %213 : vector<8x32xf32>
    %cst_79 = arith.constant 1.000000e+00 : f32
    %215 = vector.broadcast %cst_79 : f32 to vector<8x32xf32>
    %216 = arith.subf %215, %209 : vector<8x32xf32>
    %217 = arith.mulf %216, %214 : vector<8x32xf32>
    %218 = arith.mulf %209, %145 : vector<8x32xf32>
    %219 = arith.addf %217, %218 : vector<8x32xf32>
    %220 = arith.index_cast %c2_i32 : i32 to index
    %c0_80 = arith.constant 0 : index
    %c0_81 = arith.constant 0 : index
    %221 = vector.load %arg14[%220, %c0_80, %c0_81] : memref<8x8x32xf32, #tpu.memory_space<vmem>>, vector<1x8x32xf32>
    %222 = vector.shape_cast %221 : vector<1x8x32xf32> to vector<8x32xf32>
    %223 = vector.shape_cast %219 : vector<8x32xf32> to vector<1x8x32xf32>
    tpu.vector_store %arg14[%220, %c0_80, %c0_81], %223 {strides = array<i32>} : memref<8x8x32xf32, #tpu.memory_space<vmem>>, vector<1x8x32xf32>,
    %cst_82 = arith.constant dense<0.000000e+00> : vector<8x128xf32>
    %224 = tpu.matmul %219, %16, %cst_82 {dimension_numbers = #tpu.dot_dimension_numbers<[1], [0], [0], [1], [0, 0, 1, 1], [], []>} : vector<8x32xf32>, vector<32x128xf32>, vector<8x128xf32> -> vector<8x128xf32>
    %225 = vector.broadcast %17 : vector<1x128xf32> to vector<8x128xf32>
    %226 = arith.addf %224, %225 : vector<8x128xf32>
    %cst_83 = arith.constant dense<0xFF800000> : vector<8xf32>
    %227 = vector.multi_reduction <maximumf>, %226, %cst_83 [1] : vector<8x128xf32> to vector<8xf32>
    %228 = vector.shape_cast %227 : vector<8xf32> to vector<8x1xf32>
    %229 = vector.broadcast %228 : vector<8x1xf32> to vector<8x128xf32>
    %230 = arith.subf %226, %229 : vector<8x128xf32>
    %231 = math.exp %230 : vector<8x128xf32>
    %cst_84 = arith.constant dense<0.000000e+00> : vector<8xf32>
    %232 = vector.multi_reduction <add>, %231, %cst_84 [1] : vector<8x128xf32> to vector<8xf32>
    %233 = vector.shape_cast %232 : vector<8xf32> to vector<8x1xf32>
    %234 = math.log %233 : vector<8x1xf32>
    %235 = vector.broadcast %234 : vector<8x1xf32> to vector<8x128xf32>
    %236 = arith.subf %230, %235 : vector<8x128xf32>
    %237 = arith.index_cast %c2_i32 : i32 to index
    %c0_85 = arith.constant 0 : index
    %c0_86 = arith.constant 0 : index
    %238 = vector.load %arg13[%237, %c0_85, %c0_86] : memref<8x8x128xf32, #tpu.memory_space<vmem>>, vector<1x8x128xf32>
    %239 = vector.shape_cast %238 : vector<1x8x128xf32> to vector<8x128xf32>
    %240 = vector.shape_cast %236 : vector<8x128xf32> to vector<1x8x128xf32>
    tpu.vector_store %arg13[%237, %c0_85, %c0_86], %240 {strides = array<i32>} : memref<8x8x128xf32, #tpu.memory_space<vmem>>, vector<1x8x128xf32>,
    %c3_i32 = arith.constant 3 : i32
    %cst_87 = arith.constant dense<0.000000e+00> : vector<8x128xf32>
    %241 = tpu.matmul %219, %10, %cst_87 {dimension_numbers = #tpu.dot_dimension_numbers<[1], [0], [0], [1], [0, 0, 1, 1], [], []>} : vector<8x32xf32>, vector<32x128xf32>, vector<8x128xf32> -> vector<8x128xf32>
    %242 = vector.broadcast %11 : vector<1x128xf32> to vector<8x128xf32>
    %243 = arith.addf %241, %242 : vector<8x128xf32>
    %cst_88 = arith.constant dense<0xFF800000> : vector<8xf32>
    %244 = vector.multi_reduction <maximumf>, %243, %cst_88 [1] : vector<8x128xf32> to vector<8xf32>
    %245 = vector.shape_cast %244 : vector<8xf32> to vector<8x1xf32>
    %246 = vector.broadcast %245 : vector<8x1xf32> to vector<8x128xf32>
    %247 = arith.subf %243, %246 : vector<8x128xf32>
    %248 = math.exp %247 : vector<8x128xf32>
    %cst_89 = arith.constant dense<0.000000e+00> : vector<8xf32>
    %249 = vector.multi_reduction <add>, %248, %cst_89 [1] : vector<8x128xf32> to vector<8xf32>
    %250 = vector.shape_cast %249 : vector<8xf32> to vector<8x1xf32>
    %251 = vector.broadcast %250 : vector<8x1xf32> to vector<8x128xf32>
    %252 = arith.divf %248, %251 : vector<8x128xf32>
    %253 = arith.index_cast %c3_i32 : i32 to index
    %c0_90 = arith.constant 0 : index
    %c0_91 = arith.constant 0 : index
    %254 = vector.load %arg15[%253, %c0_90, %c0_91] : memref<8x8x128xf32, #tpu.memory_space<vmem>>, vector<1x8x128xf32>
    %255 = vector.shape_cast %254 : vector<1x8x128xf32> to vector<8x128xf32>
    %256 = vector.shape_cast %252 : vector<8x128xf32> to vector<1x8x128xf32>
    tpu.vector_store %arg15[%253, %c0_90, %c0_91], %256 {strides = array<i32>} : memref<8x8x128xf32, #tpu.memory_space<vmem>>, vector<1x8x128xf32>,
    %cst_92 = arith.constant dense<0.000000e+00> : vector<8x32xf32>
    %257 = tpu.matmul %252, %9, %cst_92 {dimension_numbers = #tpu.dot_dimension_numbers<[1], [0], [0], [1], [0, 0, 1, 1], [], []>} : vector<8x128xf32>, vector<128x32xf32>, vector<8x32xf32> -> vector<8x32xf32>
    %c8_i32_93 = arith.constant 8 : i32
    %258 = arith.muli %c3_i32, %c8_i32_93 : i32
    %259 = tpu.assume_multiple %258, 8 : i32
    %260 = arith.index_cast %259 : i32 to index
    %c0_94 = arith.constant 0 : index
    %261 = vector.load %arg16[%260, %c0_94] : memref<64x32xf32, #tpu.memory_space<vmem>>, vector<8x32xf32>
    %262 = tpu.concatenate %261, %257 in 1 : vector<8x32xf32>, vector<8x32xf32> -> vector<8x64xf32>
    %cst_95 = arith.constant dense<0.000000e+00> : vector<8x32xf32>
    %263 = tpu.matmul %262, %12, %cst_95 {dimension_numbers = #tpu.dot_dimension_numbers<[1], [0], [0], [1], [0, 0, 1, 1], [], []>} : vector<8x64xf32>, vector<64x32xf32>, vector<8x32xf32> -> vector<8x32xf32>
    %264 = vector.broadcast %13 : vector<1x32xf32> to vector<8x32xf32>
    %265 = arith.addf %263, %264 : vector<8x32xf32>
    %cst_96 = arith.constant 0.000000e+00 : f32
    %266 = vector.broadcast %cst_96 : f32 to vector<8x32xf32>
    %267 = arith.maximumf %265, %266 : vector<8x32xf32>
    %268 = tpu.concatenate %267, %219 in 1 : vector<8x32xf32>, vector<8x32xf32> -> vector<8x64xf32>
    %cst_97 = arith.constant dense<0.000000e+00> : vector<8x128xf32>
    %269 = tpu.matmul %268, %14, %cst_97 {dimension_numbers = #tpu.dot_dimension_numbers<[1], [0], [0], [1], [0, 0, 1, 1], [], []>} : vector<8x64xf32>, vector<64x128xf32>, vector<8x128xf32> -> vector<8x128xf32>
    %270 = vector.broadcast %15 : vector<1x128xf32> to vector<8x128xf32>
    %271 = arith.addf %269, %270 : vector<8x128xf32>
    %272 = vector.extract_strided_slice %271 {offsets = [0, 0], sizes = [8, 32], strides = [1, 1]} : vector<8x128xf32> to vector<8x32xf32>
    %273 = arith.negf %272 : vector<8x32xf32>
    %274 = math.exp %273 : vector<8x32xf32>
    %cst_98 = arith.constant 1.000000e+00 : f32
    %275 = vector.broadcast %cst_98 : f32 to vector<8x32xf32>
    %276 = arith.addf %275, %274 : vector<8x32xf32>
    %277 = arith.divf %275, %276 : vector<8x32xf32>
    %278 = vector.extract_strided_slice %271 {offsets = [0, 32], sizes = [8, 32], strides = [1, 1]} : vector<8x128xf32> to vector<8x32xf32>
    %279 = arith.negf %278 : vector<8x32xf32>
    %280 = math.exp %279 : vector<8x32xf32>
    %cst_99 = arith.constant 1.000000e+00 : f32
    %281 = vector.broadcast %cst_99 : f32 to vector<8x32xf32>
    %282 = arith.addf %281, %280 : vector<8x32xf32>
    %283 = arith.divf %281, %282 : vector<8x32xf32>
    %284 = vector.extract_strided_slice %271 {offsets = [0, 64], sizes = [8, 32], strides = [1, 1]} : vector<8x128xf32> to vector<8x32xf32>
    %285 = vector.extract_strided_slice %271 {offsets = [0, 96], sizes = [8, 32], strides = [1, 1]} : vector<8x128xf32> to vector<8x32xf32>
    %286 = arith.mulf %277, %285 : vector<8x32xf32>
    %287 = arith.addf %284, %286 : vector<8x32xf32>
    %288 = math.tanh %287 : vector<8x32xf32>
    %cst_100 = arith.constant 1.000000e+00 : f32
    %289 = vector.broadcast %cst_100 : f32 to vector<8x32xf32>
    %290 = arith.subf %289, %283 : vector<8x32xf32>
    %291 = arith.mulf %290, %288 : vector<8x32xf32>
    %292 = arith.mulf %283, %219 : vector<8x32xf32>
    %293 = arith.addf %291, %292 : vector<8x32xf32>
    %294 = arith.index_cast %c3_i32 : i32 to index
    %c0_101 = arith.constant 0 : index
    %c0_102 = arith.constant 0 : index
    %295 = vector.load %arg14[%294, %c0_101, %c0_102] : memref<8x8x32xf32, #tpu.memory_space<vmem>>, vector<1x8x32xf32>
    %296 = vector.shape_cast %295 : vector<1x8x32xf32> to vector<8x32xf32>
    %297 = vector.shape_cast %293 : vector<8x32xf32> to vector<1x8x32xf32>
    tpu.vector_store %arg14[%294, %c0_101, %c0_102], %297 {strides = array<i32>} : memref<8x8x32xf32, #tpu.memory_space<vmem>>, vector<1x8x32xf32>,
    %cst_103 = arith.constant dense<0.000000e+00> : vector<8x128xf32>
    %298 = tpu.matmul %293, %16, %cst_103 {dimension_numbers = #tpu.dot_dimension_numbers<[1], [0], [0], [1], [0, 0, 1, 1], [], []>} : vector<8x32xf32>, vector<32x128xf32>, vector<8x128xf32> -> vector<8x128xf32>
    %299 = vector.broadcast %17 : vector<1x128xf32> to vector<8x128xf32>
    %300 = arith.addf %298, %299 : vector<8x128xf32>
    %cst_104 = arith.constant dense<0xFF800000> : vector<8xf32>
    %301 = vector.multi_reduction <maximumf>, %300, %cst_104 [1] : vector<8x128xf32> to vector<8xf32>
    %302 = vector.shape_cast %301 : vector<8xf32> to vector<8x1xf32>
    %303 = vector.broadcast %302 : vector<8x1xf32> to vector<8x128xf32>
    %304 = arith.subf %300, %303 : vector<8x128xf32>
    %305 = math.exp %304 : vector<8x128xf32>
    %cst_105 = arith.constant dense<0.000000e+00> : vector<8xf32>
    %306 = vector.multi_reduction <add>, %305, %cst_105 [1] : vector<8x128xf32> to vector<8xf32>
    %307 = vector.shape_cast %306 : vector<8xf32> to vector<8x1xf32>
    %308 = math.log %307 : vector<8x1xf32>
    %309 = vector.broadcast %308 : vector<8x1xf32> to vector<8x128xf32>
    %310 = arith.subf %304, %309 : vector<8x128xf32>
    %311 = arith.index_cast %c3_i32 : i32 to index
    %c0_106 = arith.constant 0 : index
    %c0_107 = arith.constant 0 : index
    %312 = vector.load %arg13[%311, %c0_106, %c0_107] : memref<8x8x128xf32, #tpu.memory_space<vmem>>, vector<1x8x128xf32>
    %313 = vector.shape_cast %312 : vector<1x8x128xf32> to vector<8x128xf32>
    %314 = vector.shape_cast %310 : vector<8x128xf32> to vector<1x8x128xf32>
    tpu.vector_store %arg13[%311, %c0_106, %c0_107], %314 {strides = array<i32>} : memref<8x8x128xf32, #tpu.memory_space<vmem>>, vector<1x8x128xf32>,
    %c4_i32 = arith.constant 4 : i32
    %cst_108 = arith.constant dense<0.000000e+00> : vector<8x128xf32>
    %315 = tpu.matmul %293, %10, %cst_108 {dimension_numbers = #tpu.dot_dimension_numbers<[1], [0], [0], [1], [0, 0, 1, 1], [], []>} : vector<8x32xf32>, vector<32x128xf32>, vector<8x128xf32> -> vector<8x128xf32>
    %316 = vector.broadcast %11 : vector<1x128xf32> to vector<8x128xf32>
    %317 = arith.addf %315, %316 : vector<8x128xf32>
    %cst_109 = arith.constant dense<0xFF800000> : vector<8xf32>
    %318 = vector.multi_reduction <maximumf>, %317, %cst_109 [1] : vector<8x128xf32> to vector<8xf32>
    %319 = vector.shape_cast %318 : vector<8xf32> to vector<8x1xf32>
    %320 = vector.broadcast %319 : vector<8x1xf32> to vector<8x128xf32>
    %321 = arith.subf %317, %320 : vector<8x128xf32>
    %322 = math.exp %321 : vector<8x128xf32>
    %cst_110 = arith.constant dense<0.000000e+00> : vector<8xf32>
    %323 = vector.multi_reduction <add>, %322, %cst_110 [1] : vector<8x128xf32> to vector<8xf32>
    %324 = vector.shape_cast %323 : vector<8xf32> to vector<8x1xf32>
    %325 = vector.broadcast %324 : vector<8x1xf32> to vector<8x128xf32>
    %326 = arith.divf %322, %325 : vector<8x128xf32>
    %327 = arith.index_cast %c4_i32 : i32 to index
    %c0_111 = arith.constant 0 : index
    %c0_112 = arith.constant 0 : index
    %328 = vector.load %arg15[%327, %c0_111, %c0_112] : memref<8x8x128xf32, #tpu.memory_space<vmem>>, vector<1x8x128xf32>
    %329 = vector.shape_cast %328 : vector<1x8x128xf32> to vector<8x128xf32>
    %330 = vector.shape_cast %326 : vector<8x128xf32> to vector<1x8x128xf32>
    tpu.vector_store %arg15[%327, %c0_111, %c0_112], %330 {strides = array<i32>} : memref<8x8x128xf32, #tpu.memory_space<vmem>>, vector<1x8x128xf32>,
    %cst_113 = arith.constant dense<0.000000e+00> : vector<8x32xf32>
    %331 = tpu.matmul %326, %9, %cst_113 {dimension_numbers = #tpu.dot_dimension_numbers<[1], [0], [0], [1], [0, 0, 1, 1], [], []>} : vector<8x128xf32>, vector<128x32xf32>, vector<8x32xf32> -> vector<8x32xf32>
    %c8_i32_114 = arith.constant 8 : i32
    %332 = arith.muli %c4_i32, %c8_i32_114 : i32
    %333 = tpu.assume_multiple %332, 8 : i32
    %334 = arith.index_cast %333 : i32 to index
    %c0_115 = arith.constant 0 : index
    %335 = vector.load %arg16[%334, %c0_115] : memref<64x32xf32, #tpu.memory_space<vmem>>, vector<8x32xf32>
    %336 = tpu.concatenate %335, %331 in 1 : vector<8x32xf32>, vector<8x32xf32> -> vector<8x64xf32>
    %cst_116 = arith.constant dense<0.000000e+00> : vector<8x32xf32>
    %337 = tpu.matmul %336, %12, %cst_116 {dimension_numbers = #tpu.dot_dimension_numbers<[1], [0], [0], [1], [0, 0, 1, 1], [], []>} : vector<8x64xf32>, vector<64x32xf32>, vector<8x32xf32> -> vector<8x32xf32>
    %338 = vector.broadcast %13 : vector<1x32xf32> to vector<8x32xf32>
    %339 = arith.addf %337, %338 : vector<8x32xf32>
    %cst_117 = arith.constant 0.000000e+00 : f32
    %340 = vector.broadcast %cst_117 : f32 to vector<8x32xf32>
    %341 = arith.maximumf %339, %340 : vector<8x32xf32>
    %342 = tpu.concatenate %341, %293 in 1 : vector<8x32xf32>, vector<8x32xf32> -> vector<8x64xf32>
    %cst_118 = arith.constant dense<0.000000e+00> : vector<8x128xf32>
    %343 = tpu.matmul %342, %14, %cst_118 {dimension_numbers = #tpu.dot_dimension_numbers<[1], [0], [0], [1], [0, 0, 1, 1], [], []>} : vector<8x64xf32>, vector<64x128xf32>, vector<8x128xf32> -> vector<8x128xf32>
    %344 = vector.broadcast %15 : vector<1x128xf32> to vector<8x128xf32>
    %345 = arith.addf %343, %344 : vector<8x128xf32>
    %346 = vector.extract_strided_slice %345 {offsets = [0, 0], sizes = [8, 32], strides = [1, 1]} : vector<8x128xf32> to vector<8x32xf32>
    %347 = arith.negf %346 : vector<8x32xf32>
    %348 = math.exp %347 : vector<8x32xf32>
    %cst_119 = arith.constant 1.000000e+00 : f32
    %349 = vector.broadcast %cst_119 : f32 to vector<8x32xf32>
    %350 = arith.addf %349, %348 : vector<8x32xf32>
    %351 = arith.divf %349, %350 : vector<8x32xf32>
    %352 = vector.extract_strided_slice %345 {offsets = [0, 32], sizes = [8, 32], strides = [1, 1]} : vector<8x128xf32> to vector<8x32xf32>
    %353 = arith.negf %352 : vector<8x32xf32>
    %354 = math.exp %353 : vector<8x32xf32>
    %cst_120 = arith.constant 1.000000e+00 : f32
    %355 = vector.broadcast %cst_120 : f32 to vector<8x32xf32>
    %356 = arith.addf %355, %354 : vector<8x32xf32>
    %357 = arith.divf %355, %356 : vector<8x32xf32>
    %358 = vector.extract_strided_slice %345 {offsets = [0, 64], sizes = [8, 32], strides = [1, 1]} : vector<8x128xf32> to vector<8x32xf32>
    %359 = vector.extract_strided_slice %345 {offsets = [0, 96], sizes = [8, 32], strides = [1, 1]} : vector<8x128xf32> to vector<8x32xf32>
    %360 = arith.mulf %351, %359 : vector<8x32xf32>
    %361 = arith.addf %358, %360 : vector<8x32xf32>
    %362 = math.tanh %361 : vector<8x32xf32>
    %cst_121 = arith.constant 1.000000e+00 : f32
    %363 = vector.broadcast %cst_121 : f32 to vector<8x32xf32>
    %364 = arith.subf %363, %357 : vector<8x32xf32>
    %365 = arith.mulf %364, %362 : vector<8x32xf32>
    %366 = arith.mulf %357, %293 : vector<8x32xf32>
    %367 = arith.addf %365, %366 : vector<8x32xf32>
    %368 = arith.index_cast %c4_i32 : i32 to index
    %c0_122 = arith.constant 0 : index
    %c0_123 = arith.constant 0 : index
    %369 = vector.load %arg14[%368, %c0_122, %c0_123] : memref<8x8x32xf32, #tpu.memory_space<vmem>>, vector<1x8x32xf32>
    %370 = vector.shape_cast %369 : vector<1x8x32xf32> to vector<8x32xf32>
    %371 = vector.shape_cast %367 : vector<8x32xf32> to vector<1x8x32xf32>
    tpu.vector_store %arg14[%368, %c0_122, %c0_123], %371 {strides = array<i32>} : memref<8x8x32xf32, #tpu.memory_space<vmem>>, vector<1x8x32xf32>,
    %cst_124 = arith.constant dense<0.000000e+00> : vector<8x128xf32>
    %372 = tpu.matmul %367, %16, %cst_124 {dimension_numbers = #tpu.dot_dimension_numbers<[1], [0], [0], [1], [0, 0, 1, 1], [], []>} : vector<8x32xf32>, vector<32x128xf32>, vector<8x128xf32> -> vector<8x128xf32>
    %373 = vector.broadcast %17 : vector<1x128xf32> to vector<8x128xf32>
    %374 = arith.addf %372, %373 : vector<8x128xf32>
    %cst_125 = arith.constant dense<0xFF800000> : vector<8xf32>
    %375 = vector.multi_reduction <maximumf>, %374, %cst_125 [1] : vector<8x128xf32> to vector<8xf32>
    %376 = vector.shape_cast %375 : vector<8xf32> to vector<8x1xf32>
    %377 = vector.broadcast %376 : vector<8x1xf32> to vector<8x128xf32>
    %378 = arith.subf %374, %377 : vector<8x128xf32>
    %379 = math.exp %378 : vector<8x128xf32>
    %cst_126 = arith.constant dense<0.000000e+00> : vector<8xf32>
    %380 = vector.multi_reduction <add>, %379, %cst_126 [1] : vector<8x128xf32> to vector<8xf32>
    %381 = vector.shape_cast %380 : vector<8xf32> to vector<8x1xf32>
    %382 = math.log %381 : vector<8x1xf32>
    %383 = vector.broadcast %382 : vector<8x1xf32> to vector<8x128xf32>
    %384 = arith.subf %378, %383 : vector<8x128xf32>
    %385 = arith.index_cast %c4_i32 : i32 to index
    %c0_127 = arith.constant 0 : index
    %c0_128 = arith.constant 0 : index
    %386 = vector.load %arg13[%385, %c0_127, %c0_128] : memref<8x8x128xf32, #tpu.memory_space<vmem>>, vector<1x8x128xf32>
    %387 = vector.shape_cast %386 : vector<1x8x128xf32> to vector<8x128xf32>
    %388 = vector.shape_cast %384 : vector<8x128xf32> to vector<1x8x128xf32>
    tpu.vector_store %arg13[%385, %c0_127, %c0_128], %388 {strides = array<i32>} : memref<8x8x128xf32, #tpu.memory_space<vmem>>, vector<1x8x128xf32>,
    %c5_i32 = arith.constant 5 : i32
    %cst_129 = arith.constant dense<0.000000e+00> : vector<8x128xf32>
    %389 = tpu.matmul %367, %10, %cst_129 {dimension_numbers = #tpu.dot_dimension_numbers<[1], [0], [0], [1], [0, 0, 1, 1], [], []>} : vector<8x32xf32>, vector<32x128xf32>, vector<8x128xf32> -> vector<8x128xf32>
    %390 = vector.broadcast %11 : vector<1x128xf32> to vector<8x128xf32>
    %391 = arith.addf %389, %390 : vector<8x128xf32>
    %cst_130 = arith.constant dense<0xFF800000> : vector<8xf32>
    %392 = vector.multi_reduction <maximumf>, %391, %cst_130 [1] : vector<8x128xf32> to vector<8xf32>
    %393 = vector.shape_cast %392 : vector<8xf32> to vector<8x1xf32>
    %394 = vector.broadcast %393 : vector<8x1xf32> to vector<8x128xf32>
    %395 = arith.subf %391, %394 : vector<8x128xf32>
    %396 = math.exp %395 : vector<8x128xf32>
    %cst_131 = arith.constant dense<0.000000e+00> : vector<8xf32>
    %397 = vector.multi_reduction <add>, %396, %cst_131 [1] : vector<8x128xf32> to vector<8xf32>
    %398 = vector.shape_cast %397 : vector<8xf32> to vector<8x1xf32>
    %399 = vector.broadcast %398 : vector<8x1xf32> to vector<8x128xf32>
    %400 = arith.divf %396, %399 : vector<8x128xf32>
    %401 = arith.index_cast %c5_i32 : i32 to index
    %c0_132 = arith.constant 0 : index
    %c0_133 = arith.constant 0 : index
    %402 = vector.load %arg15[%401, %c0_132, %c0_133] : memref<8x8x128xf32, #tpu.memory_space<vmem>>, vector<1x8x128xf32>
    %403 = vector.shape_cast %402 : vector<1x8x128xf32> to vector<8x128xf32>
    %404 = vector.shape_cast %400 : vector<8x128xf32> to vector<1x8x128xf32>
    tpu.vector_store %arg15[%401, %c0_132, %c0_133], %404 {strides = array<i32>} : memref<8x8x128xf32, #tpu.memory_space<vmem>>, vector<1x8x128xf32>,
    %cst_134 = arith.constant dense<0.000000e+00> : vector<8x32xf32>
    %405 = tpu.matmul %400, %9, %cst_134 {dimension_numbers = #tpu.dot_dimension_numbers<[1], [0], [0], [1], [0, 0, 1, 1], [], []>} : vector<8x128xf32>, vector<128x32xf32>, vector<8x32xf32> -> vector<8x32xf32>
    %c8_i32_135 = arith.constant 8 : i32
    %406 = arith.muli %c5_i32, %c8_i32_135 : i32
    %407 = tpu.assume_multiple %406, 8 : i32
    %408 = arith.index_cast %407 : i32 to index
    %c0_136 = arith.constant 0 : index
    %409 = vector.load %arg16[%408, %c0_136] : memref<64x32xf32, #tpu.memory_space<vmem>>, vector<8x32xf32>
    %410 = tpu.concatenate %409, %405 in 1 : vector<8x32xf32>, vector<8x32xf32> -> vector<8x64xf32>
    %cst_137 = arith.constant dense<0.000000e+00> : vector<8x32xf32>
    %411 = tpu.matmul %410, %12, %cst_137 {dimension_numbers = #tpu.dot_dimension_numbers<[1], [0], [0], [1], [0, 0, 1, 1], [], []>} : vector<8x64xf32>, vector<64x32xf32>, vector<8x32xf32> -> vector<8x32xf32>
    %412 = vector.broadcast %13 : vector<1x32xf32> to vector<8x32xf32>
    %413 = arith.addf %411, %412 : vector<8x32xf32>
    %cst_138 = arith.constant 0.000000e+00 : f32
    %414 = vector.broadcast %cst_138 : f32 to vector<8x32xf32>
    %415 = arith.maximumf %413, %414 : vector<8x32xf32>
    %416 = tpu.concatenate %415, %367 in 1 : vector<8x32xf32>, vector<8x32xf32> -> vector<8x64xf32>
    %cst_139 = arith.constant dense<0.000000e+00> : vector<8x128xf32>
    %417 = tpu.matmul %416, %14, %cst_139 {dimension_numbers = #tpu.dot_dimension_numbers<[1], [0], [0], [1], [0, 0, 1, 1], [], []>} : vector<8x64xf32>, vector<64x128xf32>, vector<8x128xf32> -> vector<8x128xf32>
    %418 = vector.broadcast %15 : vector<1x128xf32> to vector<8x128xf32>
    %419 = arith.addf %417, %418 : vector<8x128xf32>
    %420 = vector.extract_strided_slice %419 {offsets = [0, 0], sizes = [8, 32], strides = [1, 1]} : vector<8x128xf32> to vector<8x32xf32>
    %421 = arith.negf %420 : vector<8x32xf32>
    %422 = math.exp %421 : vector<8x32xf32>
    %cst_140 = arith.constant 1.000000e+00 : f32
    %423 = vector.broadcast %cst_140 : f32 to vector<8x32xf32>
    %424 = arith.addf %423, %422 : vector<8x32xf32>
    %425 = arith.divf %423, %424 : vector<8x32xf32>
    %426 = vector.extract_strided_slice %419 {offsets = [0, 32], sizes = [8, 32], strides = [1, 1]} : vector<8x128xf32> to vector<8x32xf32>
    %427 = arith.negf %426 : vector<8x32xf32>
    %428 = math.exp %427 : vector<8x32xf32>
    %cst_141 = arith.constant 1.000000e+00 : f32
    %429 = vector.broadcast %cst_141 : f32 to vector<8x32xf32>
    %430 = arith.addf %429, %428 : vector<8x32xf32>
    %431 = arith.divf %429, %430 : vector<8x32xf32>
    %432 = vector.extract_strided_slice %419 {offsets = [0, 64], sizes = [8, 32], strides = [1, 1]} : vector<8x128xf32> to vector<8x32xf32>
    %433 = vector.extract_strided_slice %419 {offsets = [0, 96], sizes = [8, 32], strides = [1, 1]} : vector<8x128xf32> to vector<8x32xf32>
    %434 = arith.mulf %425, %433 : vector<8x32xf32>
    %435 = arith.addf %432, %434 : vector<8x32xf32>
    %436 = math.tanh %435 : vector<8x32xf32>
    %cst_142 = arith.constant 1.000000e+00 : f32
    %437 = vector.broadcast %cst_142 : f32 to vector<8x32xf32>
    %438 = arith.subf %437, %431 : vector<8x32xf32>
    %439 = arith.mulf %438, %436 : vector<8x32xf32>
    %440 = arith.mulf %431, %367 : vector<8x32xf32>
    %441 = arith.addf %439, %440 : vector<8x32xf32>
    %442 = arith.index_cast %c5_i32 : i32 to index
    %c0_143 = arith.constant 0 : index
    %c0_144 = arith.constant 0 : index
    %443 = vector.load %arg14[%442, %c0_143, %c0_144] : memref<8x8x32xf32, #tpu.memory_space<vmem>>, vector<1x8x32xf32>
    %444 = vector.shape_cast %443 : vector<1x8x32xf32> to vector<8x32xf32>
    %445 = vector.shape_cast %441 : vector<8x32xf32> to vector<1x8x32xf32>
    tpu.vector_store %arg14[%442, %c0_143, %c0_144], %445 {strides = array<i32>} : memref<8x8x32xf32, #tpu.memory_space<vmem>>, vector<1x8x32xf32>,
    %cst_145 = arith.constant dense<0.000000e+00> : vector<8x128xf32>
    %446 = tpu.matmul %441, %16, %cst_145 {dimension_numbers = #tpu.dot_dimension_numbers<[1], [0], [0], [1], [0, 0, 1, 1], [], []>} : vector<8x32xf32>, vector<32x128xf32>, vector<8x128xf32> -> vector<8x128xf32>
    %447 = vector.broadcast %17 : vector<1x128xf32> to vector<8x128xf32>
    %448 = arith.addf %446, %447 : vector<8x128xf32>
    %cst_146 = arith.constant dense<0xFF800000> : vector<8xf32>
    %449 = vector.multi_reduction <maximumf>, %448, %cst_146 [1] : vector<8x128xf32> to vector<8xf32>
    %450 = vector.shape_cast %449 : vector<8xf32> to vector<8x1xf32>
    %451 = vector.broadcast %450 : vector<8x1xf32> to vector<8x128xf32>
    %452 = arith.subf %448, %451 : vector<8x128xf32>
    %453 = math.exp %452 : vector<8x128xf32>
    %cst_147 = arith.constant dense<0.000000e+00> : vector<8xf32>
    %454 = vector.multi_reduction <add>, %453, %cst_147 [1] : vector<8x128xf32> to vector<8xf32>
    %455 = vector.shape_cast %454 : vector<8xf32> to vector<8x1xf32>
    %456 = math.log %455 : vector<8x1xf32>
    %457 = vector.broadcast %456 : vector<8x1xf32> to vector<8x128xf32>
    %458 = arith.subf %452, %457 : vector<8x128xf32>
    %459 = arith.index_cast %c5_i32 : i32 to index
    %c0_148 = arith.constant 0 : index
    %c0_149 = arith.constant 0 : index
    %460 = vector.load %arg13[%459, %c0_148, %c0_149] : memref<8x8x128xf32, #tpu.memory_space<vmem>>, vector<1x8x128xf32>
    %461 = vector.shape_cast %460 : vector<1x8x128xf32> to vector<8x128xf32>
    %462 = vector.shape_cast %458 : vector<8x128xf32> to vector<1x8x128xf32>
    tpu.vector_store %arg13[%459, %c0_148, %c0_149], %462 {strides = array<i32>} : memref<8x8x128xf32, #tpu.memory_space<vmem>>, vector<1x8x128xf32>,
    %c6_i32 = arith.constant 6 : i32
    %cst_150 = arith.constant dense<0.000000e+00> : vector<8x128xf32>
    %463 = tpu.matmul %441, %10, %cst_150 {dimension_numbers = #tpu.dot_dimension_numbers<[1], [0], [0], [1], [0, 0, 1, 1], [], []>} : vector<8x32xf32>, vector<32x128xf32>, vector<8x128xf32> -> vector<8x128xf32>
    %464 = vector.broadcast %11 : vector<1x128xf32> to vector<8x128xf32>
    %465 = arith.addf %463, %464 : vector<8x128xf32>
    %cst_151 = arith.constant dense<0xFF800000> : vector<8xf32>
    %466 = vector.multi_reduction <maximumf>, %465, %cst_151 [1] : vector<8x128xf32> to vector<8xf32>
    %467 = vector.shape_cast %466 : vector<8xf32> to vector<8x1xf32>
    %468 = vector.broadcast %467 : vector<8x1xf32> to vector<8x128xf32>
    %469 = arith.subf %465, %468 : vector<8x128xf32>
    %470 = math.exp %469 : vector<8x128xf32>
    %cst_152 = arith.constant dense<0.000000e+00> : vector<8xf32>
    %471 = vector.multi_reduction <add>, %470, %cst_152 [1] : vector<8x128xf32> to vector<8xf32>
    %472 = vector.shape_cast %471 : vector<8xf32> to vector<8x1xf32>
    %473 = vector.broadcast %472 : vector<8x1xf32> to vector<8x128xf32>
    %474 = arith.divf %470, %473 : vector<8x128xf32>
    %475 = arith.index_cast %c6_i32 : i32 to index
    %c0_153 = arith.constant 0 : index
    %c0_154 = arith.constant 0 : index
    %476 = vector.load %arg15[%475, %c0_153, %c0_154] : memref<8x8x128xf32, #tpu.memory_space<vmem>>, vector<1x8x128xf32>
    %477 = vector.shape_cast %476 : vector<1x8x128xf32> to vector<8x128xf32>
    %478 = vector.shape_cast %474 : vector<8x128xf32> to vector<1x8x128xf32>
    tpu.vector_store %arg15[%475, %c0_153, %c0_154], %478 {strides = array<i32>} : memref<8x8x128xf32, #tpu.memory_space<vmem>>, vector<1x8x128xf32>,
    %cst_155 = arith.constant dense<0.000000e+00> : vector<8x32xf32>
    %479 = tpu.matmul %474, %9, %cst_155 {dimension_numbers = #tpu.dot_dimension_numbers<[1], [0], [0], [1], [0, 0, 1, 1], [], []>} : vector<8x128xf32>, vector<128x32xf32>, vector<8x32xf32> -> vector<8x32xf32>
    %c8_i32_156 = arith.constant 8 : i32
    %480 = arith.muli %c6_i32, %c8_i32_156 : i32
    %481 = tpu.assume_multiple %480, 8 : i32
    %482 = arith.index_cast %481 : i32 to index
    %c0_157 = arith.constant 0 : index
    %483 = vector.load %arg16[%482, %c0_157] : memref<64x32xf32, #tpu.memory_space<vmem>>, vector<8x32xf32>
    %484 = tpu.concatenate %483, %479 in 1 : vector<8x32xf32>, vector<8x32xf32> -> vector<8x64xf32>
    %cst_158 = arith.constant dense<0.000000e+00> : vector<8x32xf32>
    %485 = tpu.matmul %484, %12, %cst_158 {dimension_numbers = #tpu.dot_dimension_numbers<[1], [0], [0], [1], [0, 0, 1, 1], [], []>} : vector<8x64xf32>, vector<64x32xf32>, vector<8x32xf32> -> vector<8x32xf32>
    %486 = vector.broadcast %13 : vector<1x32xf32> to vector<8x32xf32>
    %487 = arith.addf %485, %486 : vector<8x32xf32>
    %cst_159 = arith.constant 0.000000e+00 : f32
    %488 = vector.broadcast %cst_159 : f32 to vector<8x32xf32>
    %489 = arith.maximumf %487, %488 : vector<8x32xf32>
    %490 = tpu.concatenate %489, %441 in 1 : vector<8x32xf32>, vector<8x32xf32> -> vector<8x64xf32>
    %cst_160 = arith.constant dense<0.000000e+00> : vector<8x128xf32>
    %491 = tpu.matmul %490, %14, %cst_160 {dimension_numbers = #tpu.dot_dimension_numbers<[1], [0], [0], [1], [0, 0, 1, 1], [], []>} : vector<8x64xf32>, vector<64x128xf32>, vector<8x128xf32> -> vector<8x128xf32>
    %492 = vector.broadcast %15 : vector<1x128xf32> to vector<8x128xf32>
    %493 = arith.addf %491, %492 : vector<8x128xf32>
    %494 = vector.extract_strided_slice %493 {offsets = [0, 0], sizes = [8, 32], strides = [1, 1]} : vector<8x128xf32> to vector<8x32xf32>
    %495 = arith.negf %494 : vector<8x32xf32>
    %496 = math.exp %495 : vector<8x32xf32>
    %cst_161 = arith.constant 1.000000e+00 : f32
    %497 = vector.broadcast %cst_161 : f32 to vector<8x32xf32>
    %498 = arith.addf %497, %496 : vector<8x32xf32>
    %499 = arith.divf %497, %498 : vector<8x32xf32>
    %500 = vector.extract_strided_slice %493 {offsets = [0, 32], sizes = [8, 32], strides = [1, 1]} : vector<8x128xf32> to vector<8x32xf32>
    %501 = arith.negf %500 : vector<8x32xf32>
    %502 = math.exp %501 : vector<8x32xf32>
    %cst_162 = arith.constant 1.000000e+00 : f32
    %503 = vector.broadcast %cst_162 : f32 to vector<8x32xf32>
    %504 = arith.addf %503, %502 : vector<8x32xf32>
    %505 = arith.divf %503, %504 : vector<8x32xf32>
    %506 = vector.extract_strided_slice %493 {offsets = [0, 64], sizes = [8, 32], strides = [1, 1]} : vector<8x128xf32> to vector<8x32xf32>
    %507 = vector.extract_strided_slice %493 {offsets = [0, 96], sizes = [8, 32], strides = [1, 1]} : vector<8x128xf32> to vector<8x32xf32>
    %508 = arith.mulf %499, %507 : vector<8x32xf32>
    %509 = arith.addf %506, %508 : vector<8x32xf32>
    %510 = math.tanh %509 : vector<8x32xf32>
    %cst_163 = arith.constant 1.000000e+00 : f32
    %511 = vector.broadcast %cst_163 : f32 to vector<8x32xf32>
    %512 = arith.subf %511, %505 : vector<8x32xf32>
    %513 = arith.mulf %512, %510 : vector<8x32xf32>
    %514 = arith.mulf %505, %441 : vector<8x32xf32>
    %515 = arith.addf %513, %514 : vector<8x32xf32>
    %516 = arith.index_cast %c6_i32 : i32 to index
    %c0_164 = arith.constant 0 : index
    %c0_165 = arith.constant 0 : index
    %517 = vector.load %arg14[%516, %c0_164, %c0_165] : memref<8x8x32xf32, #tpu.memory_space<vmem>>, vector<1x8x32xf32>
    %518 = vector.shape_cast %517 : vector<1x8x32xf32> to vector<8x32xf32>
    %519 = vector.shape_cast %515 : vector<8x32xf32> to vector<1x8x32xf32>
    tpu.vector_store %arg14[%516, %c0_164, %c0_165], %519 {strides = array<i32>} : memref<8x8x32xf32, #tpu.memory_space<vmem>>, vector<1x8x32xf32>,
    %cst_166 = arith.constant dense<0.000000e+00> : vector<8x128xf32>
    %520 = tpu.matmul %515, %16, %cst_166 {dimension_numbers = #tpu.dot_dimension_numbers<[1], [0], [0], [1], [0, 0, 1, 1], [], []>} : vector<8x32xf32>, vector<32x128xf32>, vector<8x128xf32> -> vector<8x128xf32>
    %521 = vector.broadcast %17 : vector<1x128xf32> to vector<8x128xf32>
    %522 = arith.addf %520, %521 : vector<8x128xf32>
    %cst_167 = arith.constant dense<0xFF800000> : vector<8xf32>
    %523 = vector.multi_reduction <maximumf>, %522, %cst_167 [1] : vector<8x128xf32> to vector<8xf32>
    %524 = vector.shape_cast %523 : vector<8xf32> to vector<8x1xf32>
    %525 = vector.broadcast %524 : vector<8x1xf32> to vector<8x128xf32>
    %526 = arith.subf %522, %525 : vector<8x128xf32>
    %527 = math.exp %526 : vector<8x128xf32>
    %cst_168 = arith.constant dense<0.000000e+00> : vector<8xf32>
    %528 = vector.multi_reduction <add>, %527, %cst_168 [1] : vector<8x128xf32> to vector<8xf32>
    %529 = vector.shape_cast %528 : vector<8xf32> to vector<8x1xf32>
    %530 = math.log %529 : vector<8x1xf32>
    %531 = vector.broadcast %530 : vector<8x1xf32> to vector<8x128xf32>
    %532 = arith.subf %526, %531 : vector<8x128xf32>
    %533 = arith.index_cast %c6_i32 : i32 to index
    %c0_169 = arith.constant 0 : index
    %c0_170 = arith.constant 0 : index
    %534 = vector.load %arg13[%533, %c0_169, %c0_170] : memref<8x8x128xf32, #tpu.memory_space<vmem>>, vector<1x8x128xf32>
    %535 = vector.shape_cast %534 : vector<1x8x128xf32> to vector<8x128xf32>
    %536 = vector.shape_cast %532 : vector<8x128xf32> to vector<1x8x128xf32>
    tpu.vector_store %arg13[%533, %c0_169, %c0_170], %536 {strides = array<i32>} : memref<8x8x128xf32, #tpu.memory_space<vmem>>, vector<1x8x128xf32>,
    %c7_i32 = arith.constant 7 : i32
    %cst_171 = arith.constant dense<0.000000e+00> : vector<8x128xf32>
    %537 = tpu.matmul %515, %10, %cst_171 {dimension_numbers = #tpu.dot_dimension_numbers<[1], [0], [0], [1], [0, 0, 1, 1], [], []>} : vector<8x32xf32>, vector<32x128xf32>, vector<8x128xf32> -> vector<8x128xf32>
    %538 = vector.broadcast %11 : vector<1x128xf32> to vector<8x128xf32>
    %539 = arith.addf %537, %538 : vector<8x128xf32>
    %cst_172 = arith.constant dense<0xFF800000> : vector<8xf32>
    %540 = vector.multi_reduction <maximumf>, %539, %cst_172 [1] : vector<8x128xf32> to vector<8xf32>
    %541 = vector.shape_cast %540 : vector<8xf32> to vector<8x1xf32>
    %542 = vector.broadcast %541 : vector<8x1xf32> to vector<8x128xf32>
    %543 = arith.subf %539, %542 : vector<8x128xf32>
    %544 = math.exp %543 : vector<8x128xf32>
    %cst_173 = arith.constant dense<0.000000e+00> : vector<8xf32>
    %545 = vector.multi_reduction <add>, %544, %cst_173 [1] : vector<8x128xf32> to vector<8xf32>
    %546 = vector.shape_cast %545 : vector<8xf32> to vector<8x1xf32>
    %547 = vector.broadcast %546 : vector<8x1xf32> to vector<8x128xf32>
    %548 = arith.divf %544, %547 : vector<8x128xf32>
    %549 = arith.index_cast %c7_i32 : i32 to index
    %c0_174 = arith.constant 0 : index
    %c0_175 = arith.constant 0 : index
    %550 = vector.load %arg15[%549, %c0_174, %c0_175] : memref<8x8x128xf32, #tpu.memory_space<vmem>>, vector<1x8x128xf32>
    %551 = vector.shape_cast %550 : vector<1x8x128xf32> to vector<8x128xf32>
    %552 = vector.shape_cast %548 : vector<8x128xf32> to vector<1x8x128xf32>
    tpu.vector_store %arg15[%549, %c0_174, %c0_175], %552 {strides = array<i32>} : memref<8x8x128xf32, #tpu.memory_space<vmem>>, vector<1x8x128xf32>,
    %cst_176 = arith.constant dense<0.000000e+00> : vector<8x32xf32>
    %553 = tpu.matmul %548, %9, %cst_176 {dimension_numbers = #tpu.dot_dimension_numbers<[1], [0], [0], [1], [0, 0, 1, 1], [], []>} : vector<8x128xf32>, vector<128x32xf32>, vector<8x32xf32> -> vector<8x32xf32>
    %c8_i32_177 = arith.constant 8 : i32
    %554 = arith.muli %c7_i32, %c8_i32_177 : i32
    %555 = tpu.assume_multiple %554, 8 : i32
    %556 = arith.index_cast %555 : i32 to index
    %c0_178 = arith.constant 0 : index
    %557 = vector.load %arg16[%556, %c0_178] : memref<64x32xf32, #tpu.memory_space<vmem>>, vector<8x32xf32>
    %558 = tpu.concatenate %557, %553 in 1 : vector<8x32xf32>, vector<8x32xf32> -> vector<8x64xf32>
    %cst_179 = arith.constant dense<0.000000e+00> : vector<8x32xf32>
    %559 = tpu.matmul %558, %12, %cst_179 {dimension_numbers = #tpu.dot_dimension_numbers<[1], [0], [0], [1], [0, 0, 1, 1], [], []>} : vector<8x64xf32>, vector<64x32xf32>, vector<8x32xf32> -> vector<8x32xf32>
    %560 = vector.broadcast %13 : vector<1x32xf32> to vector<8x32xf32>
    %561 = arith.addf %559, %560 : vector<8x32xf32>
    %cst_180 = arith.constant 0.000000e+00 : f32
    %562 = vector.broadcast %cst_180 : f32 to vector<8x32xf32>
    %563 = arith.maximumf %561, %562 : vector<8x32xf32>
    %564 = tpu.concatenate %563, %515 in 1 : vector<8x32xf32>, vector<8x32xf32> -> vector<8x64xf32>
    %cst_181 = arith.constant dense<0.000000e+00> : vector<8x128xf32>
    %565 = tpu.matmul %564, %14, %cst_181 {dimension_numbers = #tpu.dot_dimension_numbers<[1], [0], [0], [1], [0, 0, 1, 1], [], []>} : vector<8x64xf32>, vector<64x128xf32>, vector<8x128xf32> -> vector<8x128xf32>
    %566 = vector.broadcast %15 : vector<1x128xf32> to vector<8x128xf32>
    %567 = arith.addf %565, %566 : vector<8x128xf32>
    %568 = vector.extract_strided_slice %567 {offsets = [0, 0], sizes = [8, 32], strides = [1, 1]} : vector<8x128xf32> to vector<8x32xf32>
    %569 = arith.negf %568 : vector<8x32xf32>
    %570 = math.exp %569 : vector<8x32xf32>
    %cst_182 = arith.constant 1.000000e+00 : f32
    %571 = vector.broadcast %cst_182 : f32 to vector<8x32xf32>
    %572 = arith.addf %571, %570 : vector<8x32xf32>
    %573 = arith.divf %571, %572 : vector<8x32xf32>
    %574 = vector.extract_strided_slice %567 {offsets = [0, 32], sizes = [8, 32], strides = [1, 1]} : vector<8x128xf32> to vector<8x32xf32>
    %575 = arith.negf %574 : vector<8x32xf32>
    %576 = math.exp %575 : vector<8x32xf32>
    %cst_183 = arith.constant 1.000000e+00 : f32
    %577 = vector.broadcast %cst_183 : f32 to vector<8x32xf32>
    %578 = arith.addf %577, %576 : vector<8x32xf32>
    %579 = arith.divf %577, %578 : vector<8x32xf32>
    %580 = vector.extract_strided_slice %567 {offsets = [0, 64], sizes = [8, 32], strides = [1, 1]} : vector<8x128xf32> to vector<8x32xf32>
    %581 = vector.extract_strided_slice %567 {offsets = [0, 96], sizes = [8, 32], strides = [1, 1]} : vector<8x128xf32> to vector<8x32xf32>
    %582 = arith.mulf %573, %581 : vector<8x32xf32>
    %583 = arith.addf %580, %582 : vector<8x32xf32>
    %584 = math.tanh %583 : vector<8x32xf32>
    %cst_184 = arith.constant 1.000000e+00 : f32
    %585 = vector.broadcast %cst_184 : f32 to vector<8x32xf32>
    %586 = arith.subf %585, %579 : vector<8x32xf32>
    %587 = arith.mulf %586, %584 : vector<8x32xf32>
    %588 = arith.mulf %579, %515 : vector<8x32xf32>
    %589 = arith.addf %587, %588 : vector<8x32xf32>
    %590 = arith.index_cast %c7_i32 : i32 to index
    %c0_185 = arith.constant 0 : index
    %c0_186 = arith.constant 0 : index
    %591 = vector.load %arg14[%590, %c0_185, %c0_186] : memref<8x8x32xf32, #tpu.memory_space<vmem>>, vector<1x8x32xf32>
    %592 = vector.shape_cast %591 : vector<1x8x32xf32> to vector<8x32xf32>
    %593 = vector.shape_cast %589 : vector<8x32xf32> to vector<1x8x32xf32>
    tpu.vector_store %arg14[%590, %c0_185, %c0_186], %593 {strides = array<i32>} : memref<8x8x32xf32, #tpu.memory_space<vmem>>, vector<1x8x32xf32>,
    %cst_187 = arith.constant dense<0.000000e+00> : vector<8x128xf32>
    %594 = tpu.matmul %589, %16, %cst_187 {dimension_numbers = #tpu.dot_dimension_numbers<[1], [0], [0], [1], [0, 0, 1, 1], [], []>} : vector<8x32xf32>, vector<32x128xf32>, vector<8x128xf32> -> vector<8x128xf32>
    %595 = vector.broadcast %17 : vector<1x128xf32> to vector<8x128xf32>
    %596 = arith.addf %594, %595 : vector<8x128xf32>
    %cst_188 = arith.constant dense<0xFF800000> : vector<8xf32>
    %597 = vector.multi_reduction <maximumf>, %596, %cst_188 [1] : vector<8x128xf32> to vector<8xf32>
    %598 = vector.shape_cast %597 : vector<8xf32> to vector<8x1xf32>
    %599 = vector.broadcast %598 : vector<8x1xf32> to vector<8x128xf32>
    %600 = arith.subf %596, %599 : vector<8x128xf32>
    %601 = math.exp %600 : vector<8x128xf32>
    %cst_189 = arith.constant dense<0.000000e+00> : vector<8xf32>
    %602 = vector.multi_reduction <add>, %601, %cst_189 [1] : vector<8x128xf32> to vector<8xf32>
    %603 = vector.shape_cast %602 : vector<8xf32> to vector<8x1xf32>
    %604 = math.log %603 : vector<8x1xf32>
    %605 = vector.broadcast %604 : vector<8x1xf32> to vector<8x128xf32>
    %606 = arith.subf %600, %605 : vector<8x128xf32>
    %607 = arith.index_cast %c7_i32 : i32 to index
    %c0_190 = arith.constant 0 : index
    %c0_191 = arith.constant 0 : index
    %608 = vector.load %arg13[%607, %c0_190, %c0_191] : memref<8x8x128xf32, #tpu.memory_space<vmem>>, vector<1x8x128xf32>
    %609 = vector.shape_cast %608 : vector<1x8x128xf32> to vector<8x128xf32>
    %610 = vector.shape_cast %606 : vector<8x128xf32> to vector<1x8x128xf32>
    tpu.vector_store %arg13[%607, %c0_190, %c0_191], %610 {strides = array<i32>} : memref<8x8x128xf32, #tpu.memory_space<vmem>>, vector<1x8x128xf32>,
    %c8_i32_192 = arith.constant 8 : i32
    return
  }
  func.func @transform_0(%arg0: i32) -> (i32, i32) {
    %c0_i32 = arith.constant 0 : i32
    %c0_i32_0 = arith.constant 0 : i32
    %c0_i32_1 = arith.constant 0 : i32
    return %c0_i32, %c0_i32_0 : i32, i32
  }
  func.func @transform_1(%arg0: i32) -> (i32, i32) {
    %c0_i32 = arith.constant 0 : i32
    %c0_i32_0 = arith.constant 0 : i32
    %c0_i32_1 = arith.constant 0 : i32
    return %c0_i32, %c0_i32_0 : i32, i32
  }
  func.func @transform_2(%arg0: i32) -> (i32, i32) {
    %c0_i32 = arith.constant 0 : i32
    %c0_i32_0 = arith.constant 0 : i32
    %c0_i32_1 = arith.constant 0 : i32
    return %c0_i32, %c0_i32_0 : i32, i32
  }
  func.func @transform_3(%arg0: i32) -> (i32, i32) {
    %c0_i32 = arith.constant 0 : i32
    %c0_i32_0 = arith.constant 0 : i32
    %c0_i32_1 = arith.constant 0 : i32
    return %c0_i32, %c0_i32_0 : i32, i32
  }
  func.func @transform_4(%arg0: i32) -> (i32, i32) {
    %c0_i32 = arith.constant 0 : i32
    %c0_i32_0 = arith.constant 0 : i32
    %c0_i32_1 = arith.constant 0 : i32
    return %c0_i32, %c0_i32_0 : i32, i32
  }
  func.func @transform_5(%arg0: i32) -> (i32, i32) {
    %c0_i32 = arith.constant 0 : i32
    %c0_i32_0 = arith.constant 0 : i32
    %c0_i32_1 = arith.constant 0 : i32
    return %c0_i32, %c0_i32_0 : i32, i32
  }
  func.func @transform_6(%arg0: i32) -> (i32, i32) {
    %c0_i32 = arith.constant 0 : i32
    %c0_i32_0 = arith.constant 0 : i32
    %c0_i32_1 = arith.constant 0 : i32
    return %c0_i32, %c0_i32_0 : i32, i32
  }
  func.func @transform_7(%arg0: i32) -> (i32, i32) {
    %c0_i32 = arith.constant 0 : i32
    %c0_i32_0 = arith.constant 0 : i32
    %c0_i32_1 = arith.constant 0 : i32
    return %c0_i32, %c0_i32_0 : i32, i32
  }
  func.func @transform_8(%arg0: i32) -> (i32, i32) {
    %c0_i32 = arith.constant 0 : i32
    %c0_i32_0 = arith.constant 0 : i32
    %c0_i32_1 = arith.constant 0 : i32
    return %c0_i32, %c0_i32_0 : i32, i32
  }
  func.func @transform_9(%arg0: i32) -> (i32, i32) {
    %c0_i32 = arith.constant 0 : i32
    %c0_i32_0 = arith.constant 0 : i32
    %c0_i32_1 = arith.constant 0 : i32
    return %c0_i32, %c0_i32_0 : i32, i32
  }
  func.func @transform_10(%arg0: i32) -> (i32, i32) {
    %c0_i32 = arith.constant 0 : i32
    %c0_i32_0 = arith.constant 0 : i32
    %c0_i32_1 = arith.constant 0 : i32
    return %c0_i32, %c0_i32_0 : i32, i32
  }
  func.func @transform_11(%arg0: i32) -> (i32, i32) {
    %c0_i32 = arith.constant 0 : i32
    %c0_i32_0 = arith.constant 0 : i32
    %c0_i32_1 = arith.constant 0 : i32
    return %c0_i32, %c0_i32_0 : i32, i32
  }
  func.func @transform_12(%arg0: i32) -> (i32, i32, i32) {
    %c0_i32 = arith.constant 0 : i32
    %c0_i32_0 = arith.constant 0 : i32
    %c0_i32_1 = arith.constant 0 : i32
    %c0_i32_2 = arith.constant 0 : i32
    return %c0_i32, %c0_i32_0, %c0_i32_1 : i32, i32, i32
  }
  func.func @transform_13(%arg0: i32) -> (i32, i32, i32) {
    %c0_i32 = arith.constant 0 : i32
    %c0_i32_0 = arith.constant 0 : i32
    %c0_i32_1 = arith.constant 0 : i32
    %c0_i32_2 = arith.constant 0 : i32
    return %c0_i32, %c0_i32_0, %c0_i32_1 : i32, i32, i32
  }
  func.func @transform_14(%arg0: i32) -> (i32, i32, i32) {
    %c0_i32 = arith.constant 0 : i32
    %c0_i32_0 = arith.constant 0 : i32
    %c0_i32_1 = arith.constant 0 : i32
    %c0_i32_2 = arith.constant 0 : i32
    return %c0_i32, %c0_i32_0, %c0_i32_1 : i32, i32, i32
  }
}

</mosaic_0001>

<bundles_post_ra>
// kernel: tpu_custom_call.1
= control target key start
LH: loop header
LB: loop body
LE: loop exit
PB: predicated region body
PF: predicated region fallthrough
CT: control target
= control target key end

     0   :  { %20 = vsyncpa [#allocation4], 0  ;;  %v5630_v3 = vmov 0.0|0.0   ;;  %vm5631_vm0 = vmmov 0   ;;  %v5632_v6 = vmov 0.0   ;;  %s6620_s0 = inlined_call_operand.vmem [shape: s32[64,1], index: 0, kind: input, shape index: {}]   ;;  %s6621_s1 = inlined_call_operand.vmem [shape: f32[20,32], index: 1, kind: input, shape index: {}]   ;;  %s6622_s2 = inlined_call_operand.vmem [shape: f32[8,32], index: 2, kind: input, shape index: {}]   ;;  %s6623_s3 = inlined_call_operand.vmem [shape: f32[128,32], index: 3, kind: input, shape index: {}]   ;;  %s6624_s4 = inlined_call_operand.vmem [shape: f32[32,128], index: 4, kind: input, shape index: {}]   ;;  %s6625_s5 = inlined_call_operand.vmem [shape: f32[1,128], index: 5, kind: input, shape index: {}]   ;;  %s6626_s6 = inlined_call_operand.vmem [shape: f32[64,32], index: 6, kind: input, shape index: {}]   ;;  %s6627_s7 = inlined_call_operand.vmem [shape: f32[1,32], index: 7, kind: input, shape index: {}]   ;;  %s6628_s8 = inlined_call_operand.vmem [shape: f32[64,128], index: 8, kind: input, shape index: {}]   ;;  %s6629_s9 = inlined_call_operand.vmem [shape: f32[1,128], index: 9, kind: input, shape index: {}]   ;;  %s6630_s10 = inlined_call_operand.vmem [shape: f32[32,128], index: 10, kind: input, shape index: {}]   ;;  %s6631_s11 = inlined_call_operand.vmem [shape: f32[1,128], index: 11, kind: input, shape index: {}]   ;;  %s6632_s12 = inlined_call_operand.hbm [shape: f32[8,8,128], index: 12, kind: output, shape index: {0}]   ;;  %s6633_s13 = inlined_call_operand.hbm [shape: f32[8,8,32], index: 13, kind: output, shape index: {1}]   ;;  %s6634_s14 = inlined_call_operand.hbm [shape: f32[8,8,128], index: 14, kind: output, shape index: {2}]  }
   0x1   :  { %v266_v0 = vld [vmem:[%s6624_s4] sm:$0xff]  ;;  %v267_v1 = vld [vmem:[%s6624_s4 + $0x8] sm:$0xff]  ;;  %v268_v2 = vld [vmem:[%s6624_s4 + $0x10] sm:$0xff]  ;;  %4951 = vmatprep.subr.bf16.mxu1 %v5630_v3  ;;  %4195 = vmatprep.mubr.msk.f32.mxu1 %vm5631_vm0, %v5632_v6 }
   0x2   :  { %v5727_v4 = vpack.c.bf16 %v267_v1, %v266_v0  ;;  %v269_v5 = vld [vmem:[%s6624_s4 + $0x18] sm:$0xff] }
   0x3   :  { %21 = vsyncpa [#allocation6], 0  ;;  %v5735_v7 = vpack.c.bf16 %v269_v5, %v268_v2  ;;  %vm241_vm1 = vcmask 261120   ;;  %v5742_v8 = vld [vmem:[%s6622_s2] sm:$0xff]  ;;  %v47_v9 = vld [vmem:[%s6620_s0 + $0x8] sm:$0xff]  ;;  %v5633_v10 = vmov 0   ;;  %v54_v25 = vlaneseq }
   0x4   :  { %4953 = vmatpush3.bf16.msra.mxu1 %v5727_v4  ;;  %5444 = vset.pattern.permute.xlu1 %v5633_v10  ;;  %v48_v11 = vld [vmem:[%s6620_s0 + $0x10] sm:$0xff]  ;;  %v5758_v12 = vld [vmem:[%s6625_s5] ss:$0 sm:$0xff]  ;;  %v49_v17 = vld [vmem:[%s6620_s0 + $0x18] sm:$0xff]  ;;  %vm132_vm2 = vcmask 1043456   ;;  %vm107_vm5 = vcmask 162816  }
   0x5   :  { %4954 = vmatprep.subr.bf16.mxu1 %v5630_v3  ;;  %5443 = vset.pattern.permute.xlu0 %v5633_v10  ;;  %v46_v16 = vld [vmem:[%s6620_s0] sm:$0xff]  ;;  %v51_v19 = vld [vmem:[%s6620_s0 + $0x28] sm:$0xff]  ;;  %v53_v20 = vld [vmem:[%s6620_s0 + $0x38] sm:$0xff]  ;;  %v5786_v29 = vand.u32 127, %v54_v25  ;;  %s5634_s2 = smov 32   ;;  %vm466_vm12 = vcmask 523264  }
   0x6   :  { %60 = vperm.xlu1 %5444, %v47_v9   ;;  %v50_v18 = vld [vmem:[%s6620_s0 + $0x20] sm:$0xff]  ;;  %v105_v22 = vld [vmem:[%s6621_s1 + $0x8] sm:$0xff]  ;;  %v106_v24 = vld [vmem:[%s6621_s1 + $0x10] sm:$0xf]  ;;  %s5635_s17 = smov 64   ;;  %s5636_s4 = smov 96  }
   0x7   :  { %v104_v21 = vld [vmem:[%s6621_s1] sm:$0xff]  ;;  %v251_v33 = vld [vmem:[%s6623_s3 + $0x8] sm:$0xff]  ;;  %v252_v39 = vld [vmem:[%s6623_s3 + $0x10] sm:$0xff] }
   0x8   :  { %4956 = vmatpush3.bf16.msra.mxu1 %v5735_v7  ;;  %v4947_v23 = vpack.c.bf16 %v105_v22, %v104_v21  ;;  %v250_v32 = vld [vmem:[%s6623_s3] sm:$0xff]  ;;  %v253_v40 = vld [vmem:[%s6623_s3 + $0x18] sm:$0xff]  ;;  %v255_v45 = vld [vmem:[%s6623_s3 + $0x28] sm:$0xff] }
   0x9   :  { %4981 = vmatprep.subr.bf16.mxu1 %v5630_v3  ;;  %v5798_v36 = vpack.c.bf16 %v251_v33, %v250_v32  ;;  %v5813_v42 = vpack.c.bf16 %v253_v40, %v252_v39  ;;  %v254_v44 = vld [vmem:[%s6623_s3 + $0x20] sm:$0xff]  ;;  %v256_v50 = vld [vmem:[%s6623_s3 + $0x30] sm:$0xff]  ;;  %v257_v51 = vld [vmem:[%s6623_s3 + $0x38] sm:$0xff] }
   0xa   :  { %63 = vperm.xlu1 %5444, %v48_v11   ;;  %4948 = vmatprep.subr.bf16.mxu0 %v4947_v23  ;;  %v5826_v48 = vpack.c.bf16 %v255_v45, %v254_v44  ;;  %v5839_v53 = vpack.c.bf16 %v257_v51, %v256_v50  ;;  %v258_v55 = vld [vmem:[%s6623_s3 + $0x40] sm:$0xff]  ;;  %v259_v56 = vld [vmem:[%s6623_s3 + $0x48] sm:$0xff]  ;;  %v260_v58 = vld [vmem:[%s6623_s3 + $0x50] sm:$0xff] }
   0xb   :  { %4196 = vmatmul.mubr.msk.f32.vlgmr.msra.gmra.mrb[0].mxu1 %vm241_vm1, %v5742_v8  ;;  %4950 = vmatpush3.bf16.msra.mxu0 %v4947_v23  ;;  %v5851_v57 = vpack.c.bf16 %v259_v56, %v258_v55  ;;  %v261_v59 = vld [vmem:[%s6623_s3 + $0x58] sm:$0xff]  ;;  %v52_v60 = vld [vmem:[%s6620_s0 + $0x30] sm:$0xff]  ;;  %v262_v62 = vld [vmem:[%s6623_s3 + $0x60] sm:$0xff] }
   0xc   :  { %4249 = vmatprep.mubr.msk.f32.mxu1 %vm5631_vm0, %v5632_v6  ;;  %4173 = vmatprep.subr.msk.mxu0 %vm132_vm2, %v106_v24  ;;  %v5865_v61 = vpack.c.bf16 %v261_v59, %v260_v58  ;;  %v263_v63 = vld [vmem:[%s6623_s3 + $0x68] sm:$0xff]  ;;  %v264_v1 = vld [vmem:[%s6623_s3 + $0x70] sm:$0xff]  ;;  %v265_v2 = vld [vmem:[%s6623_s3 + $0x78] sm:$0xff] }
   0xd   :  { %v5875_v0 = vpack.c.bf16 %v263_v63, %v262_v62  ;;  %v5885_v5 = vpack.c.bf16 %v265_v2, %v264_v1  ;;  %v271_v23 = vld [vmem:[%s6626_s6] sm:$0xff]  ;;  %v273_v25 = vld [vmem:[%s6626_s6 + $0x10] sm:$0xff]  ;;  %v278_v32 = vld [vmem:[%s6626_s6 + $0x38] sm:$0xff] }
   0xe   :  { %v280_v39 = vld [vmem:[%s6628_s8] sm:$0xff]  ;;  %v281_v40 = vld [vmem:[%s6628_s8 + $0x8] sm:$0xff]  ;;  %v282_v45 = vld [vmem:[%s6628_s8 + $0x10] sm:$0xff] }
   0xf   :  { %4174 = vmatpush3.msk.msra.mxu0 %vm132_vm2, %v106_v24  ;;  %v272_v24 = vld [vmem:[%s6626_s6 + $0x8] sm:$0xff]  ;;  %v284_v50 = vld [vmem:[%s6628_s8 + $0x20] sm:$0xff]  ;;  %v287_v55 = vld [vmem:[%s6628_s8 + $0x38] sm:$0xff] }
  0x10   :  { %4957 = vmatprep.subr.bf16.mxu0 %v5630_v3  ;;  %v285_v51 = vld [vmem:[%s6628_s8 + $0x28] sm:$0xff]  ;;  %v5997_v58 = vld [vmem:[%s6627_s7] ss:$0 sm:$0xff] }
  0x85   :  { %v61_v26 = vpop.permute.xlu1 %60 }
  0x86   :  { %vm81_vm3 = vcmp.eq.s32.totalorder %v5786_v29, %v61_v26  ;;  %v5916_v26 = vpack.c.bf16 %v272_v24, %v271_v23  ;;  %v290_v23 = vld [vmem:[%s6630_s10 + $0x8] sm:$0xff]  ;;  %v291_v24 = vld [vmem:[%s6630_s10 + $0x10] sm:$0xff] }
  0x87   :  { %v3738_v35 = vsel %vm81_vm3, 1.0, %v5632_v6 }
  0x88   :  { %4983 = vmatpush3.bf16.msra.mxu1 %v5916_v26 }
  0x89   :  { %v64_v31 = vpop.permute.xlu1 %63  ;;  %4984 = vmatprep.subr.bf16.mxu1 %v5630_v3 }
  0x8a   :  { %vm82_vm4 = vcmp.eq.s32.totalorder %v5786_v29, %v64_v31  ;;  %v277_v31 = vld [vmem:[%s6626_s6 + $0x30] sm:$0xff] }
  0x8b   :  { %v3739_v37 = vsel %vm82_vm4, 1.0, %v5632_v6  ;;  %v5942_v33 = vpack.c.bf16 %v278_v32, %v277_v31 }
  0xde   :  { %v370_v13 = vpop.f32.mrb[0].mxu1 }
  0xdf   :  { %v371_v14 = vadd.f32 %v5758_v12, %v370_v13  ;;  %v4197_v15 = vpop.f32.mrb[1].mxu1 }
  0xe1   :  { %374 = vmax.xlane.f32.xlu0 %v371_v14 }
  0xf7   :  { %57 = vperm.xlu0 %5443, %v46_v16  }
  0xfb   :  { %66 = vperm.xlu0 %5443, %v49_v17  }
  0xff   :  { %69 = vperm.xlu0 %5443, %v50_v18  }
 0x103   :  { %72 = vperm.xlu0 %5443, %v51_v19  }
 0x107   :  { %78 = vperm.xlu0 %5443, %v53_v20  }
 0x10b   :  { %541 = vrot.lane.b32.xlu0 %v5742_v8, %s5634_s2  ;;  %v276_v8 = vld [vmem:[%s6626_s6 + $0x28] sm:$0xff] }
 0x16e   :  { %v375_v27 = vpop.xlane.xlu0 %374 }
 0x16f   :  { %v376_v28 = vsub.f32 %v371_v14, %v375_v27  ;;  %v274_v27 = vld [vmem:[%s6626_s6 + $0x18] sm:$0xff] }
 0x171   :  { %v377_v30 = vmul.f32 1.442695, %v376_v28  ;;  %v5922_v28 = vpack.c.bf16 %v274_v27, %v273_v25  ;;  %v292_v27 = vld [vmem:[%s6630_s10 + $0x18] sm:$0xff] }
 0x173   :  { %5445 = vpow2.f32 %v377_v30  ;;  %4986 = vmatpush3.bf16.msra.mxu1 %v5922_v28 }
 0x174   :  { %4987 = vmatprep.subr.bf16.mxu1 %v5630_v3 }
 0x176   :  { %v58_v34 = vpop.permute.xlu0 %57 }
 0x177   :  { %vm80_vm6 = vcmp.eq.s32.totalorder %v5786_v29, %v58_v34 }
 0x178   :  { %v3737_v38 = vsel %vm80_vm6, 1.0, %v5632_v6 }
 0x179   :  { %4175 = vmatprep.mubr.msk.f32.mxu0 %vm107_vm5, %v3737_v38 }
 0x17a   :  { %4176 = vmatmul.mubr.msk.f32.vlgmr.msra.gmra.mrb[0].mxu0 %vm107_vm5, %v3738_v35  ;;  %v67_v41 = vpop.permute.xlu0 %66 }
 0x17b   :  { %4178 = vmatprep.mubr.msk.f32.mxu0 %vm107_vm5, %v3739_v37  ;;  %vm83_vm7 = vcmp.eq.s32.totalorder %v5786_v29, %v67_v41  ;;  %4959 = vmatpush3.bf16.msra.mxu0 %v5798_v36  ;;  %v5956_v41 = vpack.c.bf16 %v281_v40, %v280_v39 }
 0x17c   :  { %v3740_v43 = vsel %vm83_vm7, 1.0, %v5632_v6  ;;  %4960 = vmatprep.subr.bf16.mxu0 %v5630_v3 }
 0x17d   :  { %v5446_v46 = vpop.eup %5445 }
 0x17e   :  { %379 = vadd.xlane.f32.xlu1 %v5446_v46  ;;  %v70_v47 = vpop.permute.xlu0 %69  ;;  %4179 = vmatmul.mubr.msk.f32.gmra.mrb[2].mxu0 %vm107_vm5, %v3740_v43 }
 0x17f   :  { %vm84_vm8 = vcmp.eq.s32.totalorder %v5786_v29, %v70_v47  ;;  %4962 = vmatpush3.bf16.msra.mxu0 %v5813_v42 }
 0x180   :  { %v3741_v49 = vsel %vm84_vm8, 1.0, %v5632_v6  ;;  %4963 = vmatprep.subr.bf16.mxu0 %v5630_v3 }
 0x181   :  { %4181 = vmatprep.mubr.msk.f32.mxu0 %vm107_vm5, %v3741_v49 }
 0x182   :  { %v73_v52 = vpop.permute.xlu0 %72 }
 0x183   :  { %vm85_vm9 = vcmp.eq.s32.totalorder %v5786_v29, %v73_v52  ;;  %4965 = vmatpush3.bf16.msra.mxu0 %v5826_v48  ;;  %v5979_v52 = vpack.c.bf16 %v285_v51, %v284_v50 }
 0x184   :  { %v3742_v54 = vsel %vm85_vm9, 1.0, %v5632_v6  ;;  %4966 = vmatprep.subr.bf16.mxu0 %v5630_v3 }
 0x185   :  { %4182 = vmatmul.mubr.msk.f32.gmra.mrb[4].mxu0 %vm107_vm5, %v3742_v54  ;;  %v286_v54 = vld [vmem:[%s6628_s8 + $0x30] sm:$0xff] }
 0x186   :  { %v79_v10 = vpop.permute.xlu0 %78  ;;  %v5990_v56 = vpack.c.bf16 %v287_v55, %v286_v54 }
 0x187   :  { %4968 = vmatpush3.bf16.msra.mxu0 %v5839_v53  ;;  %vm87_vm10 = vcmp.eq.s32.totalorder %v5786_v29, %v79_v10 }
 0x188   :  { %4969 = vmatprep.subr.bf16.mxu0 %v5630_v3  ;;  %v3744_v14 = vsel %vm87_vm10, 1.0, %v5632_v6 }
 0x18a   :  { %v542_v63 = vpop.permute.xlu0 %541 }
 0x18b   :  { %4971 = vmatpush3.bf16.msra.mxu0 %v5851_v57 }
 0x18c   :  { %4972 = vmatprep.subr.bf16.mxu0 %v5630_v3 }
 0x18f   :  { %75 = vperm.xlu1 %5444, %v52_v60   ;;  %4974 = vmatpush3.bf16.msra.mxu0 %v5865_v61 }
 0x190   :  { %4975 = vmatprep.subr.bf16.mxu0 %v5630_v3 }
 0x193   :  { %4977 = vmatpush3.bf16.msra.mxu0 %v5875_v0 }
 0x194   :  { %4978 = vmatprep.subr.bf16.mxu0 %v5630_v3 }
 0x197   :  { %4980 = vmatpush3.bf16.msra.mxu0 %v5885_v5 }
 0x198   :  { %5005 = vmatprep.subr.bf16.mxu0 %v5630_v3 }
 0x20b   :  { %v380_v9 = vpop.xlane.xlu1 %379 }
 0x20c   :  { %5447 = vrcp.f32 %v380_v9  ;;  %v6011_v9 = vld [vmem:[%s6629_s9] ss:$0 sm:$0xff] }
 0x20f   :  { %v76_v11 = vpop.permute.xlu1 %75 }
 0x210   :  { %vm86_vm11 = vcmp.eq.s32.totalorder %v5786_v29, %v76_v11  ;;  %v275_v29 = vld [vmem:[%s6626_s6 + $0x20] sm:$0xff] }
 0x211   :  { %v3743_v13 = vsel %vm86_vm11, 1.0, %v5632_v6  ;;  %v5932_v30 = vpack.c.bf16 %v276_v8, %v275_v29  ;;  %v6031_v29 = vpack.c.bf16 %v292_v27, %v291_v24 }
 0x212   :  { %4184 = vmatprep.mubr.msk.f32.mxu0 %vm107_vm5, %v3743_v13 }
 0x213   :  { %4185 = vmatmul.mubr.msk.f32.gmra.mrb[6].mxu0 %vm107_vm5, %v3744_v14  ;;  %4989 = vmatpush3.bf16.msra.mxu1 %v5932_v30 }
 0x214   :  { %4230 = vmatprep.mubr.msk.f32.mxu0 %vm5631_vm0, %v5632_v6  ;;  %4990 = vmatprep.subr.bf16.mxu1 %v5630_v3 }
 0x216   :  { %v5448_v15 = vpop.eup %5447 }
 0x217   :  { %v382_v16 = vmul.f32 %v5448_v15, %v5446_v46  ;;  %4992 = vmatpush3.bf16.msra.mxu1 %v5942_v33  ;;  %v283_v46 = vld [vmem:[%s6628_s8 + $0x18] sm:$0xff] }
 0x218   :  { %4993 = vmatprep.subr.bf16.mxu1 %v5630_v3  ;;  %v5967_v49 = vpack.c.bf16 %v283_v46, %v282_v45 }
 0x219   :  { %383 = vst [vmem:[#allocation7] sm:$0xff] %v382_v16  ;;  %4231 = vmatmul.mubr.f32.vlgmr.msra.gmra.mrb[8].mxu0 %v382_v16 }
 0x21a   :  { %4279 = vmatprep.mubr.msk.f32.mxu0 %vm5631_vm0, %v5632_v6 }
 0x24d   :  { %v4177_v17 = vpop.f32.mrb[0].mxu0 }
 0x24e   :  { %243 = vst.msk [vmem:[#allocation2 + $0x8] sm:$0xff] %vm241_vm1, %v4177_v17  ;;  %v202_v18 = vpop.f32.mrb[1].mxu0 }
 0x24f   :  { %242 = vst.msk [vmem:[#allocation2] sm:$0xff] %vm241_vm1, %v202_v18 }
 0x251   :  { %v4180_v19 = vpop.f32.mrb[2].mxu0 }
 0x252   :  { %245 = vst.msk [vmem:[#allocation2 + $0x18] sm:$0xff] %vm241_vm1, %v4180_v19  ;;  %v212_v20 = vpop.f32.mrb[3].mxu0 }
 0x253   :  { %244 = vst.msk [vmem:[#allocation2 + $0x10] sm:$0xff] %vm241_vm1, %v212_v20 }
 0x256   :  { %v454_v43 = vld [vmem:[#allocation2] sm:$0xff] }
 0x258   :  { %v4183_v21 = vpop.f32.mrb[4].mxu0 }
 0x259   :  { %247 = vst.msk [vmem:[#allocation2 + $0x28] sm:$0xff] %vm241_vm1, %v4183_v21  ;;  %v222_v22 = vpop.f32.mrb[5].mxu0 }
 0x25a   :  { %246 = vst.msk [vmem:[#allocation2 + $0x20] sm:$0xff] %vm241_vm1, %v222_v22  ;;  %v289_v22 = vld [vmem:[%s6630_s10] sm:$0xff] }
 0x25b   :  { %v6025_v25 = vpack.c.bf16 %v290_v23, %v289_v22 }
 0x25d   :  { %5007 = vmatpush3.bf16.msra.mxu0 %v6025_v25 }
 0x25e   :  { %5008 = vmatprep.subr.bf16.mxu0 %v5630_v3 }
 0x261   :  { %5010 = vmatpush3.bf16.msra.mxu0 %v6031_v29 }
 0x262   :  { %5017 = vmatprep.subr.bf16.mxu0 %v5630_v3 }
 0x2e6   :  { %v4186_v34 = vpop.f32.mrb[6].mxu0 }
 0x2e7   :  { %249 = vst.msk [vmem:[#allocation2 + $0x38] sm:$0xff] %vm241_vm1, %v4186_v34  ;;  %v232_v35 = vpop.f32.mrb[7].mxu0 }
 0x2e8   :  { %248 = vst.msk [vmem:[#allocation2 + $0x30] sm:$0xff] %vm241_vm1, %v232_v35 }
 0x2ec   :  { %v450_v37 = vpop.f32.mrb[8].mxu0 }
 0x2ed   :  { %456 = vrot.lane.b32.xlu1 %v450_v37, %s5634_s2  ;;  %v4232_v38 = vpop.f32.mrb[9].mxu0 }
 0x35f   :  { %v457_v44 = vpop.permute.xlu1 %456 }
 0x360   :  { %v459_v47 = vsel %vm241_vm1, %v454_v43, %v457_v44 }
 0x361   :  { %4250 = vmatmul.mubr.msk.f32.vlgmr.msra.gmra.mrb[2].mxu1 %vm466_vm12, %v459_v47 }
 0x362   :  { %4995 = vmatpush3.bf16.msra.mxu1 %v5956_v41  ;;  %4268 = vmatprep.mubr.msk.f32.mxu1 %vm5631_vm0, %v5632_v6 }
 0x363   :  { %4996 = vmatprep.subr.bf16.mxu1 %v5630_v3 }
 0x366   :  { %4998 = vmatpush3.bf16.msra.mxu1 %v5967_v49 }
 0x367   :  { %4999 = vmatprep.subr.bf16.mxu1 %v5630_v3 }
 0x36a   :  { %5001 = vmatpush3.bf16.msra.mxu1 %v5979_v52 }
 0x36b   :  { %5002 = vmatprep.subr.bf16.mxu1 %v5630_v3 }
 0x36e   :  { %5004 = vmatpush3.bf16.msra.mxu1 %v5990_v56 }
 0x36f   :  { %5011 = vmatprep.subr.bf16.mxu1 %v5630_v3 }
 0x434   :  { %v536_v59 = vpop.f32.mrb[2].mxu1 }
 0x435   :  { %v537_v60 = vadd.f32 %v5997_v58, %v536_v59  ;;  %v4251_v62 = vpop.f32.mrb[3].mxu1 }
 0x437   :  { %v540_v1 = vmax.f32 %v537_v60, 0.0 }
 0x439   :  { %v544_v2 = vsel %vm241_vm1, %v540_v1, %v542_v63 }
 0x43a   :  { %4269 = vmatmul.mubr.msk.f32.vlgmr.msra.gmra.mrb[4].mxu1 %vm466_vm12, %v544_v2 }
 0x43b   :  { %5013 = vmatpush3.bf16.msra.mxu1 %v5727_v4  ;;  %4290 = vmatprep.mubr.msk.f32.mxu1 %vm5631_vm0, %v5632_v6 }
 0x43c   :  { %5014 = vmatprep.subr.bf16.mxu1 %v5630_v3 }
 0x43f   :  { %5016 = vmatpush3.bf16.msra.mxu1 %v5735_v7 }
 0x440   :  { %5041 = vmatprep.subr.bf16.mxu1 %v5630_v3 }
 0x50d   :  { %v620_v10 = vpop.f32.mrb[4].mxu1 }
 0x50e   :  { %v621_v11 = vadd.f32 %v6011_v9, %v620_v10  ;;  %v4270_v13 = vpop.f32.mrb[5].mxu1 }
 0x510   :  { %631 = vrot.lane.b32.xlu1 %v621_v11, %s5634_s2  ;;  %v3760_v14 = vmul.f32 -1.442695, %v621_v11 }
 0x512   :  { %5449 = vpow2.f32 %v3760_v14 }
 0x51c   :  { %v5450_v15 = vpop.eup %5449 }
 0x51d   :  { %v627_v16 = vadd.f32 1.0, %v5450_v15 }
 0x51f   :  { %5451 = vrcp.f32 %v627_v16 }
 0x529   :  { %v5452_v17 = vpop.eup %5451 }
 0x52a   :  { %v641_v31 = vsub.f32 1.0, %v5452_v17  ;;  %v647_v34 = vmul.f32 %v5452_v17, %v542_v63  ;;  %v895_v63 = vld [vmem:[#allocation2 + $0x8] sm:$0xff] }
 0x582   :  { %v632_v18 = vpop.permute.xlu1 %631 }
 0x583   :  { %v634_v19 = vmul.f32 %v5452_v17, %v632_v18 }
 0x585   :  { %636 = vrot.lane.b32.xlu0 %v634_v19, %s5635_s17 }
 0x5f7   :  { %v637_v20 = vpop.permute.xlu0 %636 }
 0x5f8   :  { %v639_v21 = vadd.f32 %v637_v20, %v621_v11 }
 0x5fa   :  { %5453 = vtanh.f32 %v639_v21 }
 0x604   :  { %v5454_v8 = vpop.eup %5453 }
 0x605   :  { %643 = vrot.lane.b32.xlu1 %v5454_v8, %s5636_s4 }
 0x677   :  { %v644_v32 = vpop.permute.xlu1 %643 }
 0x678   :  { %v646_v35 = vmul.f32 %v644_v32, %v641_v31 }
 0x67a   :  { %v6037_v37 = vadd.f32 %v647_v34, %v646_v35 }
 0x67c   :  { %650 = vrot.lane.b32.xlu0 %v6037_v37, %s5636_s4 }
 0x6ee   :  { %v651_v38 = vpop.permute.xlu0 %650 }
 0x6ef   :  { %653 = vst.msk [vmem:[#allocation5] sm:$0xff] %vm241_vm1, %v651_v38  ;;  %4280 = vmatmul.mubr.msk.f32.vlgmr.msra.gmra.mrb[10].mxu0 %vm241_vm1, %v651_v38  ;;  %4291 = vmatmul.mubr.msk.f32.vlgmr.msra.gmra.mrb[6].mxu1 %vm241_vm1, %v651_v38 }
 0x6f0   :  { %5019 = vmatpush3.bf16.msra.mxu0 %v5798_v36  ;;  %4325 = vmatprep.mubr.msk.f32.mxu0 %vm5631_vm0, %v5632_v6 }
 0x6f1   :  { %5020 = vmatprep.subr.bf16.mxu0 %v5630_v3  ;;  %5043 = vmatpush3.bf16.msra.mxu1 %v5916_v26 }
 0x6f2   :  { %5044 = vmatprep.subr.bf16.mxu1 %v5630_v3  ;;  %4344 = vmatprep.mubr.msk.f32.mxu1 %vm5631_vm0, %v5632_v6 }
 0x6f4   :  { %5022 = vmatpush3.bf16.msra.mxu0 %v5813_v42 }
 0x6f5   :  { %5023 = vmatprep.subr.bf16.mxu0 %v5630_v3  ;;  %5046 = vmatpush3.bf16.msra.mxu1 %v5922_v28 }
 0x6f6   :  { %5047 = vmatprep.subr.bf16.mxu1 %v5630_v3 }
 0x6f8   :  { %5025 = vmatpush3.bf16.msra.mxu0 %v5826_v48 }
 0x6f9   :  { %5026 = vmatprep.subr.bf16.mxu0 %v5630_v3  ;;  %5049 = vmatpush3.bf16.msra.mxu1 %v5932_v30 }
 0x6fa   :  { %5050 = vmatprep.subr.bf16.mxu1 %v5630_v3 }
 0x6fc   :  { %5028 = vmatpush3.bf16.msra.mxu0 %v5839_v53 }
 0x6fd   :  { %5029 = vmatprep.subr.bf16.mxu0 %v5630_v3  ;;  %5052 = vmatpush3.bf16.msra.mxu1 %v5942_v33 }
 0x6fe   :  { %5053 = vmatprep.subr.bf16.mxu1 %v5630_v3 }
 0x700   :  { %5031 = vmatpush3.bf16.msra.mxu0 %v5851_v57 }
 0x701   :  { %5032 = vmatprep.subr.bf16.mxu0 %v5630_v3 }
 0x704   :  { %5034 = vmatpush3.bf16.msra.mxu0 %v5865_v61 }
 0x705   :  { %5035 = vmatprep.subr.bf16.mxu0 %v5630_v3 }
 0x708   :  { %5037 = vmatpush3.bf16.msra.mxu0 %v5875_v0 }
 0x709   :  { %5038 = vmatprep.subr.bf16.mxu0 %v5630_v3 }
 0x70c   :  { %5040 = vmatpush3.bf16.msra.mxu0 %v5885_v5 }
 0x70d   :  { %5065 = vmatprep.subr.bf16.mxu0 %v5630_v3 }
 0x7c2   :  { %v6072_v39 = vpop.f32.mrb[10].mxu0  ;;  %v809_v40 = vpop.f32.mrb[6].mxu1 }
 0x7c3   :  { %v810_v43 = vadd.f32 %v5758_v12, %v809_v40  ;;  %v4281_v44 = vpop.f32.mrb[11].mxu0  ;;  %v4292_v45 = vpop.f32.mrb[7].mxu1 }
 0x7c5   :  { %813 = vmax.xlane.f32.xlu1 %v810_v43 }
 0x852   :  { %v814_v46 = vpop.xlane.xlu1 %813 }
 0x853   :  { %v815_v47 = vsub.f32 %v810_v43, %v814_v46 }
 0x855   :  { %v816_v50 = vmul.f32 1.442695, %v815_v47 }
 0x857   :  { %5455 = vpow2.f32 %v816_v50 }
 0x861   :  { %v5456_v51 = vpop.eup %5455 }
 0x862   :  { %818 = vadd.xlane.f32.xlu0 %v5456_v51 }
 0x8ef   :  { %v819_v54 = vpop.xlane.xlu0 %818 }
 0x8f0   :  { %5457 = vrcp.f32 %v819_v54 }
 0x8fa   :  { %v5458_v55 = vpop.eup %5457 }
 0x8fb   :  { %v821_v59 = vmul.f32 %v5458_v55, %v5456_v51 }
 0x8fd   :  { %823 = vst [vmem:[#allocation7 + $0x8] sm:$0xff] %v821_v59  ;;  %4326 = vmatmul.mubr.f32.vlgmr.msra.gmra.mrb[12].mxu0 %v821_v59 }
 0x8fe   :  { %5067 = vmatpush3.bf16.msra.mxu0 %v6025_v25  ;;  %4374 = vmatprep.mubr.msk.f32.mxu0 %vm5631_vm0, %v5632_v6 }
 0x8ff   :  { %5068 = vmatprep.subr.bf16.mxu0 %v5630_v3 }
 0x902   :  { %5070 = vmatpush3.bf16.msra.mxu0 %v6031_v29 }
 0x903   :  { %5077 = vmatprep.subr.bf16.mxu0 %v5630_v3 }
 0x9d0   :  { %v890_v60 = vpop.f32.mrb[12].mxu0 }
 0x9d1   :  { %897 = vrot.lane.b32.xlu0 %v890_v60, %s5634_s2  ;;  %v4327_v62 = vpop.f32.mrb[13].mxu0 }
 0xa43   :  { %v898_v1 = vpop.permute.xlu0 %897 }
 0xa44   :  { %v900_v2 = vsel %vm241_vm1, %v895_v63, %v898_v1 }
 0xa45   :  { %4345 = vmatmul.mubr.msk.f32.vlgmr.msra.gmra.mrb[8].mxu1 %vm466_vm12, %v900_v2  ;;  %v1316_v2 = vld [vmem:[#allocation2 + $0x10] sm:$0xff] }
 0xa46   :  { %5055 = vmatpush3.bf16.msra.mxu1 %v5956_v41  ;;  %4363 = vmatprep.mubr.msk.f32.mxu1 %vm5631_vm0, %v5632_v6 }
 0xa47   :  { %5056 = vmatprep.subr.bf16.mxu1 %v5630_v3 }
 0xa4a   :  { %5058 = vmatpush3.bf16.msra.mxu1 %v5967_v49 }
 0xa4b   :  { %5059 = vmatprep.subr.bf16.mxu1 %v5630_v3 }
 0xa4e   :  { %5061 = vmatpush3.bf16.msra.mxu1 %v5979_v52 }
 0xa4f   :  { %5062 = vmatprep.subr.bf16.mxu1 %v5630_v3 }
 0xa52   :  { %5064 = vmatpush3.bf16.msra.mxu1 %v5990_v56 }
 0xa53   :  { %5071 = vmatprep.subr.bf16.mxu1 %v5630_v3 }
 0xb18   :  { %v970_v10 = vpop.f32.mrb[8].mxu1 }
 0xb19   :  { %v971_v11 = vadd.f32 %v5997_v58, %v970_v10  ;;  %v4346_v13 = vpop.f32.mrb[9].mxu1 }
 0xb1b   :  { %v974_v14 = vmax.f32 %v971_v11, 0.0 }
 0xb1d   :  { %v975_v15 = vsel %vm241_vm1, %v974_v14, %v6037_v37 }
 0xb1e   :  { %4364 = vmatmul.mubr.msk.f32.vlgmr.msra.gmra.mrb[10].mxu1 %vm466_vm12, %v975_v15 }
 0xb1f   :  { %5073 = vmatpush3.bf16.msra.mxu1 %v5727_v4  ;;  %4385 = vmatprep.mubr.msk.f32.mxu1 %vm5631_vm0, %v5632_v6 }
 0xb20   :  { %5074 = vmatprep.subr.bf16.mxu1 %v5630_v3 }
 0xb23   :  { %5076 = vmatpush3.bf16.msra.mxu1 %v5735_v7 }
 0xb24   :  { %5101 = vmatprep.subr.bf16.mxu1 %v5630_v3 }
 0xbf1   :  { %v1045_v16 = vpop.f32.mrb[10].mxu1 }
 0xbf2   :  { %v1046_v17 = vadd.f32 %v6011_v9, %v1045_v16  ;;  %v4365_v18 = vpop.f32.mrb[11].mxu1 }
 0xbf4   :  { %1056 = vrot.lane.b32.xlu1 %v1046_v17, %s5634_s2  ;;  %v3766_v19 = vmul.f32 -1.442695, %v1046_v17 }
 0xbf6   :  { %5459 = vpow2.f32 %v3766_v19 }
 0xc00   :  { %v5460_v20 = vpop.eup %5459 }
 0xc01   :  { %v1052_v21 = vadd.f32 1.0, %v5460_v20 }
 0xc03   :  { %5461 = vrcp.f32 %v1052_v21 }
 0xc0d   :  { %v5462_v22 = vpop.eup %5461 }
 0xc0e   :  { %v1066_v32 = vsub.f32 1.0, %v5462_v22  ;;  %v1072_v35 = vmul.f32 %v5462_v22, %v6037_v37 }
 0xc66   :  { %v1057_v23 = vpop.permute.xlu1 %1056 }
 0xc67   :  { %v1059_v24 = vmul.f32 %v5462_v22, %v1057_v23 }
 0xc69   :  { %1061 = vrot.lane.b32.xlu1 %v1059_v24, %s5635_s17 }
 0xcdb   :  { %v1062_v27 = vpop.permute.xlu1 %1061 }
 0xcdc   :  { %v1064_v8 = vadd.f32 %v1062_v27, %v1046_v17 }
 0xcde   :  { %5463 = vtanh.f32 %v1064_v8 }
 0xce8   :  { %v5464_v31 = vpop.eup %5463 }
 0xce9   :  { %1068 = vrot.lane.b32.xlu0 %v5464_v31, %s5636_s4 }
 0xd5b   :  { %v1069_v34 = vpop.permute.xlu0 %1068 }
 0xd5c   :  { %v1071_v38 = vmul.f32 %v1069_v34, %v1066_v32 }
 0xd5e   :  { %v6109_v40 = vadd.f32 %v1072_v35, %v1071_v38 }
 0xd60   :  { %1075 = vrot.lane.b32.xlu1 %v6109_v40, %s5636_s4 }
 0xdd2   :  { %v1076_v43 = vpop.permute.xlu1 %1075 }
 0xdd3   :  { %1079 = vst.msk [vmem:[#allocation5 + $0x8] sm:$0xff] %vm241_vm1, %v1076_v43  ;;  %4375 = vmatmul.mubr.msk.f32.vlgmr.msra.gmra.mrb[14].mxu0 %vm241_vm1, %v1076_v43  ;;  %4386 = vmatmul.mubr.msk.f32.vlgmr.msra.gmra.mrb[12].mxu1 %vm241_vm1, %v1076_v43 }
 0xdd4   :  { %5079 = vmatpush3.bf16.msra.mxu0 %v5798_v36  ;;  %4420 = vmatprep.mubr.msk.f32.mxu0 %vm5631_vm0, %v5632_v6 }
 0xdd5   :  { %5080 = vmatprep.subr.bf16.mxu0 %v5630_v3  ;;  %5103 = vmatpush3.bf16.msra.mxu1 %v5916_v26 }
 0xdd6   :  { %5104 = vmatprep.subr.bf16.mxu1 %v5630_v3  ;;  %4439 = vmatprep.mubr.msk.f32.mxu1 %vm5631_vm0, %v5632_v6 }
 0xdd8   :  { %5082 = vmatpush3.bf16.msra.mxu0 %v5813_v42 }
 0xdd9   :  { %5083 = vmatprep.subr.bf16.mxu0 %v5630_v3  ;;  %5106 = vmatpush3.bf16.msra.mxu1 %v5922_v28 }
 0xdda   :  { %5107 = vmatprep.subr.bf16.mxu1 %v5630_v3 }
 0xddc   :  { %5085 = vmatpush3.bf16.msra.mxu0 %v5826_v48 }
 0xddd   :  { %5086 = vmatprep.subr.bf16.mxu0 %v5630_v3  ;;  %5109 = vmatpush3.bf16.msra.mxu1 %v5932_v30 }
 0xdde   :  { %5110 = vmatprep.subr.bf16.mxu1 %v5630_v3 }
 0xde0   :  { %5088 = vmatpush3.bf16.msra.mxu0 %v5839_v53 }
 0xde1   :  { %5089 = vmatprep.subr.bf16.mxu0 %v5630_v3  ;;  %5112 = vmatpush3.bf16.msra.mxu1 %v5942_v33 }
 0xde2   :  { %5113 = vmatprep.subr.bf16.mxu1 %v5630_v3 }
 0xde4   :  { %5091 = vmatpush3.bf16.msra.mxu0 %v5851_v57 }
 0xde5   :  { %5092 = vmatprep.subr.bf16.mxu0 %v5630_v3 }
 0xde8   :  { %5094 = vmatpush3.bf16.msra.mxu0 %v5865_v61 }
 0xde9   :  { %5095 = vmatprep.subr.bf16.mxu0 %v5630_v3 }
 0xdec   :  { %5097 = vmatpush3.bf16.msra.mxu0 %v5875_v0 }
 0xded   :  { %5098 = vmatprep.subr.bf16.mxu0 %v5630_v3 }
 0xdf0   :  { %5100 = vmatpush3.bf16.msra.mxu0 %v5885_v5 }
 0xdf1   :  { %5125 = vmatprep.subr.bf16.mxu0 %v5630_v3 }
 0xea6   :  { %v6144_v37 = vpop.f32.mrb[14].mxu0  ;;  %v1230_v44 = vpop.f32.mrb[12].mxu1 }
 0xea7   :  { %v1231_v45 = vadd.f32 %v5758_v12, %v1230_v44  ;;  %v4376_v46 = vpop.f32.mrb[15].mxu0  ;;  %v4387_v47 = vpop.f32.mrb[13].mxu1 }
 0xea9   :  { %1234 = vmax.xlane.f32.xlu0 %v1231_v45 }
 0xf36   :  { %v1235_v50 = vpop.xlane.xlu0 %1234 }
 0xf37   :  { %v1236_v51 = vsub.f32 %v1231_v45, %v1235_v50 }
 0xf39   :  { %v1237_v54 = vmul.f32 1.442695, %v1236_v51 }
 0xf3b   :  { %5465 = vpow2.f32 %v1237_v54 }
 0xf45   :  { %v5466_v55 = vpop.eup %5465 }
 0xf46   :  { %1239 = vadd.xlane.f32.xlu1 %v5466_v55 }
 0xfd3   :  { %v1240_v59 = vpop.xlane.xlu1 %1239 }
 0xfd4   :  { %5467 = vrcp.f32 %v1240_v59 }
 0xfde   :  { %v5468_v60 = vpop.eup %5467 }
 0xfdf   :  { %v1242_v62 = vmul.f32 %v5468_v60, %v5466_v55 }
 0xfe1   :  { %1244 = vst [vmem:[#allocation7 + $0x10] sm:$0xff] %v1242_v62  ;;  %4421 = vmatmul.mubr.f32.vlgmr.msra.gmra.mrb[16].mxu0 %v1242_v62 }
 0xfe2   :  { %5127 = vmatpush3.bf16.msra.mxu0 %v6025_v25  ;;  %4469 = vmatprep.mubr.msk.f32.mxu0 %vm5631_vm0, %v5632_v6 }
 0xfe3   :  { %5128 = vmatprep.subr.bf16.mxu0 %v5630_v3 }
 0xfe6   :  { %5130 = vmatpush3.bf16.msra.mxu0 %v6031_v29 }
 0xfe7   :  { %5137 = vmatprep.subr.bf16.mxu0 %v5630_v3 }
0x10b4   :  { %v1311_v63 = vpop.f32.mrb[16].mxu0 }
0x10b5   :  { %1318 = vrot.lane.b32.xlu0 %v1311_v63, %s5634_s2  ;;  %v4422_v1 = vpop.f32.mrb[17].mxu0 }
0x1127   :  { %v1319_v10 = vpop.permute.xlu0 %1318 }
0x1128   :  { %v1321_v11 = vsel %vm241_vm1, %v1316_v2, %v1319_v10 }
0x1129   :  { %4440 = vmatmul.mubr.msk.f32.vlgmr.msra.gmra.mrb[14].mxu1 %vm466_vm12, %v1321_v11  ;;  %v1737_v11 = vld [vmem:[#allocation2 + $0x18] sm:$0xff] }
0x112a   :  { %5115 = vmatpush3.bf16.msra.mxu1 %v5956_v41  ;;  %4458 = vmatprep.mubr.msk.f32.mxu1 %vm5631_vm0, %v5632_v6 }
0x112b   :  { %5116 = vmatprep.subr.bf16.mxu1 %v5630_v3 }
0x112e   :  { %5118 = vmatpush3.bf16.msra.mxu1 %v5967_v49 }
0x112f   :  { %5119 = vmatprep.subr.bf16.mxu1 %v5630_v3 }
0x1132   :  { %5121 = vmatpush3.bf16.msra.mxu1 %v5979_v52 }
0x1133   :  { %5122 = vmatprep.subr.bf16.mxu1 %v5630_v3 }
0x1136   :  { %5124 = vmatpush3.bf16.msra.mxu1 %v5990_v56 }
0x1137   :  { %5131 = vmatprep.subr.bf16.mxu1 %v5630_v3 }
0x11fc   :  { %v1391_v13 = vpop.f32.mrb[14].mxu1 }
0x11fd   :  { %v1392_v14 = vadd.f32 %v5997_v58, %v1391_v13  ;;  %v4441_v15 = vpop.f32.mrb[15].mxu1 }
0x11ff   :  { %v1395_v16 = vmax.f32 %v1392_v14, 0.0 }
0x1201   :  { %v1396_v17 = vsel %vm241_vm1, %v1395_v16, %v6109_v40 }
0x1202   :  { %4459 = vmatmul.mubr.msk.f32.vlgmr.msra.gmra.mrb[16].mxu1 %vm466_vm12, %v1396_v17 }
0x1203   :  { %5133 = vmatpush3.bf16.msra.mxu1 %v5727_v4  ;;  %4480 = vmatprep.mubr.msk.f32.mxu1 %vm5631_vm0, %v5632_v6 }
0x1204   :  { %5134 = vmatprep.subr.bf16.mxu1 %v5630_v3 }
0x1207   :  { %5136 = vmatpush3.bf16.msra.mxu1 %v5735_v7 }
0x1208   :  { %5161 = vmatprep.subr.bf16.mxu1 %v5630_v3 }
0x12d5   :  { %v1466_v18 = vpop.f32.mrb[16].mxu1 }
0x12d6   :  { %v1467_v19 = vadd.f32 %v6011_v9, %v1466_v18  ;;  %v4460_v20 = vpop.f32.mrb[17].mxu1 }
0x12d8   :  { %1477 = vrot.lane.b32.xlu1 %v1467_v19, %s5634_s2  ;;  %v3771_v21 = vmul.f32 -1.442695, %v1467_v19 }
0x12da   :  { %5469 = vpow2.f32 %v3771_v21 }
0x12e4   :  { %v5470_v22 = vpop.eup %5469 }
0x12e5   :  { %v1473_v23 = vadd.f32 1.0, %v5470_v22 }
0x12e7   :  { %5471 = vrcp.f32 %v1473_v23 }
0x12f1   :  { %v5472_v24 = vpop.eup %5471 }
0x12f2   :  { %v1487_v35 = vsub.f32 1.0, %v5472_v24  ;;  %v1493_v43 = vmul.f32 %v5472_v24, %v6109_v40 }
0x134a   :  { %v1478_v27 = vpop.permute.xlu1 %1477 }
0x134b   :  { %v1480_v8 = vmul.f32 %v5472_v24, %v1478_v27 }
0x134d   :  { %1482 = vrot.lane.b32.xlu0 %v1480_v8, %s5635_s17 }
0x13bf   :  { %v1483_v31 = vpop.permute.xlu0 %1482 }
0x13c0   :  { %v1485_v32 = vadd.f32 %v1483_v31, %v1467_v19 }
0x13c2   :  { %5473 = vtanh.f32 %v1485_v32 }
0x13cc   :  { %v5474_v34 = vpop.eup %5473 }
0x13cd   :  { %1489 = vrot.lane.b32.xlu1 %v5474_v34, %s5636_s4 }
0x143f   :  { %v1490_v38 = vpop.permute.xlu1 %1489 }
0x1440   :  { %v1492_v44 = vmul.f32 %v1490_v38, %v1487_v35 }
0x1442   :  { %v6181_v45 = vadd.f32 %v1493_v43, %v1492_v44 }
0x1444   :  { %1496 = vrot.lane.b32.xlu0 %v6181_v45, %s5636_s4 }
0x14b6   :  { %v1497_v46 = vpop.permute.xlu0 %1496 }
0x14b7   :  { %1500 = vst.msk [vmem:[#allocation5 + $0x10] sm:$0xff] %vm241_vm1, %v1497_v46  ;;  %4470 = vmatmul.mubr.msk.f32.vlgmr.msra.gmra.mrb[18].mxu0 %vm241_vm1, %v1497_v46  ;;  %4481 = vmatmul.mubr.msk.f32.vlgmr.msra.gmra.mrb[18].mxu1 %vm241_vm1, %v1497_v46 }
0x14b8   :  { %5139 = vmatpush3.bf16.msra.mxu0 %v5798_v36  ;;  %4515 = vmatprep.mubr.msk.f32.mxu0 %vm5631_vm0, %v5632_v6 }
0x14b9   :  { %5140 = vmatprep.subr.bf16.mxu0 %v5630_v3  ;;  %5163 = vmatpush3.bf16.msra.mxu1 %v5916_v26 }
0x14ba   :  { %5164 = vmatprep.subr.bf16.mxu1 %v5630_v3  ;;  %4534 = vmatprep.mubr.msk.f32.mxu1 %vm5631_vm0, %v5632_v6 }
0x14bc   :  { %5142 = vmatpush3.bf16.msra.mxu0 %v5813_v42 }
0x14bd   :  { %5143 = vmatprep.subr.bf16.mxu0 %v5630_v3  ;;  %5166 = vmatpush3.bf16.msra.mxu1 %v5922_v28 }
0x14be   :  { %5167 = vmatprep.subr.bf16.mxu1 %v5630_v3 }
0x14c0   :  { %5145 = vmatpush3.bf16.msra.mxu0 %v5826_v48 }
0x14c1   :  { %5146 = vmatprep.subr.bf16.mxu0 %v5630_v3  ;;  %5169 = vmatpush3.bf16.msra.mxu1 %v5932_v30 }
0x14c2   :  { %5170 = vmatprep.subr.bf16.mxu1 %v5630_v3 }
0x14c4   :  { %5148 = vmatpush3.bf16.msra.mxu0 %v5839_v53 }
0x14c5   :  { %5149 = vmatprep.subr.bf16.mxu0 %v5630_v3  ;;  %5172 = vmatpush3.bf16.msra.mxu1 %v5942_v33 }
0x14c6   :  { %5173 = vmatprep.subr.bf16.mxu1 %v5630_v3 }
0x14c8   :  { %5151 = vmatpush3.bf16.msra.mxu0 %v5851_v57 }
0x14c9   :  { %5152 = vmatprep.subr.bf16.mxu0 %v5630_v3 }
0x14cc   :  { %5154 = vmatpush3.bf16.msra.mxu0 %v5865_v61 }
0x14cd   :  { %5155 = vmatprep.subr.bf16.mxu0 %v5630_v3 }
0x14d0   :  { %5157 = vmatpush3.bf16.msra.mxu0 %v5875_v0 }
0x14d1   :  { %5158 = vmatprep.subr.bf16.mxu0 %v5630_v3 }
0x14d4   :  { %5160 = vmatpush3.bf16.msra.mxu0 %v5885_v5 }
0x14d5   :  { %5185 = vmatprep.subr.bf16.mxu0 %v5630_v3 }
0x158a   :  { %v6216_v40 = vpop.f32.mrb[18].mxu0  ;;  %v1651_v47 = vpop.f32.mrb[18].mxu1 }
0x158b   :  { %v1652_v50 = vadd.f32 %v5758_v12, %v1651_v47  ;;  %v4471_v51 = vpop.f32.mrb[19].mxu0  ;;  %v4482_v54 = vpop.f32.mrb[19].mxu1 }
0x158d   :  { %1655 = vmax.xlane.f32.xlu1 %v1652_v50 }
0x161a   :  { %v1656_v55 = vpop.xlane.xlu1 %1655 }
0x161b   :  { %v1657_v59 = vsub.f32 %v1652_v50, %v1656_v55  ;;  %v6293_v55 = vld [vmem:[%s6625_s5] ss:$0 sm:$0xff] }
0x161d   :  { %v1658_v60 = vmul.f32 1.442695, %v1657_v59 }
0x161f   :  { %5475 = vpow2.f32 %v1658_v60 }
0x1629   :  { %v5476_v62 = vpop.eup %5475 }
0x162a   :  { %1660 = vadd.xlane.f32.xlu0 %v5476_v62 }
0x16b7   :  { %v1661_v63 = vpop.xlane.xlu0 %1660 }
0x16b8   :  { %5477 = vrcp.f32 %v1661_v63 }
0x16c2   :  { %v5478_v1 = vpop.eup %5477 }
0x16c3   :  { %v1663_v2 = vmul.f32 %v5478_v1, %v5476_v62 }
0x16c5   :  { %1665 = vst [vmem:[#allocation7 + $0x18] sm:$0xff] %v1663_v2  ;;  %4516 = vmatmul.mubr.f32.vlgmr.msra.gmra.mrb[20].mxu0 %v1663_v2 }
0x16c6   :  { %5187 = vmatpush3.bf16.msra.mxu0 %v6025_v25  ;;  %4564 = vmatprep.mubr.msk.f32.mxu0 %vm5631_vm0, %v5632_v6 }
0x16c7   :  { %5188 = vmatprep.subr.bf16.mxu0 %v5630_v3 }
0x16ca   :  { %5190 = vmatpush3.bf16.msra.mxu0 %v6031_v29 }
0x16cb   :  { %5197 = vmatprep.subr.bf16.mxu0 %v5630_v3 }
0x1798   :  { %v1732_v12 = vpop.f32.mrb[20].mxu0 }
0x1799   :  { %1739 = vrot.lane.b32.xlu0 %v1732_v12, %s5634_s2  ;;  %v4517_v10 = vpop.f32.mrb[21].mxu0 }
0x180b   :  { %v1740_v13 = vpop.permute.xlu0 %1739 }
0x180c   :  { %v1742_v14 = vsel %vm241_vm1, %v1737_v11, %v1740_v13 }
0x180d   :  { %4535 = vmatmul.mubr.msk.f32.vlgmr.msra.gmra.mrb[20].mxu1 %vm466_vm12, %v1742_v14 }
0x180e   :  { %5175 = vmatpush3.bf16.msra.mxu1 %v5956_v41  ;;  %4553 = vmatprep.mubr.msk.f32.mxu1 %vm5631_vm0, %v5632_v6 }
0x180f   :  { %5176 = vmatprep.subr.bf16.mxu1 %v5630_v3 }
0x1812   :  { %5178 = vmatpush3.bf16.msra.mxu1 %v5967_v49 }
0x1813   :  { %5179 = vmatprep.subr.bf16.mxu1 %v5630_v3 }
0x1816   :  { %5181 = vmatpush3.bf16.msra.mxu1 %v5979_v52 }
0x1817   :  { %5182 = vmatprep.subr.bf16.mxu1 %v5630_v3 }
0x181a   :  { %5184 = vmatpush3.bf16.msra.mxu1 %v5990_v56 }
0x181b   :  { %5191 = vmatprep.subr.bf16.mxu1 %v5630_v3 }
0x18e0   :  { %v1812_v15 = vpop.f32.mrb[20].mxu1 }
0x18e1   :  { %v1813_v16 = vadd.f32 %v5997_v58, %v1812_v15  ;;  %v4536_v17 = vpop.f32.mrb[21].mxu1 }
0x18e3   :  { %v1816_v18 = vmax.f32 %v1813_v16, 0.0  ;;  %v2158_v16 = vld [vmem:[#allocation2 + $0x20] sm:$0xff] }
0x18e5   :  { %v1817_v19 = vsel %vm241_vm1, %v1816_v18, %v6181_v45 }
0x18e6   :  { %4554 = vmatmul.mubr.msk.f32.vlgmr.msra.gmra.mrb[22].mxu1 %vm466_vm12, %v1817_v19 }
0x18e7   :  { %5193 = vmatpush3.bf16.msra.mxu1 %v5727_v4  ;;  %4575 = vmatprep.mubr.msk.f32.mxu1 %vm5631_vm0, %v5632_v6 }
0x18e8   :  { %5194 = vmatprep.subr.bf16.mxu1 %v5630_v3 }
0x18eb   :  { %5196 = vmatpush3.bf16.msra.mxu1 %v5735_v7 }
0x18ec   :  { %5221 = vmatprep.subr.bf16.mxu1 %v5630_v3 }
0x19b9   :  { %v1887_v20 = vpop.f32.mrb[22].mxu1 }
0x19ba   :  { %v1888_v21 = vadd.f32 %v6011_v9, %v1887_v20  ;;  %v4555_v22 = vpop.f32.mrb[23].mxu1 }
0x19bc   :  { %1898 = vrot.lane.b32.xlu1 %v1888_v21, %s5634_s2  ;;  %v3776_v23 = vmul.f32 -1.442695, %v1888_v21 }
0x19be   :  { %5479 = vpow2.f32 %v3776_v23 }
0x19c8   :  { %v5480_v24 = vpop.eup %5479 }
0x19c9   :  { %v1894_v27 = vadd.f32 1.0, %v5480_v24 }
0x19cb   :  { %5481 = vrcp.f32 %v1894_v27 }
0x19d5   :  { %v5482_v8 = vpop.eup %5481 }
0x19d6   :  { %v1908_v43 = vsub.f32 1.0, %v5482_v8  ;;  %v1914_v46 = vmul.f32 %v5482_v8, %v6181_v45 }
0x1a2e   :  { %v1899_v31 = vpop.permute.xlu1 %1898 }
0x1a2f   :  { %v1901_v32 = vmul.f32 %v5482_v8, %v1899_v31 }
0x1a31   :  { %1903 = vrot.lane.b32.xlu1 %v1901_v32, %s5635_s17 }
0x1aa3   :  { %v1904_v34 = vpop.permute.xlu1 %1903 }
0x1aa4   :  { %v1906_v35 = vadd.f32 %v1904_v34, %v1888_v21 }
0x1aa6   :  { %5483 = vtanh.f32 %v1906_v35 }
0x1ab0   :  { %v5484_v38 = vpop.eup %5483 }
0x1ab1   :  { %1910 = vrot.lane.b32.xlu0 %v5484_v38, %s5636_s4 }
0x1b23   :  { %v1911_v44 = vpop.permute.xlu0 %1910 }
0x1b24   :  { %v1913_v47 = vmul.f32 %v1911_v44, %v1908_v43 }
0x1b26   :  { %v6253_v50 = vadd.f32 %v1914_v46, %v1913_v47 }
0x1b28   :  { %1917 = vrot.lane.b32.xlu1 %v6253_v50, %s5636_s4 }
0x1b9a   :  { %v1918_v51 = vpop.permute.xlu1 %1917 }
0x1b9b   :  { %1921 = vst.msk [vmem:[#allocation5 + $0x18] sm:$0xff] %vm241_vm1, %v1918_v51  ;;  %4565 = vmatmul.mubr.msk.f32.vlgmr.msra.gmra.mrb[22].mxu0 %vm241_vm1, %v1918_v51  ;;  %4576 = vmatmul.mubr.msk.f32.vlgmr.msra.gmra.mrb[24].mxu1 %vm241_vm1, %v1918_v51 }
0x1b9c   :  { %5199 = vmatpush3.bf16.msra.mxu0 %v5798_v36  ;;  %4610 = vmatprep.mubr.msk.f32.mxu0 %vm5631_vm0, %v5632_v6 }
0x1b9d   :  { %5200 = vmatprep.subr.bf16.mxu0 %v5630_v3  ;;  %5223 = vmatpush3.bf16.msra.mxu1 %v5916_v26 }
0x1b9e   :  { %5224 = vmatprep.subr.bf16.mxu1 %v5630_v3  ;;  %4629 = vmatprep.mubr.msk.f32.mxu1 %vm5631_vm0, %v5632_v6 }
0x1ba0   :  { %5202 = vmatpush3.bf16.msra.mxu0 %v5813_v42 }
0x1ba1   :  { %5203 = vmatprep.subr.bf16.mxu0 %v5630_v3  ;;  %5226 = vmatpush3.bf16.msra.mxu1 %v5922_v28 }
0x1ba2   :  { %5227 = vmatprep.subr.bf16.mxu1 %v5630_v3 }
0x1ba4   :  { %5205 = vmatpush3.bf16.msra.mxu0 %v5826_v48 }
0x1ba5   :  { %5206 = vmatprep.subr.bf16.mxu0 %v5630_v3  ;;  %5229 = vmatpush3.bf16.msra.mxu1 %v5932_v30 }
0x1ba6   :  { %5230 = vmatprep.subr.bf16.mxu1 %v5630_v3 }
0x1ba8   :  { %5208 = vmatpush3.bf16.msra.mxu0 %v5839_v53 }
0x1ba9   :  { %5209 = vmatprep.subr.bf16.mxu0 %v5630_v3  ;;  %5232 = vmatpush3.bf16.msra.mxu1 %v5942_v33 }
0x1baa   :  { %5233 = vmatprep.subr.bf16.mxu1 %v5630_v3 }
0x1bac   :  { %5211 = vmatpush3.bf16.msra.mxu0 %v5851_v57 }
0x1bad   :  { %5212 = vmatprep.subr.bf16.mxu0 %v5630_v3 }
0x1bb0   :  { %5214 = vmatpush3.bf16.msra.mxu0 %v5865_v61 }
0x1bb1   :  { %5215 = vmatprep.subr.bf16.mxu0 %v5630_v3 }
0x1bb4   :  { %5217 = vmatpush3.bf16.msra.mxu0 %v5875_v0 }
0x1bb5   :  { %5218 = vmatprep.subr.bf16.mxu0 %v5630_v3 }
0x1bb8   :  { %5220 = vmatpush3.bf16.msra.mxu0 %v5885_v5 }
0x1bb9   :  { %5245 = vmatprep.subr.bf16.mxu0 %v5630_v3 }
0x1c6e   :  { %v6288_v45 = vpop.f32.mrb[22].mxu0  ;;  %v2072_v54 = vpop.f32.mrb[24].mxu1 }
0x1c6f   :  { %v2073_v59 = vadd.f32 %v6293_v55, %v2072_v54  ;;  %v4566_v60 = vpop.f32.mrb[23].mxu0  ;;  %v4577_v62 = vpop.f32.mrb[25].mxu1 }
0x1c71   :  { %2076 = vmax.xlane.f32.xlu0 %v2073_v59 }
0x1cfe   :  { %v2077_v63 = vpop.xlane.xlu0 %2076 }
0x1cff   :  { %v2078_v1 = vsub.f32 %v2073_v59, %v2077_v63 }
0x1d01   :  { %v2079_v2 = vmul.f32 1.442695, %v2078_v1 }
0x1d03   :  { %5485 = vpow2.f32 %v2079_v2 }
0x1d0d   :  { %v5486_v12 = vpop.eup %5485 }
0x1d0e   :  { %2081 = vadd.xlane.f32.xlu1 %v5486_v12 }
0x1d9b   :  { %v2082_v10 = vpop.xlane.xlu1 %2081 }
0x1d9c   :  { %5487 = vrcp.f32 %v2082_v10 }
0x1da6   :  { %v5488_v11 = vpop.eup %5487 }
0x1da7   :  { %v2084_v13 = vmul.f32 %v5488_v11, %v5486_v12 }
0x1da9   :  { %2086 = vst [vmem:[#allocation7 + $0x20] sm:$0xff] %v2084_v13  ;;  %4611 = vmatmul.mubr.f32.vlgmr.msra.gmra.mrb[24].mxu0 %v2084_v13 }
0x1daa   :  { %5247 = vmatpush3.bf16.msra.mxu0 %v6025_v25  ;;  %4659 = vmatprep.mubr.msk.f32.mxu0 %vm5631_vm0, %v5632_v6 }
0x1dab   :  { %5248 = vmatprep.subr.bf16.mxu0 %v5630_v3 }
0x1dae   :  { %5250 = vmatpush3.bf16.msra.mxu0 %v6031_v29 }
0x1daf   :  { %5257 = vmatprep.subr.bf16.mxu0 %v5630_v3 }
0x1e7c   :  { %v2153_v14 = vpop.f32.mrb[24].mxu0 }
0x1e7d   :  { %2160 = vrot.lane.b32.xlu0 %v2153_v14, %s5634_s2  ;;  %v4612_v15 = vpop.f32.mrb[25].mxu0 }
0x1eef   :  { %v2161_v17 = vpop.permute.xlu0 %2160 }
0x1ef0   :  { %v2163_v18 = vsel %vm241_vm1, %v2158_v16, %v2161_v17 }
0x1ef1   :  { %4630 = vmatmul.mubr.msk.f32.vlgmr.msra.gmra.mrb[26].mxu1 %vm466_vm12, %v2163_v18 }
0x1ef2   :  { %5235 = vmatpush3.bf16.msra.mxu1 %v5956_v41  ;;  %4648 = vmatprep.mubr.msk.f32.mxu1 %vm5631_vm0, %v5632_v6 }
0x1ef3   :  { %5236 = vmatprep.subr.bf16.mxu1 %v5630_v3 }
0x1ef6   :  { %5238 = vmatpush3.bf16.msra.mxu1 %v5967_v49 }
0x1ef7   :  { %5239 = vmatprep.subr.bf16.mxu1 %v5630_v3 }
0x1efa   :  { %5241 = vmatpush3.bf16.msra.mxu1 %v5979_v52 }
0x1efb   :  { %5242 = vmatprep.subr.bf16.mxu1 %v5630_v3 }
0x1efe   :  { %5244 = vmatpush3.bf16.msra.mxu1 %v5990_v56 }
0x1eff   :  { %5251 = vmatprep.subr.bf16.mxu1 %v5630_v3 }
0x1fc4   :  { %v2233_v19 = vpop.f32.mrb[26].mxu1 }
0x1fc5   :  { %v2234_v20 = vadd.f32 %v5997_v58, %v2233_v19  ;;  %v4631_v21 = vpop.f32.mrb[27].mxu1  ;;  %v2579_v19 = vld [vmem:[#allocation2 + $0x28] sm:$0xff] }
0x1fc7   :  { %v2237_v22 = vmax.f32 %v2234_v20, 0.0 }
0x1fc9   :  { %v2238_v23 = vsel %vm241_vm1, %v2237_v22, %v6253_v50 }
0x1fca   :  { %4649 = vmatmul.mubr.msk.f32.vlgmr.msra.gmra.mrb[28].mxu1 %vm466_vm12, %v2238_v23  ;;  %v6390_v23 = vld [vmem:[%s6627_s7] ss:$0 sm:$0xff] }
0x1fcb   :  { %5253 = vmatpush3.bf16.msra.mxu1 %v5727_v4  ;;  %4670 = vmatprep.mubr.msk.f32.mxu1 %vm5631_vm0, %v5632_v6 }
0x1fcc   :  { %5254 = vmatprep.subr.bf16.mxu1 %v5630_v3 }
0x1fcf   :  { %5256 = vmatpush3.bf16.msra.mxu1 %v5735_v7 }
0x1fd0   :  { %5281 = vmatprep.subr.bf16.mxu1 %v5630_v3 }
0x209d   :  { %v2308_v24 = vpop.f32.mrb[28].mxu1 }
0x209e   :  { %v2309_v58 = vadd.f32 %v6011_v9, %v2308_v24  ;;  %v4650_v27 = vpop.f32.mrb[29].mxu1 }
0x20a0   :  { %2319 = vrot.lane.b32.xlu1 %v2309_v58, %s5634_s2  ;;  %v3781_v8 = vmul.f32 -1.442695, %v2309_v58 }
0x20a2   :  { %5489 = vpow2.f32 %v3781_v8 }
0x20ac   :  { %v5490_v31 = vpop.eup %5489 }
0x20ad   :  { %v2315_v32 = vadd.f32 1.0, %v5490_v31 }
0x20af   :  { %5491 = vrcp.f32 %v2315_v32  ;;  %v6405_v32 = vld [vmem:[%s6629_s9] ss:$0 sm:$0xff] }
0x20b9   :  { %v5492_v34 = vpop.eup %5491 }
0x20ba   :  { %v2329_v9 = vsub.f32 1.0, %v5492_v34  ;;  %v2335_v51 = vmul.f32 %v5492_v34, %v6253_v50 }
0x2112   :  { %v2320_v35 = vpop.permute.xlu1 %2319 }
0x2113   :  { %v2322_v38 = vmul.f32 %v5492_v34, %v2320_v35 }
0x2115   :  { %2324 = vrot.lane.b32.xlu0 %v2322_v38, %s5635_s17 }
0x2187   :  { %v2325_v43 = vpop.permute.xlu0 %2324 }
0x2188   :  { %v2327_v44 = vadd.f32 %v2325_v43, %v2309_v58 }
0x218a   :  { %5493 = vtanh.f32 %v2327_v44 }
0x2194   :  { %v5494_v46 = vpop.eup %5493 }
0x2195   :  { %2331 = vrot.lane.b32.xlu1 %v5494_v46, %s5636_s4 }
0x2207   :  { %v2332_v47 = vpop.permute.xlu1 %2331 }
0x2208   :  { %v2334_v54 = vmul.f32 %v2332_v47, %v2329_v9 }
0x220a   :  { %v6330_v59 = vadd.f32 %v2335_v51, %v2334_v54 }
0x220c   :  { %2338 = vrot.lane.b32.xlu0 %v6330_v59, %s5636_s4 }
0x227e   :  { %v2339_v60 = vpop.permute.xlu0 %2338 }
0x227f   :  { %2342 = vst.msk [vmem:[#allocation5 + $0x20] sm:$0xff] %vm241_vm1, %v2339_v60  ;;  %4660 = vmatmul.mubr.msk.f32.vlgmr.msra.gmra.mrb[26].mxu0 %vm241_vm1, %v2339_v60  ;;  %4671 = vmatmul.mubr.msk.f32.vlgmr.msra.gmra.mrb[30].mxu1 %vm241_vm1, %v2339_v60 }
0x2280   :  { %5259 = vmatpush3.bf16.msra.mxu0 %v5798_v36  ;;  %4705 = vmatprep.mubr.msk.f32.mxu0 %vm5631_vm0, %v5632_v6 }
0x2281   :  { %5260 = vmatprep.subr.bf16.mxu0 %v5630_v3  ;;  %5283 = vmatpush3.bf16.msra.mxu1 %v5916_v26 }
0x2282   :  { %5284 = vmatprep.subr.bf16.mxu1 %v5630_v3  ;;  %4724 = vmatprep.mubr.msk.f32.mxu1 %vm5631_vm0, %v5632_v6 }
0x2284   :  { %5262 = vmatpush3.bf16.msra.mxu0 %v5813_v42 }
0x2285   :  { %5263 = vmatprep.subr.bf16.mxu0 %v5630_v3  ;;  %5286 = vmatpush3.bf16.msra.mxu1 %v5922_v28 }
0x2286   :  { %5287 = vmatprep.subr.bf16.mxu1 %v5630_v3 }
0x2288   :  { %5265 = vmatpush3.bf16.msra.mxu0 %v5826_v48 }
0x2289   :  { %5266 = vmatprep.subr.bf16.mxu0 %v5630_v3  ;;  %5289 = vmatpush3.bf16.msra.mxu1 %v5932_v30 }
0x228a   :  { %5290 = vmatprep.subr.bf16.mxu1 %v5630_v3 }
0x228c   :  { %5268 = vmatpush3.bf16.msra.mxu0 %v5839_v53 }
0x228d   :  { %5269 = vmatprep.subr.bf16.mxu0 %v5630_v3  ;;  %5292 = vmatpush3.bf16.msra.mxu1 %v5942_v33 }
0x228e   :  { %5293 = vmatprep.subr.bf16.mxu1 %v5630_v3 }
0x2290   :  { %5271 = vmatpush3.bf16.msra.mxu0 %v5851_v57 }
0x2291   :  { %5272 = vmatprep.subr.bf16.mxu0 %v5630_v3 }
0x2294   :  { %5274 = vmatpush3.bf16.msra.mxu0 %v5865_v61 }
0x2295   :  { %5275 = vmatprep.subr.bf16.mxu0 %v5630_v3 }
0x2298   :  { %5277 = vmatpush3.bf16.msra.mxu0 %v5875_v0 }
0x2299   :  { %5278 = vmatprep.subr.bf16.mxu0 %v5630_v3 }
0x229c   :  { %5280 = vmatpush3.bf16.msra.mxu0 %v5885_v5 }
0x229d   :  { %5305 = vmatprep.subr.bf16.mxu0 %v5630_v3 }
0x2352   :  { %v6365_v50 = vpop.f32.mrb[26].mxu0  ;;  %v2493_v62 = vpop.f32.mrb[30].mxu1 }
0x2353   :  { %v2494_v63 = vadd.f32 %v6293_v55, %v2493_v62  ;;  %v4661_v1 = vpop.f32.mrb[27].mxu0  ;;  %v4672_v2 = vpop.f32.mrb[31].mxu1 }
0x2355   :  { %2497 = vmax.xlane.f32.xlu1 %v2494_v63 }
0x23e2   :  { %v2498_v12 = vpop.xlane.xlu1 %2497 }
0x23e3   :  { %v2499_v10 = vsub.f32 %v2494_v63, %v2498_v12 }
0x23e5   :  { %v2500_v11 = vmul.f32 1.442695, %v2499_v10 }
0x23e7   :  { %5495 = vpow2.f32 %v2500_v11 }
0x23f1   :  { %v5496_v13 = vpop.eup %5495 }
0x23f2   :  { %2502 = vadd.xlane.f32.xlu0 %v5496_v13 }
0x247f   :  { %v2503_v14 = vpop.xlane.xlu0 %2502 }
0x2480   :  { %5497 = vrcp.f32 %v2503_v14 }
0x248a   :  { %v5498_v15 = vpop.eup %5497 }
0x248b   :  { %v2505_v16 = vmul.f32 %v5498_v15, %v5496_v13 }
0x248d   :  { %2507 = vst [vmem:[#allocation7 + $0x28] sm:$0xff] %v2505_v16  ;;  %4706 = vmatmul.mubr.f32.vlgmr.msra.gmra.mrb[28].mxu0 %v2505_v16 }
0x248e   :  { %5307 = vmatpush3.bf16.msra.mxu0 %v6025_v25  ;;  %4754 = vmatprep.mubr.msk.f32.mxu0 %vm5631_vm0, %v5632_v6 }
0x248f   :  { %5308 = vmatprep.subr.bf16.mxu0 %v5630_v3 }
0x2492   :  { %5310 = vmatpush3.bf16.msra.mxu0 %v6031_v29 }
0x2493   :  { %5317 = vmatprep.subr.bf16.mxu0 %v5630_v3 }
0x2560   :  { %v2574_v17 = vpop.f32.mrb[28].mxu0 }
0x2561   :  { %2581 = vrot.lane.b32.xlu0 %v2574_v17, %s5634_s2  ;;  %v4707_v18 = vpop.f32.mrb[29].mxu0 }
0x25d3   :  { %v2582_v20 = vpop.permute.xlu0 %2581 }
0x25d4   :  { %v2584_v21 = vsel %vm241_vm1, %v2579_v19, %v2582_v20 }
0x25d5   :  { %4725 = vmatmul.mubr.msk.f32.vlgmr.msra.gmra.mrb[32].mxu1 %vm466_vm12, %v2584_v21 }
0x25d6   :  { %5295 = vmatpush3.bf16.msra.mxu1 %v5956_v41  ;;  %4743 = vmatprep.mubr.msk.f32.mxu1 %vm5631_vm0, %v5632_v6 }
0x25d7   :  { %5296 = vmatprep.subr.bf16.mxu1 %v5630_v3 }
0x25da   :  { %5298 = vmatpush3.bf16.msra.mxu1 %v5967_v49 }
0x25db   :  { %5299 = vmatprep.subr.bf16.mxu1 %v5630_v3 }
0x25de   :  { %5301 = vmatpush3.bf16.msra.mxu1 %v5979_v52 }
0x25df   :  { %5302 = vmatprep.subr.bf16.mxu1 %v5630_v3 }
0x25e2   :  { %5304 = vmatpush3.bf16.msra.mxu1 %v5990_v56 }
0x25e3   :  { %5311 = vmatprep.subr.bf16.mxu1 %v5630_v3 }
0x26a8   :  { %v2654_v22 = vpop.f32.mrb[32].mxu1 }
0x26a9   :  { %v2655_v24 = vadd.f32 %v6390_v23, %v2654_v22  ;;  %v4726_v58 = vpop.f32.mrb[33].mxu1 }
0x26ab   :  { %v2658_v27 = vmax.f32 %v2655_v24, 0.0 }
0x26ad   :  { %v2659_v8 = vsel %vm241_vm1, %v2658_v27, %v6330_v59  ;;  %v3000_v27 = vld [vmem:[#allocation2 + $0x30] sm:$0xff] }
0x26ae   :  { %4744 = vmatmul.mubr.msk.f32.vlgmr.msra.gmra.mrb[34].mxu1 %vm466_vm12, %v2659_v8 }
0x26af   :  { %5313 = vmatpush3.bf16.msra.mxu1 %v5727_v4  ;;  %4765 = vmatprep.mubr.msk.f32.mxu1 %vm5631_vm0, %v5632_v6 }
0x26b0   :  { %5314 = vmatprep.subr.bf16.mxu1 %v5630_v3 }
0x26b3   :  { %5316 = vmatpush3.bf16.msra.mxu1 %v5735_v7 }
0x26b4   :  { %5341 = vmatprep.subr.bf16.mxu1 %v5630_v3 }
0x2781   :  { %v2729_v31 = vpop.f32.mrb[34].mxu1 }
0x2782   :  { %v2730_v34 = vadd.f32 %v6405_v32, %v2729_v31  ;;  %v4745_v35 = vpop.f32.mrb[35].mxu1 }
0x2784   :  { %2740 = vrot.lane.b32.xlu1 %v2730_v34, %s5634_s2  ;;  %v3786_v38 = vmul.f32 -1.442695, %v2730_v34 }
0x2786   :  { %5499 = vpow2.f32 %v3786_v38 }
0x2790   :  { %v5500_v43 = vpop.eup %5499 }
0x2791   :  { %v2736_v44 = vadd.f32 1.0, %v5500_v43 }
0x2793   :  { %5501 = vrcp.f32 %v2736_v44 }
0x279d   :  { %v5502_v46 = vpop.eup %5501 }
0x279e   :  { %v2750_v62 = vsub.f32 1.0, %v5502_v46  ;;  %v2756_v1 = vmul.f32 %v5502_v46, %v6330_v59 }
0x27f6   :  { %v2741_v9 = vpop.permute.xlu1 %2740 }
0x27f7   :  { %v2743_v47 = vmul.f32 %v5502_v46, %v2741_v9 }
0x27f9   :  { %2745 = vrot.lane.b32.xlu1 %v2743_v47, %s5635_s17 }
0x286b   :  { %v2746_v51 = vpop.permute.xlu1 %2745 }
0x286c   :  { %v2748_v54 = vadd.f32 %v2746_v51, %v2730_v34 }
0x286e   :  { %5503 = vtanh.f32 %v2748_v54 }
0x2878   :  { %v5504_v60 = vpop.eup %5503 }
0x2879   :  { %2752 = vrot.lane.b32.xlu0 %v5504_v60, %s5636_s4 }
0x28eb   :  { %v2753_v63 = vpop.permute.xlu0 %2752 }
0x28ec   :  { %v2755_v2 = vmul.f32 %v2753_v63, %v2750_v62 }
0x28ee   :  { %v6412_v12 = vadd.f32 %v2756_v1, %v2755_v2 }
0x28f0   :  { %2759 = vrot.lane.b32.xlu1 %v6412_v12, %s5636_s4 }
0x2962   :  { %v2760_v10 = vpop.permute.xlu1 %2759 }
0x2963   :  { %2763 = vst.msk [vmem:[#allocation5 + $0x28] sm:$0xff] %vm241_vm1, %v2760_v10  ;;  %4755 = vmatmul.mubr.msk.f32.vlgmr.msra.gmra.mrb[30].mxu0 %vm241_vm1, %v2760_v10  ;;  %4766 = vmatmul.mubr.msk.f32.vlgmr.msra.gmra.mrb[36].mxu1 %vm241_vm1, %v2760_v10 }
0x2964   :  { %5319 = vmatpush3.bf16.msra.mxu0 %v5798_v36  ;;  %4800 = vmatprep.mubr.msk.f32.mxu0 %vm5631_vm0, %v5632_v6 }
0x2965   :  { %5320 = vmatprep.subr.bf16.mxu0 %v5630_v3  ;;  %5343 = vmatpush3.bf16.msra.mxu1 %v5916_v26 }
0x2966   :  { %5344 = vmatprep.subr.bf16.mxu1 %v5630_v3  ;;  %4819 = vmatprep.mubr.msk.f32.mxu1 %vm5631_vm0, %v5632_v6 }
0x2968   :  { %5322 = vmatpush3.bf16.msra.mxu0 %v5813_v42 }
0x2969   :  { %5323 = vmatprep.subr.bf16.mxu0 %v5630_v3  ;;  %5346 = vmatpush3.bf16.msra.mxu1 %v5922_v28 }
0x296a   :  { %5347 = vmatprep.subr.bf16.mxu1 %v5630_v3 }
0x296c   :  { %5325 = vmatpush3.bf16.msra.mxu0 %v5826_v48 }
0x296d   :  { %5326 = vmatprep.subr.bf16.mxu0 %v5630_v3  ;;  %5349 = vmatpush3.bf16.msra.mxu1 %v5932_v30 }
0x296e   :  { %5350 = vmatprep.subr.bf16.mxu1 %v5630_v3 }
0x2970   :  { %5328 = vmatpush3.bf16.msra.mxu0 %v5839_v53 }
0x2971   :  { %5329 = vmatprep.subr.bf16.mxu0 %v5630_v3  ;;  %5352 = vmatpush3.bf16.msra.mxu1 %v5942_v33 }
0x2972   :  { %5353 = vmatprep.subr.bf16.mxu1 %v5630_v3 }
0x2974   :  { %5331 = vmatpush3.bf16.msra.mxu0 %v5851_v57 }
0x2975   :  { %5332 = vmatprep.subr.bf16.mxu0 %v5630_v3 }
0x2978   :  { %5334 = vmatpush3.bf16.msra.mxu0 %v5865_v61 }
0x2979   :  { %5335 = vmatprep.subr.bf16.mxu0 %v5630_v3 }
0x297c   :  { %5337 = vmatpush3.bf16.msra.mxu0 %v5875_v0 }
0x297d   :  { %5338 = vmatprep.subr.bf16.mxu0 %v5630_v3 }
0x2980   :  { %5340 = vmatpush3.bf16.msra.mxu0 %v5885_v5 }
0x2981   :  { %5365 = vmatprep.subr.bf16.mxu0 %v5630_v3 }
0x2a36   :  { %v6447_v59 = vpop.f32.mrb[30].mxu0  ;;  %v2914_v11 = vpop.f32.mrb[36].mxu1 }
0x2a37   :  { %v2915_v13 = vadd.f32 %v6293_v55, %v2914_v11  ;;  %v4756_v14 = vpop.f32.mrb[31].mxu0  ;;  %v4767_v15 = vpop.f32.mrb[37].mxu1 }
0x2a39   :  { %2918 = vmax.xlane.f32.xlu0 %v2915_v13 }
0x2ac6   :  { %v2919_v16 = vpop.xlane.xlu0 %2918 }
0x2ac7   :  { %v2920_v17 = vsub.f32 %v2915_v13, %v2919_v16 }
0x2ac9   :  { %v2921_v18 = vmul.f32 1.442695, %v2920_v17  ;;  %v3421_v17 = vld [vmem:[#allocation2 + $0x38] sm:$0xff] }
0x2acb   :  { %5505 = vpow2.f32 %v2921_v18 }
0x2ad5   :  { %v5506_v19 = vpop.eup %5505 }
0x2ad6   :  { %2923 = vadd.xlane.f32.xlu1 %v5506_v19 }
0x2b63   :  { %v2924_v20 = vpop.xlane.xlu1 %2923 }
0x2b64   :  { %5507 = vrcp.f32 %v2924_v20 }
0x2b6e   :  { %v5508_v21 = vpop.eup %5507 }
0x2b6f   :  { %v2926_v22 = vmul.f32 %v5508_v21, %v5506_v19 }
0x2b71   :  { %2928 = vst [vmem:[#allocation7 + $0x30] sm:$0xff] %v2926_v22  ;;  %4801 = vmatmul.mubr.f32.vlgmr.msra.gmra.mrb[32].mxu0 %v2926_v22 }
0x2b72   :  { %5367 = vmatpush3.bf16.msra.mxu0 %v6025_v25  ;;  %4849 = vmatprep.mubr.msk.f32.mxu0 %vm5631_vm0, %v5632_v6 }
0x2b73   :  { %5368 = vmatprep.subr.bf16.mxu0 %v5630_v3 }
0x2b76   :  { %5370 = vmatpush3.bf16.msra.mxu0 %v6031_v29 }
0x2b77   :  { %5377 = vmatprep.subr.bf16.mxu0 %v5630_v3 }
0x2c44   :  { %v2995_v24 = vpop.f32.mrb[32].mxu0 }
0x2c45   :  { %3002 = vrot.lane.b32.xlu0 %v2995_v24, %s5634_s2  ;;  %v4802_v58 = vpop.f32.mrb[33].mxu0 }
0x2cb7   :  { %v3003_v8 = vpop.permute.xlu0 %3002 }
0x2cb8   :  { %v3005_v31 = vsel %vm241_vm1, %v3000_v27, %v3003_v8 }
0x2cb9   :  { %4820 = vmatmul.mubr.msk.f32.vlgmr.msra.gmra.mrb[38].mxu1 %vm466_vm12, %v3005_v31 }
0x2cba   :  { %5355 = vmatpush3.bf16.msra.mxu1 %v5956_v41  ;;  %4838 = vmatprep.mubr.msk.f32.mxu1 %vm5631_vm0, %v5632_v6 }
0x2cbb   :  { %5356 = vmatprep.subr.bf16.mxu1 %v5630_v3 }
0x2cbe   :  { %5358 = vmatpush3.bf16.msra.mxu1 %v5967_v49 }
0x2cbf   :  { %5359 = vmatprep.subr.bf16.mxu1 %v5630_v3 }
0x2cc2   :  { %5361 = vmatpush3.bf16.msra.mxu1 %v5979_v52 }
0x2cc3   :  { %5362 = vmatprep.subr.bf16.mxu1 %v5630_v3 }
0x2cc6   :  { %5364 = vmatpush3.bf16.msra.mxu1 %v5990_v56 }
0x2cc7   :  { %5371 = vmatprep.subr.bf16.mxu1 %v5630_v3 }
0x2d8c   :  { %v3075_v34 = vpop.f32.mrb[38].mxu1 }
0x2d8d   :  { %v3076_v35 = vadd.f32 %v6390_v23, %v3075_v34  ;;  %v4821_v38 = vpop.f32.mrb[39].mxu1 }
0x2d8f   :  { %v3079_v43 = vmax.f32 %v3076_v35, 0.0 }
0x2d91   :  { %v3080_v44 = vsel %vm241_vm1, %v3079_v43, %v6412_v12 }
0x2d92   :  { %4839 = vmatmul.mubr.msk.f32.vlgmr.msra.gmra.mrb[40].mxu1 %vm466_vm12, %v3080_v44 }
0x2d93   :  { %5373 = vmatpush3.bf16.msra.mxu1 %v5727_v4  ;;  %4860 = vmatprep.mubr.msk.f32.mxu1 %vm5631_vm0, %v5632_v6 }
0x2d94   :  { %5374 = vmatprep.subr.bf16.mxu1 %v5630_v3 }
0x2d97   :  { %5376 = vmatpush3.bf16.msra.mxu1 %v5735_v7 }
0x2d98   :  { %5401 = vmatprep.subr.bf16.mxu1 %v5630_v3 }
0x2e65   :  { %v3150_v46 = vpop.f32.mrb[40].mxu1 }
0x2e66   :  { %v3151_v9 = vadd.f32 %v6405_v32, %v3150_v46  ;;  %v4840_v47 = vpop.f32.mrb[41].mxu1 }
0x2e68   :  { %3161 = vrot.lane.b32.xlu1 %v3151_v9, %s5634_s2  ;;  %v3791_v51 = vmul.f32 -1.442695, %v3151_v9 }
0x2e6a   :  { %5509 = vpow2.f32 %v3791_v51 }
0x2e74   :  { %v5510_v54 = vpop.eup %5509 }
0x2e75   :  { %v3157_v60 = vadd.f32 1.0, %v5510_v54 }
0x2e77   :  { %5511 = vrcp.f32 %v3157_v60 }
0x2e81   :  { %v5512_v4 = vpop.eup %5511 }
0x2e82   :  { %v3171_v10 = vsub.f32 1.0, %v5512_v4  ;;  %v3177_v13 = vmul.f32 %v5512_v4, %v6412_v12 }
0x2eda   :  { %v3162_v62 = vpop.permute.xlu1 %3161 }
0x2edb   :  { %v3164_v63 = vmul.f32 %v5512_v4, %v3162_v62 }
0x2edd   :  { %3166 = vrot.lane.b32.xlu0 %v3164_v63, %s5635_s17 }
0x2f4f   :  { %v3167_v1 = vpop.permute.xlu0 %3166 }
0x2f50   :  { %v3169_v7 = vadd.f32 %v3167_v1, %v3151_v9 }
0x2f52   :  { %5513 = vtanh.f32 %v3169_v7 }
0x2f5c   :  { %v5514_v2 = vpop.eup %5513 }
0x2f5d   :  { %3173 = vrot.lane.b32.xlu1 %v5514_v2, %s5636_s4 }
0x2fcf   :  { %v3174_v11 = vpop.permute.xlu1 %3173 }
0x2fd0   :  { %v3176_v14 = vmul.f32 %v3174_v11, %v3171_v10 }
0x2fd2   :  { %v6484_v15 = vadd.f32 %v3177_v13, %v3176_v14 }
0x2fd4   :  { %3180 = vrot.lane.b32.xlu0 %v6484_v15, %s5636_s4 }
0x3046   :  { %v3181_v16 = vpop.permute.xlu0 %3180 }
0x3047   :  { %3184 = vst.msk [vmem:[#allocation5 + $0x30] sm:$0xff] %vm241_vm1, %v3181_v16  ;;  %4850 = vmatmul.mubr.msk.f32.vlgmr.msra.gmra.mrb[34].mxu0 %vm241_vm1, %v3181_v16  ;;  %4861 = vmatmul.mubr.msk.f32.vlgmr.msra.gmra.mrb[42].mxu1 %vm241_vm1, %v3181_v16 }
0x3048   :  { %5379 = vmatpush3.bf16.msra.mxu0 %v5798_v36  ;;  %4895 = vmatprep.mubr.msk.f32.mxu0 %vm5631_vm0, %v5632_v6 }
0x3049   :  { %5380 = vmatprep.subr.bf16.mxu0 %v5630_v3  ;;  %5403 = vmatpush3.bf16.msra.mxu1 %v5916_v26 }
0x304a   :  { %5404 = vmatprep.subr.bf16.mxu1 %v5630_v3  ;;  %4914 = vmatprep.mubr.msk.f32.mxu1 %vm5631_vm0, %v5632_v6 }
0x304c   :  { %5382 = vmatpush3.bf16.msra.mxu0 %v5813_v42 }
0x304d   :  { %5383 = vmatprep.subr.bf16.mxu0 %v5630_v3  ;;  %5406 = vmatpush3.bf16.msra.mxu1 %v5922_v28 }
0x304e   :  { %5407 = vmatprep.subr.bf16.mxu1 %v5630_v3 }
0x3050   :  { %5385 = vmatpush3.bf16.msra.mxu0 %v5826_v48 }
0x3051   :  { %5386 = vmatprep.subr.bf16.mxu0 %v5630_v3  ;;  %5409 = vmatpush3.bf16.msra.mxu1 %v5932_v30 }
0x3052   :  { %5410 = vmatprep.subr.bf16.mxu1 %v5630_v3 }
0x3054   :  { %5388 = vmatpush3.bf16.msra.mxu0 %v5839_v53 }
0x3055   :  { %5389 = vmatprep.subr.bf16.mxu0 %v5630_v3  ;;  %5412 = vmatpush3.bf16.msra.mxu1 %v5942_v33 }
0x3056   :  { %5413 = vmatprep.subr.bf16.mxu1 %v5630_v3 }
0x3058   :  { %5391 = vmatpush3.bf16.msra.mxu0 %v5851_v57 }
0x3059   :  { %5392 = vmatprep.subr.bf16.mxu0 %v5630_v3 }
0x305c   :  { %5394 = vmatpush3.bf16.msra.mxu0 %v5865_v61 }
0x305d   :  { %5395 = vmatprep.subr.bf16.mxu0 %v5630_v3 }
0x3060   :  { %5397 = vmatpush3.bf16.msra.mxu0 %v5875_v0 }
0x3061   :  { %5398 = vmatprep.subr.bf16.mxu0 %v5630_v3 }
0x3064   :  { %5400 = vmatpush3.bf16.msra.mxu0 %v5885_v5 }
0x3065   :  { %5425 = vmatprep.subr.bf16.mxu0 %v5630_v3 }
0x311a   :  { %v6519_v36 = vpop.f32.mrb[34].mxu0  ;;  %v3335_v42 = vpop.f32.mrb[42].mxu1 }
0x311b   :  { %v3336_v48 = vadd.f32 %v6293_v55, %v3335_v42  ;;  %v4851_v53 = vpop.f32.mrb[35].mxu0  ;;  %v4862_v57 = vpop.f32.mrb[43].mxu1 }
0x311d   :  { %3339 = vmax.xlane.f32.xlu1 %v3336_v48 }
0x31aa   :  { %v3340_v26 = vpop.xlane.xlu1 %3339 }
0x31ab   :  { %v3341_v61 = vsub.f32 %v3336_v48, %v3340_v26 }
0x31ad   :  { %v3342_v28 = vmul.f32 1.442695, %v3341_v61 }
0x31af   :  { %5515 = vpow2.f32 %v3342_v28 }
0x31b9   :  { %v5516_v30 = vpop.eup %5515 }
0x31ba   :  { %3344 = vadd.xlane.f32.xlu0 %v5516_v30 }
0x3247   :  { %v3345_v0 = vpop.xlane.xlu0 %3344 }
0x3248   :  { %5517 = vrcp.f32 %v3345_v0 }
0x3252   :  { %v5518_v33 = vpop.eup %5517 }
0x3253   :  { %v3347_v5 = vmul.f32 %v5518_v33, %v5516_v30 }
0x3255   :  { %3349 = vst [vmem:[#allocation7 + $0x38] sm:$0xff] %v3347_v5  ;;  %4896 = vmatmul.mubr.f32.vlgmr.msra.gmra.mrb[36].mxu0 %v3347_v5 }
0x3256   :  { %5427 = vmatpush3.bf16.msra.mxu0 %v6025_v25  ;;  %4944 = vmatprep.mubr.msk.f32.mxu0 %vm5631_vm0, %v5632_v6 }
0x3257   :  { %5428 = vmatprep.subr.bf16.mxu0 %v5630_v3 }
0x325a   :  { %5430 = vmatpush3.bf16.msra.mxu0 %v6031_v29 }
0x3328   :  { %v3416_v55 = vpop.f32.mrb[36].mxu0 }
0x3329   :  { %3423 = vrot.lane.b32.xlu0 %v3416_v55, %s5634_s2  ;;  %v4897_v12 = vpop.f32.mrb[37].mxu0 }
0x339b   :  { %v3424_v18 = vpop.permute.xlu0 %3423 }
0x339c   :  { %v3426_v19 = vsel %vm241_vm1, %v3421_v17, %v3424_v18 }
0x339d   :  { %4915 = vmatmul.mubr.msk.f32.vlgmr.msra.gmra.mrb[44].mxu1 %vm466_vm12, %v3426_v19 }
0x339e   :  { %5415 = vmatpush3.bf16.msra.mxu1 %v5956_v41  ;;  %4933 = vmatprep.mubr.msk.f32.mxu1 %vm5631_vm0, %v5632_v6 }
0x339f   :  { %5416 = vmatprep.subr.bf16.mxu1 %v5630_v3 }
0x33a2   :  { %5418 = vmatpush3.bf16.msra.mxu1 %v5967_v49 }
0x33a3   :  { %5419 = vmatprep.subr.bf16.mxu1 %v5630_v3 }
0x33a6   :  { %5421 = vmatpush3.bf16.msra.mxu1 %v5979_v52 }
0x33a7   :  { %5422 = vmatprep.subr.bf16.mxu1 %v5630_v3 }
0x33aa   :  { %5424 = vmatpush3.bf16.msra.mxu1 %v5990_v56 }
0x3470   :  { %v3496_v25 = vpop.f32.mrb[44].mxu1 }
0x3471   :  { %v3497_v29 = vadd.f32 %v6390_v23, %v3496_v25  ;;  %v4916_v20 = vpop.f32.mrb[45].mxu1 }
0x3473   :  { %v3500_v41 = vmax.f32 %v3497_v29, 0.0 }
0x3475   :  { %v3501_v6 = vsel %vm241_vm1, %v3500_v41, %v6484_v15 }
0x3476   :  { %4934 = vmatmul.mubr.msk.f32.vlgmr.msra.gmra.mrb[46].mxu1 %vm466_vm12, %v3501_v6 }
0x3549   :  { %v3571_v21 = vpop.f32.mrb[46].mxu1 }
0x354a   :  { %v3572_v49 = vadd.f32 %v6405_v32, %v3571_v21  ;;  %v4935_v22 = vpop.f32.mrb[47].mxu1  ;;  %v6550_v32 = vld [vmem:[%s6631_s11] ss:$0 sm:$0xff]  ;;  %s5637_s11 = smov [#allocation5]  }
0x354b   :  { %v729_v34 = vadd.f32 %v6550_v32, %v6072_v39  ;;  %v1570_v35 = vadd.f32 %v6550_v32, %v6216_v40  ;;  %v1991_v38 = vadd.f32 %v6550_v32, %v6288_v45  ;;  %v2833_v43 = vadd.f32 %v6550_v32, %v6447_v59 }
0x354c   :  { %3582 = vrot.lane.b32.xlu1 %v3572_v49, %s5634_s2  ;;  %v3796_v52 = vmul.f32 -1.442695, %v3572_v49  ;;  %v1149_v39 = vadd.f32 %v6550_v32, %v6144_v37  ;;  %v2412_v40 = vadd.f32 %v6550_v32, %v6365_v50  ;;  %v3254_v45 = vadd.f32 %v6550_v32, %v6519_v36  ;;  %s3707_s2 = sshll.u32 %s5637_s11, 4  ;;  %s3708_s2 = int_to_ptr.vmem [resolvable:$true] %s3707_s2 }
0x354d   :  { %s5560_s26 = scalar_lea.vmem %s3708_s2, 1024  ;;  %p5565_p1 = scmp.lt.s32.totalorder %s3708_s2, %s3708_s2 }
0x354e   :  { %5519 = vpow2.f32 %v3796_v52  ;;  %p5561_p0 = scmp.ne.s32.totalorder %s3708_s2, %s5560_s26  ;;  %p5566_p2 = scmp.lt.s32.totalorder %s5560_s26, %s5560_s26 }
0x3550   :  { %p5567_p3 = por %p5566_p2, %p5565_p1 }
0x3552   :  { %p5568_p4 = pnand %p5567_p3, %p5561_p0 }
0x3558   :  { %v5520_v3 = vpop.eup %5519 }
0x3559   :  { %v3578_v56 = vadd.f32 1.0, %v5520_v3 }
0x355b   :  { %5521 = vrcp.f32 %v3578_v56 }
0x3565   :  { %v5522_v24 = vpop.eup %5521 }
0x3566   :  { %v3592_v44 = vsub.f32 1.0, %v5522_v24  ;;  %v3598_v9 = vmul.f32 %v5522_v24, %v6484_v15 }
0x35be   :  { %v3583_v23 = vpop.permute.xlu1 %3582 }
0x35bf   :  { %v3585_v58 = vmul.f32 %v5522_v24, %v3583_v23 }
0x35c1   :  { %3587 = vrot.lane.b32.xlu1 %v3585_v58, %s5635_s17 }
0x3633   :  { %v3588_v27 = vpop.permute.xlu1 %3587 }
0x3634   :  { %v3590_v8 = vadd.f32 %v3588_v27, %v3572_v49 }
0x3636   :  { %5523 = vtanh.f32 %v3590_v8 }
0x3640   :  { %v5524_v31 = vpop.eup %5523 }
0x3641   :  { %3594 = vrot.lane.b32.xlu0 %v5524_v31, %s5636_s4 }
0x3660   :  { %732 = vmax.xlane.f32.xlu0 %v729_v34 }
0x3664   :  { %1573 = vmax.xlane.f32.xlu0 %v1570_v35 }
0x3668   :  { %1994 = vmax.xlane.f32.xlu0 %v1991_v38 }
0x366c   :  { %2836 = vmax.xlane.f32.xlu0 %v2833_v43 }
0x36b3   :  { %v3595_v46 = vpop.permute.xlu0 %3594 }
0x36b4   :  { %v3597_v47 = vmul.f32 %v3595_v46, %v3592_v44 }
0x36b6   :  { %v3599_v51 = vadd.f32 %v3598_v9, %v3597_v47 }
0x36b8   :  { %3601 = vrot.lane.b32.xlu1 %v3599_v51, %s5636_s4 }
0x36dc   :  { %1152 = vmax.xlane.f32.xlu1 %v1149_v39 }
0x36e0   :  { %2415 = vmax.xlane.f32.xlu1 %v2412_v40 }
0x36e4   :  { %3257 = vmax.xlane.f32.xlu1 %v3254_v45 }
0x36ed   :  { %v733_v59 = vpop.xlane.xlu0 %732 }
0x36ee   :  { %v734_v54 = vsub.f32 %v729_v34, %v733_v59 }
0x36f0   :  { %v735_v60 = vmul.f32 1.442695, %v734_v54 }
0x36f1   :  { %v1574_v4 = vpop.xlane.xlu0 %1573 }
0x36f2   :  { %5525 = vpow2.f32 %v735_v60  ;;  %v1575_v62 = vsub.f32 %v1570_v35, %v1574_v4 }
0x36f4   :  { %v1576_v63 = vmul.f32 1.442695, %v1575_v62 }
0x36f5   :  { %v1995_v0 = vpop.xlane.xlu0 %1994 }
0x36f6   :  { %5527 = vpow2.f32 %v1576_v63  ;;  %v1996_v5 = vsub.f32 %v1991_v38, %v1995_v0 }
0x36f8   :  { %v1997_v17 = vmul.f32 1.442695, %v1996_v5 }
0x36f9   :  { %v2837_v12 = vpop.xlane.xlu0 %2836 }
0x36fa   :  { %v2838_v18 = vsub.f32 %v2833_v43, %v2837_v12 }
0x36fc   :  { %v5526_v1 = vpop.eup %5525  ;;  %v2839_v19 = vmul.f32 1.442695, %v2838_v18 }
0x36fd   :  { %737 = vadd.xlane.f32.xlu1 %v5526_v1 }
0x3700   :  { %v5528_v37 = vpop.eup %5527 }
0x3701   :  { %1578 = vadd.xlane.f32.xlu1 %v5528_v37 }
0x372a   :  { %v3602_v7 = vpop.permute.xlu1 %3601 }
0x372b   :  { %3605 = vst.msk [vmem:[#allocation5 + $0x38] sm:$0xff] %vm241_vm1, %v3602_v7  ;;  %4945 = vmatmul.mubr.msk.f32.vlgmr.msra.gmra.mrb[38].mxu0 %vm241_vm1, %v3602_v7 }
0x3769   :  { %v1153_v50 = vpop.xlane.xlu1 %1152 }
0x376a   :  { %v1154_v33 = vsub.f32 %v1149_v39, %v1153_v50 }
0x376c   :  { %v1155_v55 = vmul.f32 1.442695, %v1154_v33 }
0x376d   :  { %v2416_v2 = vpop.xlane.xlu1 %2415 }
0x376e   :  { %v2417_v10 = vsub.f32 %v2412_v40, %v2416_v2 }
0x3770   :  { %v2418_v11 = vmul.f32 1.442695, %v2417_v10 }
0x3771   :  { %v3258_v13 = vpop.xlane.xlu1 %3257 }
0x3772   :  { %5529 = vpow2.f32 %v2418_v11  ;;  %v3259_v14 = vsub.f32 %v3254_v45, %v3258_v13 }
0x3774   :  { %v3260_v15 = vmul.f32 1.442695, %v3259_v14 }
0x3776   :  { %5531 = vpow2.f32 %v3260_v15 }
0x377c   :  { %v5530_v16 = vpop.eup %5529 }
0x377d   :  { %2420 = vadd.xlane.f32.xlu1 %v5530_v16 }
0x3780   :  { %v5532_v36 = vpop.eup %5531 }
0x3781   :  { %3262 = vadd.xlane.f32.xlu1 %v5532_v36 }
0x378a   :  { %v738_v42 = vpop.xlane.xlu1 %737 }
0x378b   :  { %5533 = vlog2.f32 %v738_v42 }
0x378e   :  { %v1579_v48 = vpop.xlane.xlu1 %1578 }
0x378f   :  { %5535 = vlog2.f32 %v1579_v48 }
0x3790   :  { %5537 = vpow2.f32 %v1155_v55 }
0x3791   :  { %5539 = vpow2.f32 %v1997_v17 }
0x3792   :  { %5541 = vpow2.f32 %v2839_v19 }
0x3795   :  { %v5534_v53 = vpop.eup %5533 }
0x3796   :  { %v740_v57 = vmul.f32 0.6931472, %v5534_v53 }
0x3798   :  { %v741_v26 = vsub.f32 %v734_v54, %v740_v57 }
0x3799   :  { %v5536_v61 = vpop.eup %5535 }
0x379a   :  { %742 = vst [vmem:[#allocation3] sm:$0xff] %v741_v26  ;;  %v1581_v28 = vmul.f32 0.6931472, %v5536_v61  ;;  %v5538_v41 = vpop.eup %5537 }
0x379b   :  { %v5540_v6 = vpop.eup %5539 }
0x379c   :  { %v1582_v30 = vsub.f32 %v1575_v62, %v1581_v28  ;;  %v5542_v49 = vpop.eup %5541 }
0x379e   :  { %1584 = vst [vmem:[#allocation3 + $0x10] sm:$0xff] %v1582_v30 }
0x37fe   :  { %v3674_v25 = vpop.f32.mrb[38].mxu0 }
0x37ff   :  { %v3675_v29 = vadd.f32 %v6550_v32, %v3674_v25  ;;  %v4946_v20 = vpop.f32.mrb[39].mxu0 }
0x3801   :  { %3678 = vmax.xlane.f32.xlu0 %v3675_v29 }
0x3805   :  { %1157 = vadd.xlane.f32.xlu0 %v5538_v41 }
0x3809   :  { %1999 = vadd.xlane.f32.xlu0 %v5540_v6 }
0x380a   :  { %v2421_v21 = vpop.xlane.xlu1 %2420 }
0x380b   :  { %5543 = vlog2.f32 %v2421_v21 }
0x380d   :  { %2841 = vadd.xlane.f32.xlu0 %v5542_v49 }
0x380e   :  { %v3263_v22 = vpop.xlane.xlu1 %3262 }
0x380f   :  { %5545 = vlog2.f32 %v3263_v22 }
0x3815   :  { %v5544_v52 = vpop.eup %5543 }
0x3816   :  { %v2423_v3 = vmul.f32 0.6931472, %v5544_v52 }
0x3818   :  { %v2424_v56 = vsub.f32 %v2417_v10, %v2423_v3 }
0x3819   :  { %v5546_v24 = vpop.eup %5545 }
0x381a   :  { %2426 = vst [vmem:[#allocation3 + $0x20] sm:$0xff] %v2424_v56  ;;  %v3265_v23 = vmul.f32 0.6931472, %v5546_v24 }
0x381c   :  { %v3266_v58 = vsub.f32 %v3259_v14, %v3265_v23 }
0x381e   :  { %3268 = vst [vmem:[#allocation3 + $0x30] sm:$0xff] %v3266_v58 }
0x388e   :  { %v3679_v27 = vpop.xlane.xlu0 %3678 }
0x388f   :  { %v6571_v8 = vsub.f32 %v3675_v29, %v3679_v27 }
0x3891   :  { %v3681_v31 = vmul.f32 1.442695, %v6571_v8 }
0x3892   :  { %v1158_v32 = vpop.xlane.xlu0 %1157 }
0x3893   :  { %5547 = vpow2.f32 %v3681_v31 }
0x3894   :  { %5549 = vlog2.f32 %v1158_v32 }
0x3896   :  { %v2000_v34 = vpop.xlane.xlu0 %1999 }
0x3897   :  { %5551 = vlog2.f32 %v2000_v34 }
0x389a   :  { %v2842_v35 = vpop.xlane.xlu0 %2841 }
0x389b   :  { %5553 = vlog2.f32 %v2842_v35 }
0x389d   :  { %v5548_v38 = vpop.eup %5547 }
0x389e   :  { %v5550_v43 = vpop.eup %5549  ;;  %3683 = vadd.xlane.f32.xlu0 %v5548_v38 }
0x389f   :  { %v1160_v44 = vmul.f32 0.6931472, %v5550_v43 }
0x38a1   :  { %v5552_v46 = vpop.eup %5551  ;;  %v1161_v9 = vsub.f32 %v1154_v33, %v1160_v44 }
0x38a2   :  { %v2002_v47 = vmul.f32 0.6931472, %v5552_v46 }
0x38a3   :  { %1163 = vst [vmem:[#allocation3 + $0x8] sm:$0xff] %v1161_v9 }
0x38a4   :  { %v2003_v51 = vsub.f32 %v1996_v5, %v2002_v47 }
0x38a5   :  { %v5554_v39 = vpop.eup %5553 }
0x38a6   :  { %2005 = vst [vmem:[#allocation3 + $0x18] sm:$0xff] %v2003_v51  ;;  %v2844_v40 = vmul.f32 0.6931472, %v5554_v39 }
0x38a8   :  { %v2845_v45 = vsub.f32 %v2838_v18, %v2844_v40 }
0x38aa   :  { %2847 = vst [vmem:[#allocation3 + $0x28] sm:$0xff] %v2845_v45 }
0x38ab   :  { %5571 = shalt.err (!%p5568_p4)
}
0x38ac   :  { %s5572_s29 = scalar_lea.hbm %s6633_s13, 1024 }
0x38ad   :  { %p5573_p5 = scmp.ne.s32.totalorder %s6633_s13, %s5572_s29  ;;  %p5576_p6 = scmp.lt.u32.totalorder %s5572_s29, %s6633_s13 }
0x38af   :  { %p5578_p7 = pnand %p5576_p6, %p5573_p5 }
0x38b1   :  { %5581 = shalt.err (!%p5578_p7)
}
0x38b2   :  { %s5638_s17 = smov 128   ;;  %s5639_s18 = smov 8  }
0x38b3   :  { %3713 = dma.vmem_to_hbm [thread:$0]  %s3708_s2, 1024, %s6633_s13, [#allocation6], %s5638_s17, %s5638_s17, %s5639_s18  }
0x38b4   :  { %s5640_s19 = smov [#allocation7]  }
0x38b5   :  { %s3719_s20 = sshll.u32 %s5640_s19, 4  ;;  %s3720_s20 = int_to_ptr.vmem [resolvable:$true] %s3719_s20 }
0x38b6   :  { %s5582_s21 = scalar_lea.vmem %s3720_s20, 1024  ;;  %p5587_p9 = scmp.lt.s32.totalorder %s3720_s20, %s3720_s20 }
0x38b7   :  { %p5583_p8 = scmp.ne.s32.totalorder %s3720_s20, %s5582_s21  ;;  %p5588_p10 = scmp.lt.s32.totalorder %s5582_s21, %s5582_s21 }
0x38b9   :  { %p5589_p11 = por %p5588_p10, %p5587_p9 }
0x38bb   :  { %p5590_p12 = pnand %p5589_p11, %p5583_p8 }
0x38bd   :  { %5593 = shalt.err (!%p5590_p12)
}
0x38be   :  { %s5594_s4 = scalar_lea.hbm %s6634_s14, 1024 }
0x38bf   :  { %p5595_p13 = scmp.ne.s32.totalorder %s6634_s14, %s5594_s4  ;;  %p5598_p0 = scmp.lt.u32.totalorder %s5594_s4, %s6634_s14 }
0x38c1   :  { %p5600_p1 = pnand %p5598_p0, %p5595_p13 }
0x38c3   :  { %5603 = shalt.err (!%p5600_p1)
}
0x38c4   :  { %3725 = dma.vmem_to_hbm [thread:$0]  %s3720_s20, 1024, %s6634_s14, [#allocation6], %s5638_s17, %s5638_s17, %s5639_s18  }
0x38c5   :  { %s5641_s25 = smov [#allocation3]  }
0x38c6   :  { %s3695_s9 = sshll.u32 %s5641_s25, 4  ;;  %s3696_s9 = int_to_ptr.vmem [resolvable:$true] %s3695_s9 }
0x38c7   :  { %s5604_s1 = scalar_lea.vmem %s3696_s9, 1024  ;;  %p5609_p3 = scmp.lt.s32.totalorder %s3696_s9, %s3696_s9 }
0x38c8   :  { %p5605_p2 = scmp.ne.s32.totalorder %s3696_s9, %s5604_s1  ;;  %p5610_p4 = scmp.lt.s32.totalorder %s5604_s1, %s5604_s1 }
0x38ca   :  { %p5611_p5 = por %p5610_p4, %p5609_p3 }
0x38cc   :  { %p5612_p6 = pnand %p5611_p5, %p5605_p2 }
0x392b   :  { %v3684_v59 = vpop.xlane.xlu0 %3683 }
0x392c   :  { %5555 = vlog2.f32 %v3684_v59 }
0x3936   :  { %v5556_v54 = vpop.eup %5555 }
0x3937   :  { %v3686_v60 = vmul.f32 0.6931472, %v5556_v54 }
0x3939   :  { %v3687_v4 = vsub.f32 %v6571_v8, %v3686_v60 }
0x393b   :  { %3689 = vst [vmem:[#allocation3 + $0x38] sm:$0xff] %v3687_v4 }
0x393c   :  { %5615 = shalt.err (!%p5612_p6)
}
0x393d   :  { %s5616_s14 = scalar_lea.hbm %s6632_s12, 1024 }
0x393e   :  { %p5617_p7 = scmp.ne.s32.totalorder %s6632_s12, %s5616_s14  ;;  %p5620_p8 = scmp.lt.u32.totalorder %s5616_s14, %s6632_s12 }
0x3940   :  { %p5622_p9 = pnand %p5620_p8, %p5617_p7 }
0x3942   :  { %5625 = shalt.err (!%p5622_p9)
}
0x3943   :  { %3701 = dma.vmem_to_hbm [thread:$0]  %s3696_s9, 1024, %s6632_s12, [#allocation4], %s5638_s17, %s5638_s17, %s5639_s18  }
0x3944   :  { %5626 = dma.done.wait [#allocation4], 1024  }
0x3945   :  { %5627 = vsyncadd [#allocation4], 4294966272 }
0x3946   :  { %5628 = dma.done.wait [#allocation6], 2048  }
0x3947   :  { %5629 = vsyncadd [#allocation6], 4294965248 }
0x3948   :  { %3735 = vsyncpa [#allocation4], 1 }
0x3949   :  { %3736 = vsyncpa [#allocation6], 1 }

</bundles_post_ra>
